<compile_context>
chip_gen: v7x
topology: tpu7x:2x2x1
jax: 0.10.0
libtpu: 0.0.40
codegen_flags: <defaults>
</compile_context>

<pallas_src>
import functools

import jax
import jax.numpy as jnp
from jax.experimental import pallas as pl
from jax.experimental.pallas import tpu as pltpu


# --------------------------------------------------------------------------- helpers
def _round_up(x, m):
    return (x + m - 1) // m * m


# --------------------------------------------------------------------------- kernels
def _stats_kernel(x_ref, sum_ref, sq_ref):
    """Per-channel sum / sum-of-squares, accumulated across row tiles (f32).

    Outputs are (8, C) blocks (sublane-aligned); only row 0 carries data."""
    @pl.when(pl.program_id(1) == 0)
    def _():
        sum_ref[...] = jnp.zeros_like(sum_ref)
        sq_ref[...] = jnp.zeros_like(sq_ref)

    x = x_ref[...].astype(jnp.float32)
    sum_ref[0:1, :] += jnp.sum(x, axis=0, keepdims=True)
    sq_ref[0:1, :] += jnp.sum(x * x, axis=0, keepdims=True)


def _bn_relu_matmul_stats_kernel(a_ref, s_ref, t_ref, w_ref,
                                 z_ref, sum_ref, sq_ref, *, tm, m_true, m_pad):
    """z = relu(a*scale+shift) @ w  (BN1 fused into the 1x1 conv matmul), plus
    resident per-channel sum/sumsq of z (BN2 batch statistics)."""
    i = pl.program_id(0)

    @pl.when(i == 0)
    def _():
        sum_ref[...] = jnp.zeros_like(sum_ref)
        sq_ref[...] = jnp.zeros_like(sq_ref)

    a = a_ref[...].astype(jnp.float32)
    a = jnp.maximum(a * s_ref[...] + t_ref[...], 0.0)
    z = jnp.dot(a.astype(jnp.bfloat16), w_ref[...],
                preferred_element_type=jnp.float32)          # (tm, Cp) f32
    z_ref[...] = z.astype(z_ref.dtype)

    if m_pad > m_true:                        # mask padded rows out of the stats
        row = i * tm + jax.lax.broadcasted_iota(jnp.int32, (tm, 1), 0)
        z = jnp.where(row < m_true, z, 0.0)
    sum_ref[...] += jnp.sum(z, axis=0, keepdims=True)
    sq_ref[...] += jnp.sum(z * z, axis=0, keepdims=True)


def _bn_relu_conv3x3_kernel(z_ref, s_ref, t_ref, w_ref, o_ref, zpad_ref,
                            *, H, W, Cp, Ngp):
    """out = conv3x3(relu(z*scale+shift), w), one whole image per grid step.

    BN2 affine + ReLU is applied BEFORE zero padding (scratch border is zero),
    so halo pixels are exact zeros.  The 9 taps are streamed MXU matmuls over a
    VMEM-resident padded image -- no HBM im2col."""
    zpad_ref[...] = jnp.zeros_like(zpad_ref)
    z = z_ref[...].astype(jnp.float32)                        # (H, W, Cp)
    zn = jnp.maximum(z * s_ref[...] + t_ref[...], 0.0)        # (H, W, Cp)
    zpad_ref[1:H + 1, 1:W + 1, :] = zn

    acc = jnp.zeros((H * W, Ngp), jnp.float32)
    for t in range(9):                                        # static 9-tap unroll
        di, dj = t // 3, t % 3
        a = zpad_ref[di:di + H, dj:dj + W, :].reshape(H * W, Cp)
        acc = acc + jnp.dot(a.astype(jnp.bfloat16),
                            w_ref[t * Cp:(t + 1) * Cp, :],
                            preferred_element_type=jnp.float32)
    o_ref[...] = acc.reshape(H, W, Ngp).astype(o_ref.dtype)


# --------------------------------------------------------------------------- wrappers
def channel_stats(feat2d, k, true_m, tm=512):
    """Per-channel sum/sumsq over feat2d[:, :k] -> (mean, biased var), f32.

    Reads only the k-wide (128-aligned) channel prefix.  Optional 2-way
    'parallel' leading grid axis so both v7x TensorCores are used."""
    Mp = feat2d.shape[0]
    tm = min(tm, Mp)
    assert Mp % tm == 0
    total_steps = Mp // tm
    ncore = 2 if (total_steps % 2 == 0 and total_steps >= 2) else 1
    steps = total_steps // ncore

    s, sq = pl.pallas_call(
        _stats_kernel,
        out_shape=(jax.ShapeDtypeStruct((8 * ncore, k), jnp.float32),
                   jax.ShapeDtypeStruct((8 * ncore, k), jnp.float32)),
        grid=(ncore, steps),
        in_specs=[pl.BlockSpec((tm, k), lambda p, i: (p * steps + i, 0))],
        out_specs=(pl.BlockSpec((8, k), lambda p, i: (p, 0)),
                   pl.BlockSpec((8, k), lambda p, i: (p, 0))),
        compiler_params=pltpu.CompilerParams(
            dimension_semantics=("parallel", "arbitrary")),
    )(feat2d)

    inv_m = 1.0 / float(true_m)
    mean = jnp.sum(s, axis=0) * inv_m
    var = jnp.maximum(jnp.sum(sq, axis=0) * inv_m - mean * mean, 0.0)
    return mean, var


def bn_relu_conv1x1_with_stats(feat2d, scale, shift, w, true_m, tm=512):
    """relu(feat[:, :k]*scale+shift) @ w (bf16 MXU, f32 acc) + BN2 batch stats."""
    Mp = feat2d.shape[0]
    k = scale.shape[0]                      # 128-aligned channel prefix
    Cp = w.shape[1]
    tm = min(tm, Mp)
    assert Mp % tm == 0

    kern = functools.partial(_bn_relu_matmul_stats_kernel,
                             tm=tm, m_true=true_m, m_pad=Mp)
    z, s, sq = pl.pallas_call(
        kern,
        out_shape=(jax.ShapeDtypeStruct((Mp, Cp), jnp.bfloat16),
                   jax.ShapeDtypeStruct((1, Cp), jnp.float32),
                   jax.ShapeDtypeStruct((1, Cp), jnp.float32)),
        grid=(Mp // tm,),
        in_specs=[pl.BlockSpec((tm, k), lambda i: (i, 0)),
                  pl.BlockSpec((1, k), lambda i: (0, 0)),
                  pl.BlockSpec((1, k), lambda i: (0, 0)),
                  pl.BlockSpec((k, Cp), lambda i: (0, 0))],
        out_specs=(pl.BlockSpec((tm, Cp), lambda i: (i, 0)),
                   pl.BlockSpec((1, Cp), lambda i: (0, 0)),
                   pl.BlockSpec((1, Cp), lambda i: (0, 0))),
        compiler_params=pltpu.CompilerParams(
            dimension_semantics=("arbitrary",),   # stats are resident across rows
            vmem_limit_bytes=32 * 1024 * 1024),
    )(feat2d, scale.reshape(1, k), shift.reshape(1, k), w)

    inv_m = 1.0 / float(true_m)
    mean = s[0] * inv_m
    var = jnp.maximum(sq[0] * inv_m - mean * mean, 0.0)
    return z, mean, var


def bn_relu_conv3x3(z3d, scale, shift, w2, H, W, out_dtype=jnp.bfloat16):
    """Streamed 3x3 conv (pad=1) of relu(z*scale2+shift2), one image per step."""
    NH, _, Cp = z3d.shape
    N = NH // H
    Ngp = w2.shape[1]
    kern = functools.partial(_bn_relu_conv3x3_kernel, H=H, W=W, Cp=Cp, Ngp=Ngp)
    return pl.pallas_call(
        kern,
        out_shape=jax.ShapeDtypeStruct((NH, W, Ngp), out_dtype),
        grid=(N,),
        in_specs=[pl.BlockSpec((H, W, Cp), lambda n: (n, 0, 0)),
                  pl.BlockSpec((1, Cp), lambda n: (0, 0)),
                  pl.BlockSpec((1, Cp), lambda n: (0, 0)),
                  pl.BlockSpec((9 * Cp, Ngp), lambda n: (0, 0))],
        out_specs=pl.BlockSpec((H, W, Ngp), lambda n: (n, 0, 0)),
        scratch_shapes=[pltpu.VMEM((H + 2, W + 2, Cp), jnp.float32)],
        compiler_params=pltpu.CompilerParams(
            dimension_semantics=("parallel",),
            vmem_limit_bytes=32 * 1024 * 1024),
    )(z3d, scale.reshape(1, Cp), shift.reshape(1, Cp), w2)


# --------------------------------------------------------------------------- dense layer / block
def dense_layer_forward(layer_p, feat2d, valid_c, spatial, true_m, eps=1e-5):
    """One _DenseLayer: conv3x3(relu(bn2(conv1x1(relu(bn1(cat_features)))))).

    `feat2d` is the preallocated (Mp, C_pad) bf16 feature buffer; channels >=
    valid_c are still zero and are neutralized by zero BN gamma and zero weight
    rows, so this equals running the layer on torch.cat(features[:i+1], 1)."""
    N, H, W = spatial
    c_pad = feat2d.shape[1]
    k = min(_round_up(valid_c, 128), c_pad)   # channel prefix actually read

    # ---- BN1 (batch stats over the valid prefix), fused with ReLU + 1x1 conv +
    #      BN2 stats accumulation ----
    mean1, var1 = channel_stats(feat2d, k, true_m)
    gamma1 = jnp.zeros((k,), jnp.float32).at[:valid_c].set(layer_p["gamma1"])
    beta1 = jnp.zeros((k,), jnp.float32).at[:valid_c].set(layer_p["beta1"])
    scale1 = gamma1 * jax.lax.rsqrt(var1 + eps)
    shift1 = beta1 - mean1 * scale1
    w1 = layer_p["w1"][:k]                    # (k, Cp); rows >= valid_c are zero
    z, mean2, var2 = bn_relu_conv1x1_with_stats(feat2d, scale1, shift1, w1, true_m)

    # ---- BN2 affine + ReLU fused into the streamed 3x3 conv ----
    Cp = z.shape[1]
    scale2 = layer_p["gamma2"] * jax.lax.rsqrt(var2 + eps)
    shift2 = layer_p["beta2"] - mean2 * scale2
    z3d = z[:true_m].reshape(N * H, W, Cp)
    new = bn_relu_conv3x3(z3d, scale2, shift2, layer_p["w2"], H, W)
    return new.reshape(true_m, -1)            # (M, Ngp) bf16, lane-dense


def dense_block_forward(params, x_nchw, growth_rate, eps=1e-5):
    N, C_in, H, W = x_nchw.shape
    L = len(params["layers"])
    C_total = C_in + L * growth_rate
    M = N * H * W
    Mp = _round_up(M, 512)
    C_pad = _round_up(C_total, 128)

    # Single preallocated concat buffer, 2D (rows, lane-padded channels), bf16.
    x2d = jnp.transpose(x_nchw, (0, 2, 3, 1)).reshape(M, C_in).astype(jnp.bfloat16)
    feat = jnp.zeros((Mp, C_pad), jnp.bfloat16).at[:M, :C_in].set(x2d)

    for i, layer_p in enumerate(params["layers"]):
        valid_c = C_in + i * growth_rate
        new = dense_layer_forward(layer_p, feat, valid_c, (N, H, W), M, eps)
        feat = jax.lax.dynamic_update_slice(
            feat, new[:, :growth_rate].astype(jnp.bfloat16), (0, valid_c))

    # channel order == torch.cat([init] + layer_outputs, 1)
    out = feat[:M, :C_total].reshape(N, H, W, C_total)
    return jnp.transpose(out, (0, 3, 1, 2)).astype(jnp.float32)


# --------------------------------------------------------------------------- params
def init_dense_block_params(key, num_layers, num_input_features, growth_rate, bn_size=4):
    C_total = num_input_features + num_layers * growth_rate
    C_pad = _round_up(C_total, 128)
    Cmid = bn_size * growth_rate
    Cp = _round_up(Cmid, 128)
    Ngp = _round_up(growth_rate, 128)
    layers = []
    for i in range(num_layers):
        c_in = num_input_features + i * growth_rate
        key, k1, k2 = jax.random.split(key, 3)
        # conv1 (1x1, no bias): (c_in, Cmid), zero-padded rows/cols to (C_pad, Cp)
        w1 = 0.05 * jax.random.normal(k1, (c_in, Cmid), jnp.float32)
        w1_full = jnp.zeros((C_pad, Cp), jnp.float32).at[:c_in, :Cmid].set(w1)
        # conv2 (3x3, no bias): torch OIHW -> (kh,kw,Cin,O), pad per tap, flatten taps
        w2 = 0.05 * jax.random.normal(k2, (growth_rate, Cmid, 3, 3), jnp.float32)
        w2_t = jnp.transpose(w2, (2, 3, 1, 0))
        w2_t = jnp.pad(w2_t, ((0, 0), (0, 0), (0, Cp - Cmid), (0, Ngp - growth_rate)))
        layers.append({
            "gamma1": jnp.ones((c_in,), jnp.float32),
            "beta1": jnp.zeros((c_in,), jnp.float32),
            "w1": w1_full.astype(jnp.bfloat16),
            "gamma2": jnp.zeros((Cp,), jnp.float32).at[:Cmid].set(1.0),
            "beta2": jnp.zeros((Cp,), jnp.float32),
            "w2": w2_t.reshape(9 * Cp, Ngp).astype(jnp.bfloat16),
            # raw f32 weights, only used by the pure-JAX reference check
            "_w1_raw": w1,
            "_w2_raw": w2,
        })
    return {"layers": layers}


# --------------------------------------------------------------------------- reference
def dense_block_reference(params, x_nchw, eps=1e-5):
    """Pure-JAX f32 NCHW reference of the PyTorch module (training-mode BN)."""
    feats = [x_nchw]
    for layer_p in params["layers"]:
        x = jnp.concatenate(feats, axis=1)
        mean = jnp.mean(x, axis=(0, 2, 3))
        var = jnp.var(x, axis=(0, 2, 3))
        g1 = layer_p["gamma1"][None, :, None, None]
        b1 = layer_p["beta1"][None, :, None, None]
        xh = (x - mean[None, :, None, None]) * jax.lax.rsqrt(var + eps)[None, :, None, None]
        xh = jnp.maximum(xh * g1 + b1, 0.0)
        z = jnp.einsum("nchw,cm->nmhw", xh, layer_p["_w1_raw"])
        mean2 = jnp.mean(z, axis=(0, 2, 3))
        var2 = jnp.var(z, axis=(0, 2, 3))
        cmid = layer_p["_w1_raw"].shape[1]
        g2 = layer_p["gamma2"][:cmid][None, :, None, None]
        b2 = layer_p["beta2"][:cmid][None, :, None, None]
        zh = (z - mean2[None, :, None, None]) * jax.lax.rsqrt(var2 + eps)[None, :, None, None]
        zh = jnp.maximum(zh * g2 + b2, 0.0)
        new = jax.lax.conv_general_dilated(
            zh, layer_p["_w2_raw"], window_strides=(1, 1),
            padding=((1, 1), (1, 1)),
            dimension_numbers=("NCHW", "OIHW", "NCHW"))
        feats.append(new)
    return jnp.concatenate(feats, axis=1)


# --------------------------------------------------------------------------- main
if __name__ == "__main__":
    num_layers, growth_rate, bn_size = 3, 8, 4
    N, C_in, H, W = 2, 16, 16, 16

    key = jax.random.PRNGKey(0)
    pkey, xkey = jax.random.split(key)
    params = init_dense_block_params(pkey, num_layers, C_in, growth_rate, bn_size)
    x = jax.random.normal(xkey, (N, C_in, H, W), dtype=jnp.float32)    # NCHW like PyTorch

    fwd = jax.jit(functools.partial(dense_block_forward, growth_rate=growth_rate))
    out = jax.block_until_ready(fwd(params, x))

    expected_c = C_in + num_layers * growth_rate                       # 16 + 3*8 = 40
    assert out.shape == (N, expected_c, H, W), out.shape
    assert bool(jnp.all(jnp.isfinite(out)))

    # Numerical check vs a pure-JAX f32 reference (tolerances account for bf16
    # activation storage / bf16 MXU operands in the Pallas path).
    ref = dense_block_reference(params, x)
    max_err = float(jnp.max(jnp.abs(out - ref)))
    mean_err = float(jnp.mean(jnp.abs(out - ref)))
    assert max_err < 0.25, f"max abs err vs reference: {max_err}"
    assert mean_err < 0.03, f"mean abs err vs reference: {mean_err}"

    print("KERNEL_OK")
</pallas_src>

<mosaic_0001>
module attributes {stable_mosaic.version = 11 : i64} {
  func.func @_stats_kernel(%arg0: i32, %arg1: i32, %arg2: memref<512x128xbf16, #tpu.memory_space<vmem>>, %arg3: memref<8x128xf32, #tpu.memory_space<vmem>>, %arg4: memref<8x128xf32, #tpu.memory_space<vmem>>) attributes {dimension_semantics = [#tpu.dimension_semantics<parallel>, #tpu.dimension_semantics<arbitrary>], iteration_bounds = array<i64: 1, 1>, scalar_prefetch = 0 : i64, scratch_operands = 0 : i64, tpu.core_type = #tpu.core_type<tc>, window_params = [{transform_indices = @transform_0, window_bounds = array<i64: 512, 128>}, {transform_indices = @transform_1, window_bounds = array<i64: 8, 128>}, {transform_indices = @transform_2, window_bounds = array<i64: 8, 128>}]} {
    %c0_i32 = arith.constant 0 : i32
    %0 = arith.cmpi eq, %arg1, %c0_i32 : i32
    %1 = arith.extui %0 : i1 to i32
    %c0_i32_0 = arith.constant 0 : i32
    %2 = arith.cmpi ne, %1, %c0_i32_0 : i32
    scf.if %2 {
      %cst_11 = arith.constant 0.000000e+00 : f32
      %16 = vector.broadcast %cst_11 : f32 to vector<8x128xf32>
      %c0_12 = arith.constant 0 : index
      %c0_13 = arith.constant 0 : index
      %17 = vector.load %arg3[%c0_12, %c0_13] : memref<8x128xf32, #tpu.memory_space<vmem>>, vector<8x128xf32>
      tpu.vector_store %arg3[%c0_12, %c0_13], %16 {strides = array<i32>} : memref<8x128xf32, #tpu.memory_space<vmem>>, vector<8x128xf32>,
      %cst_14 = arith.constant 0.000000e+00 : f32
      %18 = vector.broadcast %cst_14 : f32 to vector<8x128xf32>
      %c0_15 = arith.constant 0 : index
      %c0_16 = arith.constant 0 : index
      %19 = vector.load %arg4[%c0_15, %c0_16] : memref<8x128xf32, #tpu.memory_space<vmem>>, vector<8x128xf32>
      tpu.vector_store %arg4[%c0_15, %c0_16], %18 {strides = array<i32>} : memref<8x128xf32, #tpu.memory_space<vmem>>, vector<8x128xf32>,
    } else {
    }
    %c0 = arith.constant 0 : index
    %c0_1 = arith.constant 0 : index
    %3 = vector.load %arg2[%c0, %c0_1] : memref<512x128xbf16, #tpu.memory_space<vmem>>, vector<512x128xbf16>
    %4 = arith.extf %3 : vector<512x128xbf16> to vector<512x128xf32>
    %c0_2 = arith.constant 0 : index
    %c0_3 = arith.constant 0 : index
    %5 = vector.load %arg3[%c0_2, %c0_3] : memref<8x128xf32, #tpu.memory_space<vmem>>, vector<1x128xf32>
    %cst = arith.constant dense<0.000000e+00> : vector<128xf32>
    %6 = vector.multi_reduction <add>, %4, %cst [0] : vector<512x128xf32> to vector<128xf32>
    %7 = vector.shape_cast %6 : vector<128xf32> to vector<1x128xf32>
    %8 = arith.addf %5, %7 : vector<1x128xf32>
    %c0_4 = arith.constant 0 : index
    %c0_5 = arith.constant 0 : index
    %9 = vector.load %arg3[%c0_4, %c0_5] : memref<8x128xf32, #tpu.memory_space<vmem>>, vector<1x128xf32>
    tpu.vector_store %arg3[%c0_4, %c0_5], %8 {strides = array<i32>} : memref<8x128xf32, #tpu.memory_space<vmem>>, vector<1x128xf32>,
    %c0_6 = arith.constant 0 : index
    %c0_7 = arith.constant 0 : index
    %10 = vector.load %arg4[%c0_6, %c0_7] : memref<8x128xf32, #tpu.memory_space<vmem>>, vector<1x128xf32>
    %11 = arith.mulf %4, %4 : vector<512x128xf32>
    %cst_8 = arith.constant dense<0.000000e+00> : vector<128xf32>
    %12 = vector.multi_reduction <add>, %11, %cst_8 [0] : vector<512x128xf32> to vector<128xf32>
    %13 = vector.shape_cast %12 : vector<128xf32> to vector<1x128xf32>
    %14 = arith.addf %10, %13 : vector<1x128xf32>
    %c0_9 = arith.constant 0 : index
    %c0_10 = arith.constant 0 : index
    %15 = vector.load %arg4[%c0_9, %c0_10] : memref<8x128xf32, #tpu.memory_space<vmem>>, vector<1x128xf32>
    tpu.vector_store %arg4[%c0_9, %c0_10], %14 {strides = array<i32>} : memref<8x128xf32, #tpu.memory_space<vmem>>, vector<1x128xf32>,
    return
  }
  func.func @transform_0(%arg0: i32, %arg1: i32) -> (i32, i32) {
    %c1_i32 = arith.constant 1 : i32
    %0 = arith.muli %arg0, %c1_i32 : i32
    %1 = arith.addi %0, %arg1 : i32
    %c0_i32 = arith.constant 0 : i32
    %c0_i32_0 = arith.constant 0 : i32
    return %1, %c0_i32 : i32, i32
  }
  func.func @transform_1(%arg0: i32, %arg1: i32) -> (i32, i32) {
    %c0_i32 = arith.constant 0 : i32
    %c0_i32_0 = arith.constant 0 : i32
    return %arg0, %c0_i32 : i32, i32
  }
  func.func @transform_2(%arg0: i32, %arg1: i32) -> (i32, i32) {
    %c0_i32 = arith.constant 0 : i32
    %c0_i32_0 = arith.constant 0 : i32
    return %arg0, %c0_i32 : i32, i32
  }
}

module attributes {stable_mosaic.version = 11 : i64} {
  func.func @_bn_relu_matmul_stats_kernel(%arg0: i32, %arg1: memref<512x128xbf16, #tpu.memory_space<vmem>>, %arg2: memref<1x128xf32, #tpu.memory_space<vmem>>, %arg3: memref<1x128xf32, #tpu.memory_space<vmem>>, %arg4: memref<128x128xbf16, #tpu.memory_space<vmem>>, %arg5: memref<512x128xbf16, #tpu.memory_space<vmem>>, %arg6: memref<1x128xf32, #tpu.memory_space<vmem>>, %arg7: memref<1x128xf32, #tpu.memory_space<vmem>>) attributes {dimension_semantics = [#tpu.dimension_semantics<arbitrary>], iteration_bounds = array<i64: 1>, scalar_prefetch = 0 : i64, scratch_operands = 0 : i64, tpu.core_type = #tpu.core_type<tc>, window_params = [{transform_indices = @transform_0, window_bounds = array<i64: 512, 128>}, {pipeline_mode = #tpu.pipeline_mode<synchronous>, transform_indices = @transform_1, window_bounds = array<i64: 1, 128>}, {pipeline_mode = #tpu.pipeline_mode<synchronous>, transform_indices = @transform_2, window_bounds = array<i64: 1, 128>}, {pipeline_mode = #tpu.pipeline_mode<synchronous>, transform_indices = @transform_3, window_bounds = array<i64: 128, 128>}, {transform_indices = @transform_4, window_bounds = array<i64: 512, 128>}, {pipeline_mode = #tpu.pipeline_mode<synchronous>, transform_indices = @transform_5, window_bounds = array<i64: 1, 128>}, {pipeline_mode = #tpu.pipeline_mode<synchronous>, transform_indices = @transform_6, window_bounds = array<i64: 1, 128>}]} {
    %c0_i32 = arith.constant 0 : i32
    %0 = arith.cmpi eq, %arg0, %c0_i32 : i32
    %1 = arith.extui %0 : i1 to i32
    %c0_i32_0 = arith.constant 0 : i32
    %2 = arith.cmpi ne, %1, %c0_i32_0 : i32
    scf.if %2 {
      %cst_21 = arith.constant 0.000000e+00 : f32
      %29 = vector.broadcast %cst_21 : f32 to vector<1x128xf32>
      %c0_22 = arith.constant 0 : index
      %c0_23 = arith.constant 0 : index
      %30 = vector.load %arg6[%c0_22, %c0_23] : memref<1x128xf32, #tpu.memory_space<vmem>>, vector<1x128xf32>
      tpu.vector_store %arg6[%c0_22, %c0_23], %29 {strides = array<i32>} : memref<1x128xf32, #tpu.memory_space<vmem>>, vector<1x128xf32>,
      %cst_24 = arith.constant 0.000000e+00 : f32
      %31 = vector.broadcast %cst_24 : f32 to vector<1x128xf32>
      %c0_25 = arith.constant 0 : index
      %c0_26 = arith.constant 0 : index
      %32 = vector.load %arg7[%c0_25, %c0_26] : memref<1x128xf32, #tpu.memory_space<vmem>>, vector<1x128xf32>
      tpu.vector_store %arg7[%c0_25, %c0_26], %31 {strides = array<i32>} : memref<1x128xf32, #tpu.memory_space<vmem>>, vector<1x128xf32>,
    } else {
    }
    %c0 = arith.constant 0 : index
    %c0_1 = arith.constant 0 : index
    %3 = vector.load %arg1[%c0, %c0_1] : memref<512x128xbf16, #tpu.memory_space<vmem>>, vector<512x128xbf16>
    %4 = arith.extf %3 : vector<512x128xbf16> to vector<512x128xf32>
    %c0_2 = arith.constant 0 : index
    %c0_3 = arith.constant 0 : index
    %5 = vector.load %arg2[%c0_2, %c0_3] : memref<1x128xf32, #tpu.memory_space<vmem>>, vector<1x128xf32>
    %6 = vector.broadcast %5 : vector<1x128xf32> to vector<512x128xf32>
    %7 = arith.mulf %4, %6 : vector<512x128xf32>
    %c0_4 = arith.constant 0 : index
    %c0_5 = arith.constant 0 : index
    %8 = vector.load %arg3[%c0_4, %c0_5] : memref<1x128xf32, #tpu.memory_space<vmem>>, vector<1x128xf32>
    %9 = vector.broadcast %8 : vector<1x128xf32> to vector<512x128xf32>
    %10 = arith.addf %7, %9 : vector<512x128xf32>
    %cst = arith.constant 0.000000e+00 : f32
    %11 = vector.broadcast %cst : f32 to vector<512x128xf32>
    %12 = arith.maximumf %10, %11 : vector<512x128xf32>
    %13 = arith.truncf %12 : vector<512x128xf32> to vector<512x128xbf16>
    %c0_6 = arith.constant 0 : index
    %c0_7 = arith.constant 0 : index
    %14 = vector.load %arg4[%c0_6, %c0_7] : memref<128x128xbf16, #tpu.memory_space<vmem>>, vector<128x128xbf16>
    %cst_8 = arith.constant dense<0.000000e+00> : vector<512x128xf32>
    %15 = tpu.matmul %13, %14, %cst_8 {dimension_numbers = #tpu.dot_dimension_numbers<[1], [0], [0], [1], [0, 0, 1, 1], [], []>} : vector<512x128xbf16>, vector<128x128xbf16>, vector<512x128xf32> -> vector<512x128xf32>
    %16 = arith.truncf %15 : vector<512x128xf32> to vector<512x128xbf16>
    %c0_9 = arith.constant 0 : index
    %c0_10 = arith.constant 0 : index
    %17 = vector.load %arg5[%c0_9, %c0_10] : memref<512x128xbf16, #tpu.memory_space<vmem>>, vector<512x128xbf16>
    tpu.vector_store %arg5[%c0_9, %c0_10], %16 {strides = array<i32>} : memref<512x128xbf16, #tpu.memory_space<vmem>>, vector<512x128xbf16>,
    %c0_11 = arith.constant 0 : index
    %c0_12 = arith.constant 0 : index
    %18 = vector.load %arg6[%c0_11, %c0_12] : memref<1x128xf32, #tpu.memory_space<vmem>>, vector<1x128xf32>
    %cst_13 = arith.constant dense<0.000000e+00> : vector<128xf32>
    %19 = vector.multi_reduction <add>, %15, %cst_13 [0] : vector<512x128xf32> to vector<128xf32>
    %20 = vector.shape_cast %19 : vector<128xf32> to vector<1x128xf32>
    %21 = arith.addf %18, %20 : vector<1x128xf32>
    %c0_14 = arith.constant 0 : index
    %c0_15 = arith.constant 0 : index
    %22 = vector.load %arg6[%c0_14, %c0_15] : memref<1x128xf32, #tpu.memory_space<vmem>>, vector<1x128xf32>
    tpu.vector_store %arg6[%c0_14, %c0_15], %21 {strides = array<i32>} : memref<1x128xf32, #tpu.memory_space<vmem>>, vector<1x128xf32>,
    %c0_16 = arith.constant 0 : index
    %c0_17 = arith.constant 0 : index
    %23 = vector.load %arg7[%c0_16, %c0_17] : memref<1x128xf32, #tpu.memory_space<vmem>>, vector<1x128xf32>
    %24 = arith.mulf %15, %15 : vector<512x128xf32>
    %cst_18 = arith.constant dense<0.000000e+00> : vector<128xf32>
    %25 = vector.multi_reduction <add>, %24, %cst_18 [0] : vector<512x128xf32> to vector<128xf32>
    %26 = vector.shape_cast %25 : vector<128xf32> to vector<1x128xf32>
    %27 = arith.addf %23, %26 : vector<1x128xf32>
    %c0_19 = arith.constant 0 : index
    %c0_20 = arith.constant 0 : index
    %28 = vector.load %arg7[%c0_19, %c0_20] : memref<1x128xf32, #tpu.memory_space<vmem>>, vector<1x128xf32>
    tpu.vector_store %arg7[%c0_19, %c0_20], %27 {strides = array<i32>} : memref<1x128xf32, #tpu.memory_space<vmem>>, vector<1x128xf32>,
    return
  }
  func.func @transform_0(%arg0: i32) -> (i32, i32) {
    %c0_i32 = arith.constant 0 : i32
    %c0_i32_0 = arith.constant 0 : i32
    return %arg0, %c0_i32 : i32, i32
  }
  func.func @transform_1(%arg0: i32) -> (i32, i32) {
    %c0_i32 = arith.constant 0 : i32
    %c0_i32_0 = arith.constant 0 : i32
    %c0_i32_1 = arith.constant 0 : i32
    return %c0_i32, %c0_i32_0 : i32, i32
  }
  func.func @transform_2(%arg0: i32) -> (i32, i32) {
    %c0_i32 = arith.constant 0 : i32
    %c0_i32_0 = arith.constant 0 : i32
    %c0_i32_1 = arith.constant 0 : i32
    return %c0_i32, %c0_i32_0 : i32, i32
  }
  func.func @transform_3(%arg0: i32) -> (i32, i32) {
    %c0_i32 = arith.constant 0 : i32
    %c0_i32_0 = arith.constant 0 : i32
    %c0_i32_1 = arith.constant 0 : i32
    return %c0_i32, %c0_i32_0 : i32, i32
  }
  func.func @transform_4(%arg0: i32) -> (i32, i32) {
    %c0_i32 = arith.constant 0 : i32
    %c0_i32_0 = arith.constant 0 : i32
    return %arg0, %c0_i32 : i32, i32
  }
  func.func @transform_5(%arg0: i32) -> (i32, i32) {
    %c0_i32 = arith.constant 0 : i32
    %c0_i32_0 = arith.constant 0 : i32
    %c0_i32_1 = arith.constant 0 : i32
    return %c0_i32, %c0_i32_0 : i32, i32
  }
  func.func @transform_6(%arg0: i32) -> (i32, i32) {
    %c0_i32 = arith.constant 0 : i32
    %c0_i32_0 = arith.constant 0 : i32
    %c0_i32_1 = arith.constant 0 : i32
    return %c0_i32, %c0_i32_0 : i32, i32
  }
}

module attributes {stable_mosaic.version = 11 : i64} {
  func.func @_bn_relu_conv3x3_kernel(%arg0: i32, %arg1: memref<16x16x128xbf16, #tpu.memory_space<vmem>>, %arg2: memref<1x128xf32, #tpu.memory_space<vmem>>, %arg3: memref<1x128xf32, #tpu.memory_space<vmem>>, %arg4: memref<1152x128xbf16, #tpu.memory_space<vmem>>, %arg5: memref<16x16x128xbf16, #tpu.memory_space<vmem>>, %arg6: memref<18x18x128xf32, #tpu.memory_space<vmem>>) attributes {dimension_semantics = [#tpu.dimension_semantics<parallel>], iteration_bounds = array<i64: 2>, scalar_prefetch = 0 : i64, scratch_operands = 1 : i64, tpu.core_type = #tpu.core_type<tc>, window_params = [{transform_indices = @transform_0, window_bounds = array<i64: 16, 16, 128>}, {pipeline_mode = #tpu.pipeline_mode<synchronous>, transform_indices = @transform_1, window_bounds = array<i64: 1, 128>}, {pipeline_mode = #tpu.pipeline_mode<synchronous>, transform_indices = @transform_2, window_bounds = array<i64: 1, 128>}, {pipeline_mode = #tpu.pipeline_mode<synchronous>, transform_indices = @transform_3, window_bounds = array<i64: 1152, 128>}, {transform_indices = @transform_4, window_bounds = array<i64: 16, 16, 128>}]} {
    %cst = arith.constant 0.000000e+00 : f32
    %0 = vector.broadcast %cst : f32 to vector<18x18x128xf32>
    %c0 = arith.constant 0 : index
    %c0_0 = arith.constant 0 : index
    %c0_1 = arith.constant 0 : index
    %1 = vector.load %arg6[%c0, %c0_0, %c0_1] : memref<18x18x128xf32, #tpu.memory_space<vmem>>, vector<18x18x128xf32>
    tpu.vector_store %arg6[%c0, %c0_0, %c0_1], %0 {strides = array<i32>} : memref<18x18x128xf32, #tpu.memory_space<vmem>>, vector<18x18x128xf32>,
    %c0_2 = arith.constant 0 : index
    %c0_3 = arith.constant 0 : index
    %c0_4 = arith.constant 0 : index
    %2 = vector.load %arg1[%c0_2, %c0_3, %c0_4] : memref<16x16x128xbf16, #tpu.memory_space<vmem>>, vector<16x16x128xbf16>
    %3 = arith.extf %2 : vector<16x16x128xbf16> to vector<16x16x128xf32>
    %c0_5 = arith.constant 0 : index
    %c0_6 = arith.constant 0 : index
    %4 = vector.load %arg2[%c0_5, %c0_6] : memref<1x128xf32, #tpu.memory_space<vmem>>, vector<1x128xf32>
    %5 = vector.shape_cast %4 : vector<1x128xf32> to vector<1x1x128xf32>
    %6 = vector.broadcast %5 : vector<1x1x128xf32> to vector<16x16x128xf32>
    %7 = arith.mulf %3, %6 : vector<16x16x128xf32>
    %c0_7 = arith.constant 0 : index
    %c0_8 = arith.constant 0 : index
    %8 = vector.load %arg3[%c0_7, %c0_8] : memref<1x128xf32, #tpu.memory_space<vmem>>, vector<1x128xf32>
    %9 = vector.shape_cast %8 : vector<1x128xf32> to vector<1x1x128xf32>
    %10 = vector.broadcast %9 : vector<1x1x128xf32> to vector<16x16x128xf32>
    %11 = arith.addf %7, %10 : vector<16x16x128xf32>
    %cst_9 = arith.constant 0.000000e+00 : f32
    %12 = vector.broadcast %cst_9 : f32 to vector<16x16x128xf32>
    %13 = arith.maximumf %11, %12 : vector<16x16x128xf32>
    %c1 = arith.constant 1 : index
    %c1_10 = arith.constant 1 : index
    %c0_11 = arith.constant 0 : index
    %14 = vector.load %arg6[%c1, %c1_10, %c0_11] : memref<18x18x128xf32, #tpu.memory_space<vmem>>, vector<16x16x128xf32>
    tpu.vector_store %arg6[%c1, %c1_10, %c0_11], %13 {strides = array<i32>} : memref<18x18x128xf32, #tpu.memory_space<vmem>>, vector<16x16x128xf32>,
    %cst_12 = arith.constant 0.000000e+00 : f32
    %15 = vector.broadcast %cst_12 : f32 to vector<256x128xf32>
    %c0_13 = arith.constant 0 : index
    %c0_14 = arith.constant 0 : index
    %c0_15 = arith.constant 0 : index
    %16 = vector.load %arg6[%c0_13, %c0_14, %c0_15] : memref<18x18x128xf32, #tpu.memory_space<vmem>>, vector<16x16x128xf32>
    %17 = vector.shape_cast %16 : vector<16x16x128xf32> to vector<256x128xf32>
    %18 = arith.truncf %17 : vector<256x128xf32> to vector<256x128xbf16>
    %c0_16 = arith.constant 0 : index
    %c0_17 = arith.constant 0 : index
    %19 = vector.load %arg4[%c0_16, %c0_17] : memref<1152x128xbf16, #tpu.memory_space<vmem>>, vector<128x128xbf16>
    %cst_18 = arith.constant dense<0.000000e+00> : vector<256x128xf32>
    %20 = tpu.matmul %18, %19, %cst_18 {dimension_numbers = #tpu.dot_dimension_numbers<[1], [0], [0], [1], [0, 0, 1, 1], [], []>} : vector<256x128xbf16>, vector<128x128xbf16>, vector<256x128xf32> -> vector<256x128xf32>
    %21 = arith.addf %15, %20 : vector<256x128xf32>
    %c0_19 = arith.constant 0 : index
    %c1_20 = arith.constant 1 : index
    %c0_21 = arith.constant 0 : index
    %22 = vector.load %arg6[%c0_19, %c1_20, %c0_21] : memref<18x18x128xf32, #tpu.memory_space<vmem>>, vector<16x16x128xf32>
    %23 = vector.shape_cast %22 : vector<16x16x128xf32> to vector<256x128xf32>
    %24 = arith.truncf %23 : vector<256x128xf32> to vector<256x128xbf16>
    %c128 = arith.constant 128 : index
    %c0_22 = arith.constant 0 : index
    %25 = vector.load %arg4[%c128, %c0_22] : memref<1152x128xbf16, #tpu.memory_space<vmem>>, vector<128x128xbf16>
    %cst_23 = arith.constant dense<0.000000e+00> : vector<256x128xf32>
    %26 = tpu.matmul %24, %25, %cst_23 {dimension_numbers = #tpu.dot_dimension_numbers<[1], [0], [0], [1], [0, 0, 1, 1], [], []>} : vector<256x128xbf16>, vector<128x128xbf16>, vector<256x128xf32> -> vector<256x128xf32>
    %27 = arith.addf %21, %26 : vector<256x128xf32>
    %c0_24 = arith.constant 0 : index
    %c2 = arith.constant 2 : index
    %c0_25 = arith.constant 0 : index
    %28 = vector.load %arg6[%c0_24, %c2, %c0_25] : memref<18x18x128xf32, #tpu.memory_space<vmem>>, vector<16x16x128xf32>
    %29 = vector.shape_cast %28 : vector<16x16x128xf32> to vector<256x128xf32>
    %30 = arith.truncf %29 : vector<256x128xf32> to vector<256x128xbf16>
    %c256 = arith.constant 256 : index
    %c0_26 = arith.constant 0 : index
    %31 = vector.load %arg4[%c256, %c0_26] : memref<1152x128xbf16, #tpu.memory_space<vmem>>, vector<128x128xbf16>
    %cst_27 = arith.constant dense<0.000000e+00> : vector<256x128xf32>
    %32 = tpu.matmul %30, %31, %cst_27 {dimension_numbers = #tpu.dot_dimension_numbers<[1], [0], [0], [1], [0, 0, 1, 1], [], []>} : vector<256x128xbf16>, vector<128x128xbf16>, vector<256x128xf32> -> vector<256x128xf32>
    %33 = arith.addf %27, %32 : vector<256x128xf32>
    %c1_28 = arith.constant 1 : index
    %c0_29 = arith.constant 0 : index
    %c0_30 = arith.constant 0 : index
    %34 = vector.load %arg6[%c1_28, %c0_29, %c0_30] : memref<18x18x128xf32, #tpu.memory_space<vmem>>, vector<16x16x128xf32>
    %35 = vector.shape_cast %34 : vector<16x16x128xf32> to vector<256x128xf32>
    %36 = arith.truncf %35 : vector<256x128xf32> to vector<256x128xbf16>
    %c384 = arith.constant 384 : index
    %c0_31 = arith.constant 0 : index
    %37 = vector.load %arg4[%c384, %c0_31] : memref<1152x128xbf16, #tpu.memory_space<vmem>>, vector<128x128xbf16>
    %cst_32 = arith.constant dense<0.000000e+00> : vector<256x128xf32>
    %38 = tpu.matmul %36, %37, %cst_32 {dimension_numbers = #tpu.dot_dimension_numbers<[1], [0], [0], [1], [0, 0, 1, 1], [], []>} : vector<256x128xbf16>, vector<128x128xbf16>, vector<256x128xf32> -> vector<256x128xf32>
    %39 = arith.addf %33, %38 : vector<256x128xf32>
    %c1_33 = arith.constant 1 : index
    %c1_34 = arith.constant 1 : index
    %c0_35 = arith.constant 0 : index
    %40 = vector.load %arg6[%c1_33, %c1_34, %c0_35] : memref<18x18x128xf32, #tpu.memory_space<vmem>>, vector<16x16x128xf32>
    %41 = vector.shape_cast %40 : vector<16x16x128xf32> to vector<256x128xf32>
    %42 = arith.truncf %41 : vector<256x128xf32> to vector<256x128xbf16>
    %c512 = arith.constant 512 : index
    %c0_36 = arith.constant 0 : index
    %43 = vector.load %arg4[%c512, %c0_36] : memref<1152x128xbf16, #tpu.memory_space<vmem>>, vector<128x128xbf16>
    %cst_37 = arith.constant dense<0.000000e+00> : vector<256x128xf32>
    %44 = tpu.matmul %42, %43, %cst_37 {dimension_numbers = #tpu.dot_dimension_numbers<[1], [0], [0], [1], [0, 0, 1, 1], [], []>} : vector<256x128xbf16>, vector<128x128xbf16>, vector<256x128xf32> -> vector<256x128xf32>
    %45 = arith.addf %39, %44 : vector<256x128xf32>
    %c1_38 = arith.constant 1 : index
    %c2_39 = arith.constant 2 : index
    %c0_40 = arith.constant 0 : index
    %46 = vector.load %arg6[%c1_38, %c2_39, %c0_40] : memref<18x18x128xf32, #tpu.memory_space<vmem>>, vector<16x16x128xf32>
    %47 = vector.shape_cast %46 : vector<16x16x128xf32> to vector<256x128xf32>
    %48 = arith.truncf %47 : vector<256x128xf32> to vector<256x128xbf16>
    %c640 = arith.constant 640 : index
    %c0_41 = arith.constant 0 : index
    %49 = vector.load %arg4[%c640, %c0_41] : memref<1152x128xbf16, #tpu.memory_space<vmem>>, vector<128x128xbf16>
    %cst_42 = arith.constant dense<0.000000e+00> : vector<256x128xf32>
    %50 = tpu.matmul %48, %49, %cst_42 {dimension_numbers = #tpu.dot_dimension_numbers<[1], [0], [0], [1], [0, 0, 1, 1], [], []>} : vector<256x128xbf16>, vector<128x128xbf16>, vector<256x128xf32> -> vector<256x128xf32>
    %51 = arith.addf %45, %50 : vector<256x128xf32>
    %c2_43 = arith.constant 2 : index
    %c0_44 = arith.constant 0 : index
    %c0_45 = arith.constant 0 : index
    %52 = vector.load %arg6[%c2_43, %c0_44, %c0_45] : memref<18x18x128xf32, #tpu.memory_space<vmem>>, vector<16x16x128xf32>
    %53 = vector.shape_cast %52 : vector<16x16x128xf32> to vector<256x128xf32>
    %54 = arith.truncf %53 : vector<256x128xf32> to vector<256x128xbf16>
    %c768 = arith.constant 768 : index
    %c0_46 = arith.constant 0 : index
    %55 = vector.load %arg4[%c768, %c0_46] : memref<1152x128xbf16, #tpu.memory_space<vmem>>, vector<128x128xbf16>
    %cst_47 = arith.constant dense<0.000000e+00> : vector<256x128xf32>
    %56 = tpu.matmul %54, %55, %cst_47 {dimension_numbers = #tpu.dot_dimension_numbers<[1], [0], [0], [1], [0, 0, 1, 1], [], []>} : vector<256x128xbf16>, vector<128x128xbf16>, vector<256x128xf32> -> vector<256x128xf32>
    %57 = arith.addf %51, %56 : vector<256x128xf32>
    %c2_48 = arith.constant 2 : index
    %c1_49 = arith.constant 1 : index
    %c0_50 = arith.constant 0 : index
    %58 = vector.load %arg6[%c2_48, %c1_49, %c0_50] : memref<18x18x128xf32, #tpu.memory_space<vmem>>, vector<16x16x128xf32>
    %59 = vector.shape_cast %58 : vector<16x16x128xf32> to vector<256x128xf32>
    %60 = arith.truncf %59 : vector<256x128xf32> to vector<256x128xbf16>
    %c896 = arith.constant 896 : index
    %c0_51 = arith.constant 0 : index
    %61 = vector.load %arg4[%c896, %c0_51] : memref<1152x128xbf16, #tpu.memory_space<vmem>>, vector<128x128xbf16>
    %cst_52 = arith.constant dense<0.000000e+00> : vector<256x128xf32>
    %62 = tpu.matmul %60, %61, %cst_52 {dimension_numbers = #tpu.dot_dimension_numbers<[1], [0], [0], [1], [0, 0, 1, 1], [], []>} : vector<256x128xbf16>, vector<128x128xbf16>, vector<256x128xf32> -> vector<256x128xf32>
    %63 = arith.addf %57, %62 : vector<256x128xf32>
    %c2_53 = arith.constant 2 : index
    %c2_54 = arith.constant 2 : index
    %c0_55 = arith.constant 0 : index
    %64 = vector.load %arg6[%c2_53, %c2_54, %c0_55] : memref<18x18x128xf32, #tpu.memory_space<vmem>>, vector<16x16x128xf32>
    %65 = vector.shape_cast %64 : vector<16x16x128xf32> to vector<256x128xf32>
    %66 = arith.truncf %65 : vector<256x128xf32> to vector<256x128xbf16>
    %c1024 = arith.constant 1024 : index
    %c0_56 = arith.constant 0 : index
    %67 = vector.load %arg4[%c1024, %c0_56] : memref<1152x128xbf16, #tpu.memory_space<vmem>>, vector<128x128xbf16>
    %cst_57 = arith.constant dense<0.000000e+00> : vector<256x128xf32>
    %68 = tpu.matmul %66, %67, %cst_57 {dimension_numbers = #tpu.dot_dimension_numbers<[1], [0], [0], [1], [0, 0, 1, 1], [], []>} : vector<256x128xbf16>, vector<128x128xbf16>, vector<256x128xf32> -> vector<256x128xf32>
    %69 = arith.addf %63, %68 : vector<256x128xf32>
    %70 = vector.shape_cast %69 : vector<256x128xf32> to vector<16x16x128xf32>
    %71 = arith.truncf %70 : vector<16x16x128xf32> to vector<16x16x128xbf16>
    %c0_58 = arith.constant 0 : index
    %c0_59 = arith.constant 0 : index
    %c0_60 = arith.constant 0 : index
    %72 = vector.load %arg5[%c0_58, %c0_59, %c0_60] : memref<16x16x128xbf16, #tpu.memory_space<vmem>>, vector<16x16x128xbf16>
    tpu.vector_store %arg5[%c0_58, %c0_59, %c0_60], %71 {strides = array<i32>} : memref<16x16x128xbf16, #tpu.memory_space<vmem>>, vector<16x16x128xbf16>,
    return
  }
  func.func @transform_0(%arg0: i32) -> (i32, i32, i32) {
    %c0_i32 = arith.constant 0 : i32
    %c0_i32_0 = arith.constant 0 : i32
    %c0_i32_1 = arith.constant 0 : i32
    return %arg0, %c0_i32, %c0_i32_0 : i32, i32, i32
  }
  func.func @transform_1(%arg0: i32) -> (i32, i32) {
    %c0_i32 = arith.constant 0 : i32
    %c0_i32_0 = arith.constant 0 : i32
    %c0_i32_1 = arith.constant 0 : i32
    return %c0_i32, %c0_i32_0 : i32, i32
  }
  func.func @transform_2(%arg0: i32) -> (i32, i32) {
    %c0_i32 = arith.constant 0 : i32
    %c0_i32_0 = arith.constant 0 : i32
    %c0_i32_1 = arith.constant 0 : i32
    return %c0_i32, %c0_i32_0 : i32, i32
  }
  func.func @transform_3(%arg0: i32) -> (i32, i32) {
    %c0_i32 = arith.constant 0 : i32
    %c0_i32_0 = arith.constant 0 : i32
    %c0_i32_1 = arith.constant 0 : i32
    return %c0_i32, %c0_i32_0 : i32, i32
  }
  func.func @transform_4(%arg0: i32) -> (i32, i32, i32) {
    %c0_i32 = arith.constant 0 : i32
    %c0_i32_0 = arith.constant 0 : i32
    %c0_i32_1 = arith.constant 0 : i32
    return %arg0, %c0_i32, %c0_i32_0 : i32, i32, i32
  }
}

</mosaic_0001>

<bundles_post_ra>
// kernel: dense_block_forward.9
= control target key start
LH: loop header
LB: loop body
LE: loop exit
PB: predicated region body
PF: predicated region fallthrough
CT: control target
= control target key end

     0   :  { %v548_v0 = vmov 0.0   ;;  %s678_s1 = inlined_call_operand.vmem [shape: f32[8,128], index: 1, kind: output, shape index: {0}]   ;;  %s679_s2 = inlined_call_operand.vmem [shape: f32[8,128], index: 2, kind: output, shape index: {1}]   ;;  %s680_s0 = inlined_call_operand.vmem [shape: bf16[512,128], index: 0, kind: input, shape index: {}]  }
   0x1   :  { %36 = vst [vmem:[%s678_s1] sm:$0xff] %v548_v0  ;;  %37 = vst [vmem:[%s679_s2] sm:$0xff] %v548_v0  ;;  %v389_v1 = vld [vmem:[%s680_s0] sm:$0xff]   ;;  %v516_v2 = vld [vmem:[%s680_s0 + $0x8] sm:$0xff]  }
   0x2   :  { %v390_v3 = vunpack.c.l.bf16 %v389_v1  ;;  %v391_v4 = vunpack.c.h.bf16 %v389_v1  ;;  %v394_v5 = vunpack.c.l.bf16 %v516_v2  ;;  %v517_v7 = vld [vmem:[%s680_s0 + $0x10] sm:$0xff]   ;;  %v395_v8 = vunpack.c.h.bf16 %v516_v2  ;;  %v518_v12 = vld [vmem:[%s680_s0 + $0x18] sm:$0xff]   ;;  %v519_v17 = vld [vmem:[%s680_s0 + $0x20] sm:$0xff]  }
   0x3   :  { %v398_v10 = vunpack.c.l.bf16 %v517_v7  ;;  %v399_v13 = vunpack.c.h.bf16 %v517_v7  ;;  %v402_v15 = vunpack.c.l.bf16 %v518_v12  ;;  %v403_v18 = vunpack.c.h.bf16 %v518_v12  ;;  %v520_v22 = vld [vmem:[%s680_s0 + $0x28] sm:$0xff]   ;;  %v521_v30 = vld [vmem:[%s680_s0 + $0x30] sm:$0xff]   ;;  %v522_v39 = vld [vmem:[%s680_s0 + $0x38] sm:$0xff]  }
   0x4   :  { %v167_v6 = vadd.f32 %v391_v4, %v390_v3  ;;  %v406_v20 = vunpack.c.l.bf16 %v519_v17  ;;  %v407_v23 = vunpack.c.h.bf16 %v519_v17  ;;  %v239_v25 = vmul.f32 %v390_v3, %v390_v3  ;;  %v523_v48 = vld [vmem:[%s680_s0 + $0x40] sm:$0xff]   ;;  %v524_v57 = vld [vmem:[%s680_s0 + $0x48] sm:$0xff]   ;;  %v525_v2 = vld [vmem:[%s680_s0 + $0x50] sm:$0xff]  }
   0x5   :  { %v240_v26 = vmul.f32 %v391_v4, %v391_v4  ;;  %v410_v27 = vunpack.c.l.bf16 %v520_v22  ;;  %v241_v29 = vmul.f32 %v394_v5, %v394_v5  ;;  %v411_v31 = vunpack.c.h.bf16 %v520_v22 }
   0x6   :  { %v168_v9 = vadd.f32 %v394_v5, %v167_v6  ;;  %v242_v33 = vmul.f32 %v395_v8, %v395_v8  ;;  %v414_v35 = vunpack.c.l.bf16 %v521_v30  ;;  %v243_v37 = vmul.f32 %v398_v10, %v398_v10 }
   0x7   :  { %v303_v34 = vadd.f32 %v240_v26, %v239_v25  ;;  %v415_v40 = vunpack.c.h.bf16 %v521_v30  ;;  %v244_v42 = vmul.f32 %v399_v13, %v399_v13  ;;  %v418_v44 = vunpack.c.l.bf16 %v522_v39 }
   0x8   :  { %v169_v11 = vadd.f32 %v395_v8, %v168_v9  ;;  %v245_v46 = vmul.f32 %v402_v15, %v402_v15  ;;  %v419_v49 = vunpack.c.h.bf16 %v522_v39  ;;  %v246_v51 = vmul.f32 %v403_v18, %v403_v18 }
   0x9   :  { %v304_v38 = vadd.f32 %v303_v34, %v241_v29  ;;  %v422_v53 = vunpack.c.l.bf16 %v523_v48  ;;  %v247_v55 = vmul.f32 %v406_v20, %v406_v20  ;;  %v423_v58 = vunpack.c.h.bf16 %v523_v48  ;;  %v528_v29 = vld [vmem:[%s680_s0 + $0x68] sm:$0xff]  }
   0xa   :  { %v170_v14 = vadd.f32 %v398_v10, %v169_v11  ;;  %v248_v60 = vmul.f32 %v407_v23, %v407_v23  ;;  %v426_v62 = vunpack.c.l.bf16 %v524_v57  ;;  %v249_v0 = vmul.f32 %v410_v27, %v410_v27  ;;  %v526_v11 = vld [vmem:[%s680_s0 + $0x58] sm:$0xff]  }
   0xb   :  { %v305_v43 = vadd.f32 %v304_v38, %v242_v33  ;;  %v427_v3 = vunpack.c.h.bf16 %v524_v57  ;;  %v250_v5 = vmul.f32 %v411_v31, %v411_v31  ;;  %v430_v7 = vunpack.c.l.bf16 %v525_v2  ;;  %v529_v38 = vld [vmem:[%s680_s0 + $0x70] sm:$0xff]  }
   0xc   :  { %v171_v16 = vadd.f32 %v399_v13, %v170_v14  ;;  %v251_v9 = vmul.f32 %v414_v35, %v414_v35  ;;  %v431_v12 = vunpack.c.h.bf16 %v525_v2  ;;  %v252_v14 = vmul.f32 %v415_v40, %v415_v40 }
   0xd   :  { %v306_v47 = vadd.f32 %v305_v43, %v243_v37  ;;  %v442_v34 = vunpack.c.l.bf16 %v528_v29  ;;  %v443_v39 = vunpack.c.h.bf16 %v528_v29  ;;  %v446_v43 = vunpack.c.l.bf16 %v529_v38 }
   0xe   :  { %v172_v19 = vadd.f32 %v402_v15, %v171_v16  ;;  %v434_v16 = vunpack.c.l.bf16 %v526_v11  ;;  %v447_v48 = vunpack.c.h.bf16 %v529_v38 }
   0xf   :  { %v307_v52 = vadd.f32 %v306_v47, %v244_v42  ;;  %v530_v47 = vld [vmem:[%s680_s0 + $0x78] sm:$0xff]  }
  0x10   :  { %v173_v21 = vadd.f32 %v403_v18, %v172_v19  ;;  %v253_v18 = vmul.f32 %v418_v44, %v418_v44  ;;  %v451_v57 = vunpack.c.h.bf16 %v530_v47 }
  0x11   :  { %v308_v56 = vadd.f32 %v307_v52, %v245_v46  ;;  %v450_v52 = vunpack.c.l.bf16 %v530_v47 }
  0x12   :  { %v174_v24 = vadd.f32 %v406_v20, %v173_v21  ;;  %v527_v20 = vld [vmem:[%s680_s0 + $0x60] sm:$0xff]   ;;  %v435_v21 = vunpack.c.h.bf16 %v526_v11 }
  0x13   :  { %v309_v61 = vadd.f32 %v308_v56, %v246_v51  ;;  %v438_v25 = vunpack.c.l.bf16 %v527_v20  ;;  %v439_v30 = vunpack.c.h.bf16 %v527_v20  ;;  %v531_v56 = vld [vmem:[%s680_s0 + $0x80] sm:$0xff]  }
  0x14   :  { %v175_v28 = vadd.f32 %v407_v23, %v174_v24  ;;  %v254_v23 = vmul.f32 %v419_v49, %v419_v49  ;;  %v455_v2 = vunpack.c.h.bf16 %v531_v56 }
  0x15   :  { %v310_v1 = vadd.f32 %v309_v61, %v247_v55  ;;  %v454_v61 = vunpack.c.l.bf16 %v531_v56 }
  0x16   :  { %v176_v32 = vadd.f32 %v410_v27, %v175_v28  ;;  %v255_v27 = vmul.f32 %v422_v53, %v422_v53 }
  0x17   :  { %v311_v6 = vadd.f32 %v310_v1, %v248_v60  ;;  %v532_v1 = vld [vmem:[%s680_s0 + $0x88] sm:$0xff]  }
  0x18   :  { %v177_v36 = vadd.f32 %v411_v31, %v176_v32  ;;  %v256_v32 = vmul.f32 %v423_v58, %v423_v58  ;;  %v459_v11 = vunpack.c.h.bf16 %v532_v1 }
  0x19   :  { %v312_v10 = vadd.f32 %v311_v6, %v249_v0  ;;  %v458_v6 = vunpack.c.l.bf16 %v532_v1 }
  0x1a   :  { %v178_v41 = vadd.f32 %v414_v35, %v177_v36  ;;  %v257_v36 = vmul.f32 %v426_v62, %v426_v62 }
  0x1b   :  { %v313_v15 = vadd.f32 %v312_v10, %v250_v5  ;;  %v533_v10 = vld [vmem:[%s680_s0 + $0x90] sm:$0xff]  }
  0x1c   :  { %v179_v45 = vadd.f32 %v415_v40, %v178_v41  ;;  %v258_v41 = vmul.f32 %v427_v3, %v427_v3  ;;  %v463_v20 = vunpack.c.h.bf16 %v533_v10 }
  0x1d   :  { %v314_v19 = vadd.f32 %v313_v15, %v251_v9  ;;  %v462_v15 = vunpack.c.l.bf16 %v533_v10 }
  0x1e   :  { %v180_v50 = vadd.f32 %v418_v44, %v179_v45  ;;  %v259_v45 = vmul.f32 %v430_v7, %v430_v7 }
  0x1f   :  { %v315_v24 = vadd.f32 %v314_v19, %v252_v14  ;;  %v534_v19 = vld [vmem:[%s680_s0 + $0x98] sm:$0xff]  }
  0x20   :  { %v181_v54 = vadd.f32 %v419_v49, %v180_v50  ;;  %v260_v50 = vmul.f32 %v431_v12, %v431_v12  ;;  %v467_v29 = vunpack.c.h.bf16 %v534_v19 }
  0x21   :  { %v316_v28 = vadd.f32 %v315_v24, %v253_v18  ;;  %v466_v24 = vunpack.c.l.bf16 %v534_v19 }
  0x22   :  { %v182_v59 = vadd.f32 %v422_v53, %v181_v54  ;;  %v261_v54 = vmul.f32 %v434_v16, %v434_v16 }
  0x23   :  { %v317_v33 = vadd.f32 %v316_v28, %v254_v23  ;;  %v535_v28 = vld [vmem:[%s680_s0 + $0xa0] sm:$0xff]  }
  0x24   :  { %v183_v63 = vadd.f32 %v423_v58, %v182_v59  ;;  %v262_v59 = vmul.f32 %v435_v21, %v435_v21  ;;  %v471_v38 = vunpack.c.h.bf16 %v535_v28 }
  0x25   :  { %v318_v37 = vadd.f32 %v317_v33, %v255_v27  ;;  %v470_v33 = vunpack.c.l.bf16 %v535_v28 }
  0x26   :  { %v184_v4 = vadd.f32 %v426_v62, %v183_v63  ;;  %v263_v63 = vmul.f32 %v438_v25, %v438_v25 }
  0x27   :  { %v319_v42 = vadd.f32 %v318_v37, %v256_v32  ;;  %v536_v37 = vld [vmem:[%s680_s0 + $0xa8] sm:$0xff]  }
  0x28   :  { %v185_v8 = vadd.f32 %v427_v3, %v184_v4  ;;  %v264_v4 = vmul.f32 %v439_v30, %v439_v30  ;;  %v475_v47 = vunpack.c.h.bf16 %v536_v37 }
  0x29   :  { %v320_v46 = vadd.f32 %v319_v42, %v257_v36  ;;  %v474_v42 = vunpack.c.l.bf16 %v536_v37 }
  0x2a   :  { %v186_v13 = vadd.f32 %v430_v7, %v185_v8  ;;  %v265_v8 = vmul.f32 %v442_v34, %v442_v34 }
  0x2b   :  { %v321_v51 = vadd.f32 %v320_v46, %v258_v41  ;;  %v537_v46 = vld [vmem:[%s680_s0 + $0xb0] sm:$0xff]  }
  0x2c   :  { %v187_v17 = vadd.f32 %v431_v12, %v186_v13  ;;  %v266_v13 = vmul.f32 %v443_v39, %v443_v39  ;;  %v479_v56 = vunpack.c.h.bf16 %v537_v46 }
  0x2d   :  { %v322_v55 = vadd.f32 %v321_v51, %v259_v45  ;;  %v478_v51 = vunpack.c.l.bf16 %v537_v46 }
  0x2e   :  { %v188_v22 = vadd.f32 %v434_v16, %v187_v17  ;;  %v267_v17 = vmul.f32 %v446_v43, %v446_v43 }
  0x2f   :  { %v323_v60 = vadd.f32 %v322_v55, %v260_v50  ;;  %v538_v55 = vld [vmem:[%s680_s0 + $0xb8] sm:$0xff]  }
  0x30   :  { %v189_v26 = vadd.f32 %v435_v21, %v188_v22  ;;  %v268_v22 = vmul.f32 %v447_v48, %v447_v48  ;;  %v483_v1 = vunpack.c.h.bf16 %v538_v55 }
  0x31   :  { %v324_v0 = vadd.f32 %v323_v60, %v261_v54  ;;  %v482_v60 = vunpack.c.l.bf16 %v538_v55 }
  0x32   :  { %v190_v31 = vadd.f32 %v438_v25, %v189_v26  ;;  %v269_v26 = vmul.f32 %v450_v52, %v450_v52 }
  0x33   :  { %v325_v5 = vadd.f32 %v324_v0, %v262_v59  ;;  %v539_v0 = vld [vmem:[%s680_s0 + $0xc0] sm:$0xff]  }
  0x34   :  { %v191_v35 = vadd.f32 %v439_v30, %v190_v31  ;;  %v270_v31 = vmul.f32 %v451_v57, %v451_v57  ;;  %v487_v10 = vunpack.c.h.bf16 %v539_v0 }
  0x35   :  { %v326_v9 = vadd.f32 %v325_v5, %v263_v63  ;;  %v486_v5 = vunpack.c.l.bf16 %v539_v0 }
  0x36   :  { %v192_v40 = vadd.f32 %v442_v34, %v191_v35  ;;  %v271_v35 = vmul.f32 %v454_v61, %v454_v61 }
  0x37   :  { %v327_v14 = vadd.f32 %v326_v9, %v264_v4  ;;  %v540_v9 = vld [vmem:[%s680_s0 + $0xc8] sm:$0xff]  }
  0x38   :  { %v193_v44 = vadd.f32 %v443_v39, %v192_v40  ;;  %v272_v40 = vmul.f32 %v455_v2, %v455_v2  ;;  %v491_v19 = vunpack.c.h.bf16 %v540_v9 }
  0x39   :  { %v328_v18 = vadd.f32 %v327_v14, %v265_v8  ;;  %v490_v14 = vunpack.c.l.bf16 %v540_v9 }
  0x3a   :  { %v194_v49 = vadd.f32 %v446_v43, %v193_v44  ;;  %v273_v44 = vmul.f32 %v458_v6, %v458_v6 }
  0x3b   :  { %v329_v23 = vadd.f32 %v328_v18, %v266_v13  ;;  %v541_v18 = vld [vmem:[%s680_s0 + $0xd0] sm:$0xff]  }
  0x3c   :  { %v195_v53 = vadd.f32 %v447_v48, %v194_v49  ;;  %v274_v49 = vmul.f32 %v459_v11, %v459_v11  ;;  %v495_v28 = vunpack.c.h.bf16 %v541_v18 }
  0x3d   :  { %v330_v27 = vadd.f32 %v329_v23, %v267_v17  ;;  %v494_v23 = vunpack.c.l.bf16 %v541_v18 }
  0x3e   :  { %v196_v58 = vadd.f32 %v450_v52, %v195_v53  ;;  %v275_v53 = vmul.f32 %v462_v15, %v462_v15 }
  0x3f   :  { %v331_v32 = vadd.f32 %v330_v27, %v268_v22  ;;  %v542_v27 = vld [vmem:[%s680_s0 + $0xd8] sm:$0xff]  }
  0x40   :  { %v197_v62 = vadd.f32 %v451_v57, %v196_v58  ;;  %v276_v58 = vmul.f32 %v463_v20, %v463_v20  ;;  %v499_v37 = vunpack.c.h.bf16 %v542_v27 }
  0x41   :  { %v332_v36 = vadd.f32 %v331_v32, %v269_v26  ;;  %v498_v32 = vunpack.c.l.bf16 %v542_v27 }
  0x42   :  { %v198_v3 = vadd.f32 %v454_v61, %v197_v62  ;;  %v277_v62 = vmul.f32 %v466_v24, %v466_v24 }
  0x43   :  { %v333_v41 = vadd.f32 %v332_v36, %v270_v31  ;;  %v543_v36 = vld [vmem:[%s680_s0 + $0xe0] sm:$0xff]  }
  0x44   :  { %v199_v7 = vadd.f32 %v455_v2, %v198_v3  ;;  %v278_v3 = vmul.f32 %v467_v29, %v467_v29  ;;  %v503_v46 = vunpack.c.h.bf16 %v543_v36 }
  0x45   :  { %v334_v45 = vadd.f32 %v333_v41, %v271_v35  ;;  %v502_v41 = vunpack.c.l.bf16 %v543_v36 }
  0x46   :  { %v200_v12 = vadd.f32 %v458_v6, %v199_v7  ;;  %v279_v7 = vmul.f32 %v470_v33, %v470_v33 }
  0x47   :  { %v335_v50 = vadd.f32 %v334_v45, %v272_v40  ;;  %v544_v45 = vld [vmem:[%s680_s0 + $0xe8] sm:$0xff]  }
  0x48   :  { %v201_v16 = vadd.f32 %v459_v11, %v200_v12  ;;  %v280_v12 = vmul.f32 %v471_v38, %v471_v38  ;;  %v507_v55 = vunpack.c.h.bf16 %v544_v45 }
  0x49   :  { %v336_v54 = vadd.f32 %v335_v50, %v273_v44  ;;  %v506_v50 = vunpack.c.l.bf16 %v544_v45 }
  0x4a   :  { %v202_v21 = vadd.f32 %v462_v15, %v201_v16  ;;  %v281_v16 = vmul.f32 %v474_v42, %v474_v42 }
  0x4b   :  { %v337_v59 = vadd.f32 %v336_v54, %v274_v49  ;;  %v545_v54 = vld [vmem:[%s680_s0 + $0xf0] sm:$0xff]  }
  0x4c   :  { %v203_v25 = vadd.f32 %v463_v20, %v202_v21  ;;  %v282_v21 = vmul.f32 %v475_v47, %v475_v47  ;;  %v511_v0 = vunpack.c.h.bf16 %v545_v54 }
  0x4d   :  { %v338_v63 = vadd.f32 %v337_v59, %v275_v53  ;;  %v510_v59 = vunpack.c.l.bf16 %v545_v54 }
  0x4e   :  { %v204_v30 = vadd.f32 %v466_v24, %v203_v25  ;;  %v283_v25 = vmul.f32 %v478_v51, %v478_v51 }
  0x4f   :  { %v339_v4 = vadd.f32 %v338_v63, %v276_v58  ;;  %v546_v63 = vld [vmem:[%s680_s0 + $0xf8] sm:$0xff]  }
  0x50   :  { %v205_v34 = vadd.f32 %v467_v29, %v204_v30  ;;  %v284_v30 = vmul.f32 %v479_v56, %v479_v56 }
  0x51   :  { %v340_v8 = vadd.f32 %v339_v4, %v277_v62  ;;  %v514_v4 = vunpack.c.l.bf16 %v546_v63 }
  0x52   :  { %v206_v39 = vadd.f32 %v470_v33, %v205_v34  ;;  %v285_v34 = vmul.f32 %v482_v60, %v482_v60 }
  0x53   :  { %v341_v13 = vadd.f32 %v340_v8, %v278_v3  ;;  %v515_v8 = vunpack.c.h.bf16 %v546_v63 }
  0x54   :  { %v207_v43 = vadd.f32 %v471_v38, %v206_v39  ;;  %v286_v39 = vmul.f32 %v483_v1, %v483_v1 }
  0x55   :  { %v342_v17 = vadd.f32 %v341_v13, %v279_v7  ;;  %v295_v13 = vmul.f32 %v502_v41, %v502_v41 }
  0x56   :  { %v208_v48 = vadd.f32 %v474_v42, %v207_v43  ;;  %v287_v43 = vmul.f32 %v486_v5, %v486_v5 }
  0x57   :  { %v343_v22 = vadd.f32 %v342_v17, %v280_v12 }
  0x58   :  { %v209_v52 = vadd.f32 %v475_v47, %v208_v48  ;;  %v288_v48 = vmul.f32 %v487_v10, %v487_v10 }
  0x59   :  { %v344_v26 = vadd.f32 %v343_v22, %v281_v16  ;;  %v296_v16 = vmul.f32 %v503_v46, %v503_v46  ;;  %v298_v22 = vmul.f32 %v507_v55, %v507_v55 }
  0x5a   :  { %v210_v57 = vadd.f32 %v478_v51, %v209_v52  ;;  %v289_v52 = vmul.f32 %v490_v14, %v490_v14 }
  0x5b   :  { %v345_v31 = vadd.f32 %v344_v26, %v282_v21 }
  0x5c   :  { %v211_v61 = vadd.f32 %v479_v56, %v210_v57  ;;  %v290_v57 = vmul.f32 %v491_v19, %v491_v19 }
  0x5d   :  { %v346_v35 = vadd.f32 %v345_v31, %v283_v25  ;;  %v299_v25 = vmul.f32 %v510_v59, %v510_v59 }
  0x5e   :  { %v212_v2 = vadd.f32 %v482_v60, %v211_v61  ;;  %v291_v61 = vmul.f32 %v494_v23, %v494_v23 }
  0x5f   :  { %v347_v40 = vadd.f32 %v346_v35, %v284_v30  ;;  %v166_v30 = vld [vmem:[%s678_s1] sm:$0x1]  ;;  %v302_v35 = vmul.f32 %v515_v8, %v515_v8 }
  0x60   :  { %v213_v6 = vadd.f32 %v483_v1, %v212_v2  ;;  %v292_v2 = vmul.f32 %v495_v28, %v495_v28 }
  0x61   :  { %v348_v44 = vadd.f32 %v347_v40, %v285_v34 }
  0x62   :  { %v214_v11 = vadd.f32 %v486_v5, %v213_v6  ;;  %v293_v6 = vmul.f32 %v498_v32, %v498_v32 }
  0x63   :  { %v349_v49 = vadd.f32 %v348_v44, %v286_v39  ;;  %v238_v44 = vld [vmem:[%s679_s2] sm:$0x1] }
  0x64   :  { %v215_v15 = vadd.f32 %v487_v10, %v214_v11  ;;  %v294_v10 = vmul.f32 %v499_v37, %v499_v37 }
  0x65   :  { %v350_v53 = vadd.f32 %v349_v49, %v287_v43 }
  0x66   :  { %v216_v20 = vadd.f32 %v490_v14, %v215_v15 }
  0x67   :  { %v351_v58 = vadd.f32 %v350_v53, %v288_v48 }
  0x68   :  { %v217_v24 = vadd.f32 %v491_v19, %v216_v20  ;;  %v297_v19 = vmul.f32 %v506_v50, %v506_v50 }
  0x69   :  { %v352_v62 = vadd.f32 %v351_v58, %v289_v52 }
  0x6a   :  { %v218_v29 = vadd.f32 %v494_v23, %v217_v24 }
  0x6b   :  { %v353_v3 = vadd.f32 %v352_v62, %v290_v57 }
  0x6c   :  { %v219_v33 = vadd.f32 %v495_v28, %v218_v29  ;;  %v300_v28 = vmul.f32 %v511_v0, %v511_v0 }
  0x6d   :  { %v354_v7 = vadd.f32 %v353_v3, %v291_v61 }
  0x6e   :  { %v220_v38 = vadd.f32 %v498_v32, %v219_v33  ;;  %v301_v32 = vmul.f32 %v514_v4, %v514_v4 }
  0x6f   :  { %v355_v11 = vadd.f32 %v354_v7, %v292_v2 }
  0x70   :  { %v221_v42 = vadd.f32 %v499_v37, %v220_v38 }
  0x71   :  { %v356_v14 = vadd.f32 %v355_v11, %v293_v6 }
  0x72   :  { %v222_v47 = vadd.f32 %v502_v41, %v221_v42 }
  0x73   :  { %v357_v17 = vadd.f32 %v356_v14, %v294_v10 }
  0x74   :  { %v223_v51 = vadd.f32 %v503_v46, %v222_v47 }
  0x75   :  { %v358_v20 = vadd.f32 %v357_v17, %v295_v13 }
  0x76   :  { %v224_v56 = vadd.f32 %v506_v50, %v223_v51 }
  0x77   :  { %v359_v23 = vadd.f32 %v358_v20, %v296_v16 }
  0x78   :  { %v225_v60 = vadd.f32 %v507_v55, %v224_v56 }
  0x79   :  { %v360_v26 = vadd.f32 %v359_v23, %v297_v19 }
  0x7a   :  { %v226_v1 = vadd.f32 %v510_v59, %v225_v60 }
  0x7b   :  { %v361_v29 = vadd.f32 %v360_v26, %v298_v22 }
  0x7c   :  { %v227_v5 = vadd.f32 %v511_v0, %v226_v1 }
  0x7d   :  { %v362_v33 = vadd.f32 %v361_v29, %v299_v25 }
  0x7e   :  { %v228_v9 = vadd.f32 %v514_v4, %v227_v5 }
  0x7f   :  { %v363_v36 = vadd.f32 %v362_v33, %v300_v28 }
  0x80   :  { %v229_v12 = vadd.f32 %v515_v8, %v228_v9 }
  0x81   :  { %v364_v37 = vadd.f32 %v363_v36, %v301_v32 }
  0x82   :  { %v230_v15 = vrot.slane %v229_v12, 4 }
  0x83   :  { %v365_v38 = vadd.f32 %v364_v37, %v302_v35 }
  0x84   :  { %v231_v18 = vadd.f32 %v230_v15, %v229_v12 }
  0x85   :  { %v366_v39 = vrot.slane %v365_v38, 4 }
  0x86   :  { %v232_v21 = vrot.slane %v231_v18, 2 }
  0x87   :  { %v367_v40 = vadd.f32 %v366_v39, %v365_v38 }
  0x88   :  { %v233_v24 = vadd.f32 %v232_v21, %v231_v18 }
  0x89   :  { %v368_v41 = vrot.slane %v367_v40, 2 }
  0x8a   :  { %v234_v27 = vrot.slane %v233_v24, 1 }
  0x8b   :  { %v369_v42 = vadd.f32 %v368_v41, %v367_v40 }
  0x8c   :  { %v235_v31 = vadd.f32 %v234_v27, %v233_v24 }
  0x8d   :  { %v370_v43 = vrot.slane %v369_v42, 1 }
  0x8e   :  { %v236_v34 = vadd.f32 %v235_v31, %v166_v30 }
  0x8f   :  { %v371_v45 = vadd.f32 %v370_v43, %v369_v42 }
  0x90   :  { %237 = vst [vmem:[%s678_s1] sm:$0x1] %v236_v34 }
  0x91   :  { %v372_v46 = vadd.f32 %v371_v45, %v238_v44 }
  0x93   :  { %373 = vst [vmem:[%s679_s2] sm:$0x1] %v372_v46 }

// kernel: dense_block_forward.10
= control target key start
LH: loop header
LB: loop body
LE: loop exit
PB: predicated region body
PF: predicated region fallthrough
CT: control target
= control target key end

     0   :  { %s2553_s3 = inlined_call_operand.vmem [shape: bf16[128,128], index: 3, kind: input, shape index: {}]   ;;  %s2554_s0 = inlined_call_operand.vmem [shape: bf16[512,128], index: 0, kind: input, shape index: {}]   ;;  %s2555_s1 = inlined_call_operand.vmem [shape: f32[1,128], index: 1, kind: input, shape index: {}]   ;;  %s2556_s2 = inlined_call_operand.vmem [shape: f32[1,128], index: 2, kind: input, shape index: {}]   ;;  %s2557_s5 = inlined_call_operand.vmem [shape: f32[1,128], index: 5, kind: output, shape index: {1}]   ;;  %s2558_s6 = inlined_call_operand.vmem [shape: f32[1,128], index: 6, kind: output, shape index: {2}]   ;;  %s2559_s4 = inlined_call_operand.vmem [shape: bf16[512,128], index: 4, kind: output, shape index: {0}]  }
   0x1   :  { %v1911_v0 = vld [vmem:[%s2553_s3] sm:$0xff]   ;;  %v1912_v1 = vld [vmem:[%s2553_s3 + $0x8] sm:$0xff]   ;;  %v1913_v2 = vld [vmem:[%s2553_s3 + $0x10] sm:$0xff]  }
   0x2   :  { %1814 = vmatprep.subr.bf16.mxu0 %v1911_v0  ;;  %1894 = vmatprep.subr.bf16.mxu1 %v1911_v0  ;;  %v1914_v3 = vld [vmem:[%s2553_s3 + $0x18] sm:$0xff]   ;;  %v1425_v4 = vld [vmem:[%s2554_s0] sm:$0xff]   ;;  %v1712_v8 = vld [vmem:[%s2554_s0 + $0x8] sm:$0xff]  }
   0x3   :  { %1815 = vmatpush3.bf16.msra.mxu0 %v1911_v0  ;;  %1902 = vmatpush3.bf16.msra.mxu1 %v1911_v0  ;;  %v1973_v5 = vld [vmem:[%s2555_s1] ss:$0 sm:$0xff]  ;;  %v1426_v6 = vunpack.c.l.bf16 %v1425_v4  ;;  %v1427_v7 = vunpack.c.h.bf16 %v1425_v4  ;;  %v1713_v9 = vld [vmem:[%s2554_s0 + $0x10] sm:$0xff]   ;;  %v1430_v14 = vunpack.c.l.bf16 %v1712_v8  ;;  %v1431_v15 = vunpack.c.h.bf16 %v1712_v8  ;;  %v1916_v22 = vld [vmem:[%s2553_s3 + $0x28] sm:$0xff]  }
   0x4   :  { %1816 = vmatprep.subr.bf16.mxu0 %v1912_v1  ;;  %1895 = vmatprep.subr.bf16.mxu1 %v1912_v1  ;;  %v1984_v10 = vld [vmem:[%s2556_s2] ss:$0 sm:$0xff]  ;;  %v1434_v16 = vunpack.c.l.bf16 %v1713_v9  ;;  %v1435_v19 = vunpack.c.h.bf16 %v1713_v9  ;;  %v1714_v26 = vld [vmem:[%s2554_s0 + $0x18] sm:$0xff]   ;;  %v1917_v31 = vld [vmem:[%s2553_s3 + $0x30] sm:$0xff]  }
   0x5   :  { %v162_v11 = vmul.f32 %v1426_v6, %v1973_v5  ;;  %v163_v12 = vmul.f32 %v1427_v7, %v1973_v5  ;;  %v1915_v13 = vld [vmem:[%s2553_s3 + $0x20] sm:$0xff]   ;;  %v164_v23 = vmul.f32 %v1430_v14, %v1973_v5  ;;  %v165_v24 = vmul.f32 %v1431_v15, %v1973_v5  ;;  %v1716_v38 = vld [vmem:[%s2554_s0 + $0x28] sm:$0xff]   ;;  %v1717_v41 = vld [vmem:[%s2554_s0 + $0x30] sm:$0xff]  }
   0x6   :  { %v166_v25 = vmul.f32 %v1434_v16, %v1973_v5  ;;  %v167_v28 = vmul.f32 %v1435_v19, %v1973_v5  ;;  %v1715_v29 = vld [vmem:[%s2554_s0 + $0x20] sm:$0xff]   ;;  %v1438_v30 = vunpack.c.l.bf16 %v1714_v26  ;;  %v1439_v35 = vunpack.c.h.bf16 %v1714_v26  ;;  %v1718_v42 = vld [vmem:[%s2554_s0 + $0x38] sm:$0xff]   ;;  %v1720_v63 = vld [vmem:[%s2554_s0 + $0x48] sm:$0xff]  }
   0x7   :  { %1817 = vmatpush3.bf16.msra.mxu0 %v1912_v1  ;;  %1903 = vmatpush3.bf16.msra.mxu1 %v1912_v1  ;;  %v233_v17 = vadd.f32 %v1984_v10, %v162_v11  ;;  %v234_v18 = vadd.f32 %v1984_v10, %v163_v12  ;;  %v235_v32 = vadd.f32 %v1984_v10, %v164_v23  ;;  %v1442_v37 = vunpack.c.l.bf16 %v1715_v29  ;;  %v1918_v43 = vld [vmem:[%s2553_s3 + $0x38] sm:$0xff]   ;;  %v1719_v48 = vld [vmem:[%s2554_s0 + $0x40] sm:$0xff]   ;;  %v1721_v4 = vld [vmem:[%s2554_s0 + $0x50] sm:$0xff]  }
   0x8   :  { %1818 = vmatprep.subr.bf16.mxu0 %v1913_v2  ;;  %1896 = vmatprep.subr.bf16.mxu1 %v1913_v2  ;;  %v236_v33 = vadd.f32 %v1984_v10, %v165_v24  ;;  %v237_v34 = vadd.f32 %v1984_v10, %v166_v25  ;;  %v238_v36 = vadd.f32 %v1984_v10, %v167_v28  ;;  %v1443_v40 = vunpack.c.h.bf16 %v1715_v29  ;;  %v1722_v23 = vld [vmem:[%s2554_s0 + $0x58] sm:$0xff]  }
   0x9   :  { %v297_v20 = vmax.f32 %v233_v17, 0.0  ;;  %v298_v21 = vmax.f32 %v234_v18, 0.0  ;;  %v168_v39 = vmul.f32 %v1438_v30, %v1973_v5  ;;  %v299_v44 = vmax.f32 %v235_v32, 0.0 }
   0xa   :  { %v300_v45 = vmax.f32 %v236_v33, 0.0  ;;  %v301_v46 = vmax.f32 %v237_v34, 0.0  ;;  %v169_v47 = vmul.f32 %v1439_v35, %v1973_v5  ;;  %v302_v49 = vmax.f32 %v238_v36, 0.0 }
   0xb   :  { %1819 = vmatpush3.bf16.msra.mxu0 %v1913_v2  ;;  %1904 = vmatpush3.bf16.msra.mxu1 %v1913_v2  ;;  %v361_v27 = vpack.c.bf16 %v298_v21, %v297_v20  ;;  %v170_v50 = vmul.f32 %v1442_v37, %v1973_v5  ;;  %v1446_v51 = vunpack.c.l.bf16 %v1716_v38  ;;  %v1447_v52 = vunpack.c.h.bf16 %v1716_v38 }
   0xc   :  { %1820 = vmatprep.subr.bf16.mxu0 %v1914_v3  ;;  %1897 = vmatprep.subr.bf16.mxu1 %v1914_v3  ;;  %v1450_v53 = vunpack.c.l.bf16 %v1717_v41  ;;  %v1451_v54 = vunpack.c.h.bf16 %v1717_v41  ;;  %v1454_v55 = vunpack.c.l.bf16 %v1718_v42  ;;  %v1455_v56 = vunpack.c.h.bf16 %v1718_v42 }
   0xd   :  { %1830 = vmatprep.mubr.bf16.mxu0 %v361_v27  ;;  %v171_v57 = vmul.f32 %v1443_v40, %v1973_v5  ;;  %v1458_v58 = vunpack.c.l.bf16 %v1719_v48  ;;  %v1459_v59 = vunpack.c.h.bf16 %v1719_v48  ;;  %v362_v60 = vpack.c.bf16 %v300_v45, %v299_v44  ;;  %v1727_v44 = vld [vmem:[%s2554_s0 + $0x80] sm:$0xff]  }
   0xe   :  { %v239_v61 = vadd.f32 %v1984_v10, %v168_v39  ;;  %v240_v62 = vadd.f32 %v1984_v10, %v169_v47  ;;  %v363_v0 = vpack.c.bf16 %v302_v49, %v301_v46  ;;  %v241_v1 = vadd.f32 %v1984_v10, %v170_v50 }
   0xf   :  { %1821 = vmatpush3.bf16.msra.mxu0 %v1914_v3  ;;  %1905 = vmatpush3.bf16.msra.mxu1 %v1914_v3  ;;  %v172_v2 = vmul.f32 %v1446_v51, %v1973_v5  ;;  %v173_v3 = vmul.f32 %v1447_v52, %v1973_v5  ;;  %v174_v6 = vmul.f32 %v1450_v53, %v1973_v5  ;;  %v1462_v14 = vunpack.c.l.bf16 %v1720_v63  ;;  %v2077_v52 = vld [vmem:[%s2554_s0 + $0x60] sm:$0xff]  }
  0x10   :  { %1822 = vmatprep.subr.bf16.mxu0 %v1915_v13  ;;  %1898 = vmatprep.subr.bf16.mxu1 %v1915_v13  ;;  %v175_v7 = vmul.f32 %v1451_v54, %v1973_v5  ;;  %v176_v8 = vmul.f32 %v1454_v55, %v1973_v5  ;;  %v177_v9 = vmul.f32 %v1455_v56, %v1973_v5  ;;  %v303_v15 = vmax.f32 %v239_v61, 0.0 }
  0x11   :  { %v242_v11 = vadd.f32 %v1984_v10, %v171_v57  ;;  %v178_v12 = vmul.f32 %v1458_v58, %v1973_v5  ;;  %v304_v16 = vmax.f32 %v240_v62, 0.0  ;;  %v1463_v17 = vunpack.c.h.bf16 %v1720_v63 }
  0x12   :  { %v1466_v18 = vunpack.c.l.bf16 %v1721_v4  ;;  %v305_v19 = vmax.f32 %v241_v1, 0.0  ;;  %v243_v20 = vadd.f32 %v1984_v10, %v172_v2  ;;  %v244_v21 = vadd.f32 %v1984_v10, %v173_v3 }
  0x13   :  { %1823 = vmatpush3.bf16.msra.mxu0 %v1915_v13  ;;  %1906 = vmatpush3.bf16.msra.mxu1 %v1915_v13  ;;  %v179_v13 = vmul.f32 %v1459_v59, %v1973_v5  ;;  %v245_v24 = vadd.f32 %v1984_v10, %v174_v6  ;;  %v246_v25 = vadd.f32 %v1984_v10, %v175_v7  ;;  %v306_v28 = vmax.f32 %v242_v11, 0.0  ;;  %v1728_v59 = vld [vmem:[%s2554_s0 + $0x88] sm:$0xff]   ;;  %v1730_v11 = vld [vmem:[%s2554_s0 + $0x98] sm:$0xff]  }
  0x14   :  { %1824 = vmatprep.subr.bf16.mxu0 %v1916_v22  ;;  %1899 = vmatprep.subr.bf16.mxu1 %v1916_v22  ;;  %v247_v26 = vadd.f32 %v1984_v10, %v176_v8  ;;  %v248_v27 = vadd.f32 %v1984_v10, %v177_v9  ;;  %v249_v29 = vadd.f32 %v1984_v10, %v178_v12  ;;  %v1470_v35 = vunpack.c.l.bf16 %v1722_v23 }
  0x15   :  { %v250_v30 = vadd.f32 %v1984_v10, %v179_v13  ;;  %v364_v32 = vpack.c.bf16 %v304_v16, %v303_v15  ;;  %v181_v33 = vmul.f32 %v1463_v17, %v1973_v5  ;;  %v182_v34 = vmul.f32 %v1466_v18, %v1973_v5 }
  0x16   :  { %v307_v36 = vmax.f32 %v243_v20, 0.0  ;;  %v308_v37 = vmax.f32 %v244_v21, 0.0  ;;  %v1471_v39 = vunpack.c.h.bf16 %v1722_v23  ;;  %v309_v40 = vmax.f32 %v245_v24, 0.0  ;;  %v1731_v24 = vld [vmem:[%s2554_s0 + $0xa0] sm:$0xff]  }
  0x17   :  { %1825 = vmatpush3.bf16.msra.mxu0 %v1916_v22  ;;  %1907 = vmatpush3.bf16.msra.mxu1 %v1916_v22  ;;  %v1467_v22 = vunpack.c.h.bf16 %v1721_v4  ;;  %v310_v41 = vmax.f32 %v246_v25, 0.0  ;;  %v311_v42 = vmax.f32 %v247_v26, 0.0  ;;  %v365_v45 = vpack.c.bf16 %v306_v28, %v305_v19 }
  0x18   :  { %1826 = vmatprep.subr.bf16.mxu0 %v1917_v31  ;;  %1900 = vmatprep.subr.bf16.mxu1 %v1917_v31  ;;  %v313_v46 = vmax.f32 %v249_v29, 0.0  ;;  %v314_v47 = vmax.f32 %v250_v30, 0.0  ;;  %v252_v49 = vadd.f32 %v1984_v10, %v181_v33  ;;  %v2071_v50 = vadd.f32 %v1984_v10, %v182_v34  ;;  %v1732_v33 = vld [vmem:[%s2554_s0 + $0xa8] sm:$0xff]  }
  0x19   :  { %v183_v38 = vmul.f32 %v1467_v22, %v1973_v5  ;;  %v184_v51 = vmul.f32 %v1470_v35, %v1973_v5  ;;  %v185_v54 = vmul.f32 %v1471_v39, %v1973_v5  ;;  %v1490_v55 = vunpack.c.l.bf16 %v1727_v44 }
  0x1a   :  { %v366_v56 = vpack.c.bf16 %v308_v37, %v307_v36  ;;  %v367_v57 = vpack.c.bf16 %v310_v41, %v309_v40  ;;  %v1474_v62 = vunpack.c.l.bf16 %v2077_v52  ;;  %v1491_v63 = vunpack.c.h.bf16 %v1727_v44 }
  0x1b   :  { %1827 = vmatpush3.bf16.msra.mxu0 %v1917_v31  ;;  %1908 = vmatpush3.bf16.msra.mxu1 %v1917_v31  ;;  %v180_v31 = vmul.f32 %v1462_v14, %v1973_v5  ;;  %v2080_v53 = vadd.f32 %v1984_v10, %v183_v38  ;;  %v316_v1 = vmax.f32 %v252_v49, 0.0  ;;  %v317_v2 = vmax.f32 %v2071_v50, 0.0 }
  0x1c   :  { %1828 = vmatprep.subr.bf16.mxu0 %v1918_v43  ;;  %1901 = vmatprep.subr.bf16.mxu1 %v1918_v43  ;;  %v2096_v3 = vadd.f32 %v1984_v10, %v184_v51  ;;  %v194_v4 = vmul.f32 %v1490_v55, %v1973_v5  ;;  %v2101_v7 = vadd.f32 %v1984_v10, %v185_v54  ;;  %v1494_v9 = vunpack.c.l.bf16 %v1728_v59 }
  0x1d   :  { %v251_v48 = vadd.f32 %v1984_v10, %v180_v31  ;;  %v318_v6 = vmax.f32 %v2080_v53, 0.0  ;;  %v195_v8 = vmul.f32 %v1491_v63, %v1973_v5  ;;  %v1475_v12 = vunpack.c.h.bf16 %v2077_v52 }
  0x1e   :  { %v265_v13 = vadd.f32 %v1984_v10, %v194_v4  ;;  %v1495_v14 = vunpack.c.h.bf16 %v1728_v59  ;;  %v2110_v16 = vmul.f32 %v1474_v62, %v1973_v5  ;;  %v196_v18 = vmul.f32 %v1494_v9, %v1973_v5 }
  0x1f   :  { %1829 = vmatpush3.bf16.msra.mxu0 %v1918_v43  ;;  %1909 = vmatpush3.bf16.msra.mxu1 %v1918_v43  ;;  %v312_v43 = vmax.f32 %v248_v27, 0.0  ;;  %v315_v61 = vmax.f32 %v251_v48, 0.0  ;;  %v266_v17 = vadd.f32 %v1984_v10, %v195_v8  ;;  %v1502_v23 = vunpack.c.l.bf16 %v1730_v11 }
  0x20   :  { %v329_v20 = vmax.f32 %v265_v13, 0.0  ;;  %v197_v21 = vmul.f32 %v1495_v14, %v1973_v5  ;;  %v267_v27 = vadd.f32 %v1984_v10, %v196_v18  ;;  %v1503_v31 = vunpack.c.h.bf16 %v1730_v11  ;;  %v1735_v18 = vld [vmem:[%s2554_s0 + $0xc0] sm:$0xff]  }
  0x21   :  { %v2083_v58 = vpack.c.bf16 %v312_v43, %v311_v42  ;;  %v2119_v25 = vpack.c.bf16 %v316_v1, %v315_v61  ;;  %v330_v26 = vmax.f32 %v266_v17, 0.0  ;;  %v1506_v37 = vunpack.c.l.bf16 %v1731_v24  ;;  %v1734_v1 = vld [vmem:[%s2554_s0 + $0xb8] sm:$0xff]  }
  0x22   :  { %1831 = vmatmul.mubr.bf16.vlgmr.msra.gmra.mrb[0].mxu0 %v362_v60  ;;  %v2088_v60 = vpack.c.bf16 %v314_v47, %v313_v46  ;;  %v268_v29 = vadd.f32 %v1984_v10, %v197_v21  ;;  %v331_v35 = vmax.f32 %v267_v27, 0.0  ;;  %v201_v40 = vmul.f32 %v1503_v31, %v1973_v5  ;;  %v1733_v46 = vld [vmem:[%s2554_s0 + $0xb0] sm:$0xff]   ;;  %v1724_v47 = vld [vmem:[%s2554_s0 + $0x68] sm:$0xff]  }
  0x23   :  { %1834 = vmatprep.mubr.bf16.mxu0 %v363_v0  ;;  %v1729_v0 = vld [vmem:[%s2554_s0 + $0x90] sm:$0xff]   ;;  %v377_v34 = vpack.c.bf16 %v330_v26, %v329_v20  ;;  %v1507_v43 = vunpack.c.h.bf16 %v1731_v24  ;;  %v202_v44 = vmul.f32 %v1506_v37, %v1973_v5  ;;  %v1511_v54 = vunpack.c.h.bf16 %v1732_v33 }
  0x24   :  { %v1498_v15 = vunpack.c.l.bf16 %v1729_v0  ;;  %v1499_v19 = vunpack.c.h.bf16 %v1729_v0  ;;  %v332_v38 = vmax.f32 %v268_v29, 0.0  ;;  %v272_v49 = vadd.f32 %v1984_v10, %v201_v40  ;;  %v1737_v40 = vld [vmem:[%s2554_s0 + $0xd0] sm:$0xff]  }
  0x25   :  { %1862 = vmatprep.mubr.bf16.mxu1 %v377_v34  ;;  %v205_v62 = vmul.f32 %v1511_v54, %v1973_v5  ;;  %v1514_v63 = vunpack.c.l.bf16 %v1733_v46  ;;  %v1515_v0 = vunpack.c.h.bf16 %v1733_v46  ;;  %v319_v4 = vmax.f32 %v2096_v3, 0.0 }
  0x26   :  { %v198_v22 = vmul.f32 %v1498_v15, %v1973_v5  ;;  %v199_v28 = vmul.f32 %v1499_v19, %v1973_v5  ;;  %v378_v48 = vpack.c.bf16 %v332_v38, %v331_v35  ;;  %v336_v61 = vmax.f32 %v272_v49, 0.0 }
  0x27   :  { %v1478_v8 = vunpack.c.l.bf16 %v1724_v47  ;;  %v320_v13 = vmax.f32 %v2101_v7, 0.0  ;;  %v1479_v14 = vunpack.c.h.bf16 %v1724_v47  ;;  %v206_v15 = vmul.f32 %v1514_v63, %v1973_v5 }
  0x28   :  { %v269_v30 = vadd.f32 %v1984_v10, %v198_v22  ;;  %v270_v36 = vadd.f32 %v1984_v10, %v199_v28  ;;  %1863 = vmatmul.mubr.bf16.vlgmr.msra.gmra.mrb[0].mxu1 %v378_v48  ;;  %v207_v17 = vmul.f32 %v1515_v0, %v1973_v5  ;;  %v187_v3 = vmul.f32 %v1475_v12, %v1973_v5 }
  0x29   :  { %v1518_v19 = vunpack.c.l.bf16 %v1734_v1  ;;  %v1519_v20 = vunpack.c.h.bf16 %v1734_v1  ;;  %v277_v24 = vadd.f32 %v1984_v10, %v206_v15  ;;  %v1522_v27 = vunpack.c.l.bf16 %v1735_v18  ;;  %v1738_v15 = vld [vmem:[%s2554_s0 + $0xd8] sm:$0xff]  }
  0x2a   :  { %1835 = vmatmul.mubr.bf16.gmra.mrb[4].mxu0 %v364_v32  ;;  %v200_v32 = vmul.f32 %v1502_v23, %v1973_v5  ;;  %v333_v39 = vmax.f32 %v269_v30, 0.0  ;;  %v334_v42 = vmax.f32 %v270_v36, 0.0  ;;  %v276_v23 = vadd.f32 %v1984_v10, %v205_v62 }
  0x2b   :  { %1838 = vmatprep.mubr.bf16.mxu0 %v365_v45  ;;  %v1510_v45 = vunpack.c.l.bf16 %v1732_v33  ;;  %v1523_v52 = vunpack.c.h.bf16 %v1735_v18  ;;  %v371_v12 = vpack.c.bf16 %v318_v6, %v317_v2  ;;  %v257_v28 = vadd.f32 %v1984_v10, %v2110_v16  ;;  %v1726_v33 = vld [vmem:[%s2554_s0 + $0x78] sm:$0xff]   ;;  %v1736_v16 = vld [vmem:[%s2554_s0 + $0xc8] sm:$0xff]  }
  0x2c   :  { %v271_v41 = vadd.f32 %v1984_v10, %v200_v32  ;;  %v379_v55 = vpack.c.bf16 %v334_v42, %v333_v39  ;;  %v258_v31 = vadd.f32 %v1984_v10, %v187_v3  ;;  %v188_v32 = vmul.f32 %v1478_v8, %v1973_v5 }
  0x2d   :  { %v204_v59 = vmul.f32 %v1510_v45, %v1973_v5  ;;  %v208_v34 = vmul.f32 %v1518_v19, %v1973_v5  ;;  %v209_v50 = vmul.f32 %v1519_v20, %v1973_v5  ;;  %v372_v35 = vpack.c.bf16 %v320_v13, %v319_v4 }
  0x2e   :  { %v335_v51 = vmax.f32 %v271_v41, 0.0  ;;  %1866 = vmatprep.mubr.bf16.mxu1 %v379_v55  ;;  %v189_v53 = vmul.f32 %v1479_v14, %v1973_v5  ;;  %v340_v6 = vmax.f32 %v276_v23, 0.0  ;;  %v341_v36 = vmax.f32 %v277_v24, 0.0 }
  0x2f   :  { %v275_v22 = vadd.f32 %v1984_v10, %v204_v59  ;;  %v210_v38 = vmul.f32 %v1522_v27, %v1973_v5  ;;  %v211_v39 = vmul.f32 %v1523_v52, %v1973_v5  ;;  %v321_v41 = vmax.f32 %v257_v28, 0.0 }
  0x30   :  { %v380_v21 = vpack.c.bf16 %v336_v61, %v335_v51  ;;  %v322_v45 = vmax.f32 %v258_v31, 0.0  ;;  %v279_v46 = vadd.f32 %v1984_v10, %v208_v34  ;;  %v280_v47 = vadd.f32 %v1984_v10, %v209_v50 }
  0x31   :  { %v339_v2 = vmax.f32 %v275_v22, 0.0  ;;  %v1526_v48 = vunpack.c.l.bf16 %v1736_v16  ;;  %v1527_v51 = vunpack.c.h.bf16 %v1736_v16  ;;  %v1530_v54 = vunpack.c.l.bf16 %v1737_v40 }
  0x32   :  { %1839 = vmatmul.mubr.bf16.gmra.mrb[8].mxu0 %v366_v56  ;;  %v203_v56 = vmul.f32 %v1507_v43, %v1973_v5  ;;  %1867 = vmatmul.mubr.bf16.gmra.mrb[4].mxu1 %v380_v21  ;;  %v1531_v55 = vunpack.c.h.bf16 %v1737_v40  ;;  %v282_v59 = vadd.f32 %v1984_v10, %v211_v39  ;;  %v260_v61 = vadd.f32 %v1984_v10, %v189_v53  ;;  %v1739_v21 = vld [vmem:[%s2554_s0 + $0xe0] sm:$0xff]  }
  0x33   :  { %1842 = vmatprep.mubr.bf16.mxu0 %v367_v57  ;;  %v273_v57 = vadd.f32 %v1984_v10, %v202_v44  ;;  %v1486_v44 = vunpack.c.l.bf16 %v1726_v33  ;;  %v382_v49 = vpack.c.bf16 %v340_v6, %v339_v2  ;;  %v1487_v0 = vunpack.c.h.bf16 %v1726_v33 }
  0x34   :  { %v274_v9 = vadd.f32 %v1984_v10, %v203_v56  ;;  %v259_v56 = vadd.f32 %v1984_v10, %v188_v32  ;;  %v373_v1 = vpack.c.bf16 %v322_v45, %v321_v41  ;;  %v343_v4 = vmax.f32 %v279_v46, 0.0  ;;  %v1741_v41 = vld [vmem:[%s2554_s0 + $0xf0] sm:$0xff]  }
  0x35   :  { %v337_v11 = vmax.f32 %v273_v57, 0.0  ;;  %v281_v57 = vadd.f32 %v1984_v10, %v210_v38  ;;  %v344_v8 = vmax.f32 %v280_v47, 0.0  ;;  %v214_v13 = vmul.f32 %v1530_v54, %v1973_v5 }
  0x36   :  { %v338_v7 = vmax.f32 %v274_v9, 0.0  ;;  %v212_v9 = vmul.f32 %v1526_v48, %v1973_v5  ;;  %v215_v14 = vmul.f32 %v1531_v55, %v1973_v5  ;;  %v346_v3 = vmax.f32 %v282_v59, 0.0 }
  0x37   :  { %v345_v18 = vmax.f32 %v281_v57, 0.0  ;;  %v193_v20 = vmul.f32 %v1487_v0, %v1973_v5  ;;  %v384_v23 = vpack.c.bf16 %v344_v8, %v343_v4  ;;  %v285_v27 = vadd.f32 %v1984_v10, %v214_v13 }
  0x38   :  { %v381_v26 = vpack.c.bf16 %v338_v7, %v337_v11  ;;  %v213_v11 = vmul.f32 %v1527_v51, %v1973_v5  ;;  %v324_v7 = vmax.f32 %v260_v61, 0.0  ;;  %v283_v24 = vadd.f32 %v1984_v10, %v212_v9 }
  0x39   :  { %v286_v52 = vadd.f32 %v1984_v10, %v215_v14  ;;  %v385_v28 = vpack.c.bf16 %v346_v3, %v345_v18  ;;  %v264_v33 = vadd.f32 %v1984_v10, %v193_v20  ;;  %v349_v2 = vmax.f32 %v285_v27, 0.0 }
  0x3a   :  { %1843 = vmatmul.mubr.bf16.gmra.mrb[12].mxu0 %v2083_v58  ;;  %v1725_v58 = vld [vmem:[%s2554_s0 + $0x70] sm:$0xff]   ;;  %1870 = vmatprep.mubr.bf16.mxu1 %v381_v26  ;;  %v1534_v26 = vunpack.c.l.bf16 %v1738_v15  ;;  %v347_v50 = vmax.f32 %v283_v24, 0.0  ;;  %v1546_v51 = vunpack.c.l.bf16 %v1741_v41  ;;  %v1547_v54 = vunpack.c.h.bf16 %v1741_v41 }
  0x3b   :  { %1846 = vmatprep.mubr.bf16.mxu0 %v2088_v60  ;;  %v278_v60 = vadd.f32 %v1984_v10, %v207_v17  ;;  %v1482_v29 = vunpack.c.l.bf16 %v1725_v58  ;;  %v1483_v30 = vunpack.c.h.bf16 %v1725_v58  ;;  %1871 = vmatmul.mubr.bf16.gmra.mrb[8].mxu1 %v382_v49  ;;  %v192_v17 = vmul.f32 %v1486_v44, %v1973_v5 }
  0x3c   :  { %v323_v58 = vmax.f32 %v259_v56, 0.0  ;;  %v350_v6 = vmax.f32 %v286_v52, 0.0  ;;  %v328_v40 = vmax.f32 %v264_v33, 0.0  ;;  %v223_v0 = vmul.f32 %v1547_v54, %v1973_v5 }
  0x3d   :  { %v342_v37 = vmax.f32 %v278_v60, 0.0  ;;  %v190_v42 = vmul.f32 %v1482_v29, %v1973_v5  ;;  %v191_v43 = vmul.f32 %v1483_v30, %v1973_v5  ;;  %v284_v60 = vadd.f32 %v1984_v10, %v213_v11 }
  0x3e   :  { %v1538_v29 = vunpack.c.l.bf16 %v1739_v21  ;;  %v1539_v30 = vunpack.c.h.bf16 %v1739_v21  ;;  %v374_v31 = vpack.c.bf16 %v324_v7, %v323_v58  ;;  %v263_v32 = vadd.f32 %v1984_v10, %v192_v17 }
  0x3f   :  { %v261_v62 = vadd.f32 %v1984_v10, %v190_v42  ;;  %v262_v63 = vadd.f32 %v1984_v10, %v191_v43  ;;  %v348_v53 = vmax.f32 %v284_v60, 0.0  ;;  %v387_v45 = vpack.c.bf16 %v350_v6, %v349_v2 }
  0x40   :  { %v219_v38 = vmul.f32 %v1539_v30, %v1973_v5  ;;  %v327_v39 = vmax.f32 %v263_v32, 0.0  ;;  %v294_v17 = vadd.f32 %v1984_v10, %v223_v0  ;;  %v1919_v52 = vmov 0.0  }
  0x41   :  { %v325_v19 = vmax.f32 %v261_v62, 0.0  ;;  %v326_v22 = vmax.f32 %v262_v63, 0.0  ;;  %v386_v44 = vpack.c.bf16 %v348_v53, %v347_v50  ;;  %v222_v63 = vmul.f32 %v1546_v51, %v1973_v5  ;;  %25 = vst [vmem:[%s2557_s5] sm:$0x1] %v1919_v52  ;;  %26 = vst [vmem:[%s2558_s6] sm:$0x1] %v1919_v52 }
  0x42   :  { %1847 = vmatmul.mubr.bf16.gmra.mrb[16].mxu0 %v2119_v25  ;;  %v383_v25 = vpack.c.bf16 %v342_v37, %v341_v36  ;;  %v1740_v36 = vld [vmem:[%s2554_s0 + $0xe8] sm:$0xff]   ;;  %v218_v37 = vmul.f32 %v1538_v29, %v1973_v5  ;;  %v290_v49 = vadd.f32 %v1984_v10, %v219_v38  ;;  %v376_v55 = vpack.c.bf16 %v328_v40, %v327_v39 }
  0x43   :  { %1850 = vmatprep.mubr.bf16.mxu0 %v371_v12  ;;  %v1535_v12 = vunpack.c.h.bf16 %v1738_v15  ;;  %v375_v34 = vpack.c.bf16 %v326_v22, %v325_v19  ;;  %v1542_v43 = vunpack.c.l.bf16 %v1740_v36  ;;  %v1543_v47 = vunpack.c.h.bf16 %v1740_v36 }
  0x44   :  { %1874 = vmatprep.mubr.bf16.mxu1 %v383_v25  ;;  %v289_v48 = vadd.f32 %v1984_v10, %v218_v37  ;;  %v354_v62 = vmax.f32 %v290_v49, 0.0  ;;  %v293_v15 = vadd.f32 %v1984_v10, %v222_v63  ;;  %v358_v20 = vmax.f32 %v294_v17, 0.0 }
  0x45   :  { %1875 = vmatmul.mubr.bf16.gmra.mrb[12].mxu1 %v384_v23  ;;  %v217_v16 = vmul.f32 %v1535_v12, %v1973_v5  ;;  %v220_v56 = vmul.f32 %v1542_v43, %v1973_v5  ;;  %v221_v59 = vmul.f32 %v1543_v47, %v1973_v5 }
  0x46   :  { %1878 = vmatprep.mubr.bf16.mxu1 %v385_v28  ;;  %v353_v61 = vmax.f32 %v289_v48, 0.0  ;;  %v357_v19 = vmax.f32 %v293_v15, 0.0 }
  0x47   :  { %v288_v46 = vadd.f32 %v1984_v10, %v217_v16  ;;  %v291_v4 = vadd.f32 %v1984_v10, %v220_v56  ;;  %v292_v9 = vadd.f32 %v1984_v10, %v221_v59 }
  0x48   :  { %v389_v14 = vpack.c.bf16 %v354_v62, %v353_v61  ;;  %v391_v24 = vpack.c.bf16 %v358_v20, %v357_v19 }
  0x49   :  { %v352_v57 = vmax.f32 %v288_v46, 0.0  ;;  %v355_v18 = vmax.f32 %v291_v4, 0.0  ;;  %v356_v3 = vmax.f32 %v292_v9, 0.0 }
  0x4a   :  { %1851 = vmatmul.mubr.bf16.gmra.mrb[20].mxu0 %v372_v35  ;;  %v216_v35 = vmul.f32 %v1534_v26, %v1973_v5 }
  0x4b   :  { %1854 = vmatprep.mubr.bf16.mxu0 %v373_v1  ;;  %v1742_v1 = vld [vmem:[%s2554_s0 + $0xf8] sm:$0xff]   ;;  %v390_v21 = vpack.c.bf16 %v356_v3, %v355_v18 }
  0x4c   :  { %v287_v42 = vadd.f32 %v1984_v10, %v216_v35  ;;  %v1550_v11 = vunpack.c.l.bf16 %v1742_v1  ;;  %v1551_v13 = vunpack.c.h.bf16 %v1742_v1 }
  0x4d   :  { %1879 = vmatmul.mubr.bf16.gmra.mrb[16].mxu1 %v386_v44 }
  0x4e   :  { %v351_v25 = vmax.f32 %v287_v42, 0.0  ;;  %1882 = vmatprep.mubr.bf16.mxu1 %v387_v45  ;;  %v224_v58 = vmul.f32 %v1550_v11, %v1973_v5  ;;  %v225_v7 = vmul.f32 %v1551_v13, %v1973_v5 }
  0x50   :  { %v388_v8 = vpack.c.bf16 %v352_v57, %v351_v25  ;;  %v295_v22 = vadd.f32 %v1984_v10, %v224_v58  ;;  %v296_v23 = vadd.f32 %v1984_v10, %v225_v7 }
  0x52   :  { %1855 = vmatmul.mubr.bf16.gmra.mrb[24].mxu0 %v374_v31  ;;  %v359_v26 = vmax.f32 %v295_v22, 0.0  ;;  %v360_v60 = vmax.f32 %v296_v23, 0.0 }
  0x53   :  { %1858 = vmatprep.mubr.bf16.mxu0 %v375_v34 }
  0x54   :  { %v392_v27 = vpack.c.bf16 %v360_v60, %v359_v26 }
  0x55   :  { %1883 = vmatmul.mubr.bf16.gmra.mrb[20].mxu1 %v388_v8 }
  0x56   :  { %1886 = vmatprep.mubr.bf16.mxu1 %v389_v14 }
  0x5a   :  { %1859 = vmatmul.mubr.bf16.gmra.mrb[28].mxu0 %v376_v55 }
  0x5d   :  { %1887 = vmatmul.mubr.bf16.gmra.mrb[24].mxu1 %v390_v21 }
  0x5e   :  { %1890 = vmatprep.mubr.bf16.mxu1 %v391_v24 }
  0x65   :  { %1891 = vmatmul.mubr.bf16.gmra.mrb[28].mxu1 %v392_v27 }
  0xf5   :  { %v1832_v5 = vpop.f32.mrb[0].mxu0 }
  0xf6   :  { %v491_v12 = vpop.f32.mrb[1].mxu0  ;;  %v1141_v34 = vmul.f32 %v1832_v5, %v1832_v5 }
  0xf7   :  { %v1833_v28 = vpop.f32.mrb[2].mxu0  ;;  %v1139_v30 = vmul.f32 %v491_v12, %v491_v12 }
  0xf8   :  { %v1560_v10 = vpack.c.bf16 %v1833_v28, %v1832_v5  ;;  %v494_v29 = vpop.f32.mrb[3].mxu0  ;;  %v1142_v53 = vmul.f32 %v1833_v28, %v1833_v28 }
  0xf9   :  { %v1555_v31 = vpack.c.bf16 %v494_v29, %v491_v12  ;;  %v1067_v32 = vadd.f32 %v494_v29, %v491_v12  ;;  %v1140_v33 = vmul.f32 %v494_v29, %v494_v29 }
  0xfa   :  { %1743 = vst [vmem:[%s2559_s4 + $0x8] sm:$0xff] %v1560_v10  }
  0xfb   :  { %1556 = vst [vmem:[%s2559_s4] sm:$0xff] %v1555_v31   ;;  %v1068_v50 = vadd.f32 %v1832_v5, %v1067_v32  ;;  %v1203_v35 = vadd.f32 %v1140_v33, %v1139_v30  ;;  %v2271_v15 = vpop.f32.mrb[0].mxu1 }
  0xfc   :  { %v2273_v17 = vpop.f32.mrb[1].mxu1 }
  0xfd   :  { %v1204_v2 = vadd.f32 %v1203_v35, %v1141_v34  ;;  %v1836_v6 = vpop.f32.mrb[4].mxu0  ;;  %v1069_v16 = vadd.f32 %v1833_v28, %v1068_v50  ;;  %v2275_v19 = vpop.f32.mrb[2].mxu1 }
  0xfe   :  { %v507_v36 = vpop.f32.mrb[5].mxu0  ;;  %v1145_v47 = vmul.f32 %v1836_v6, %v1836_v6  ;;  %v1640_v21 = vpack.c.bf16 %v2275_v19, %v2271_v15  ;;  %v2279_v22 = vpop.f32.mrb[3].mxu1 }
  0xff   :  { %v1070_v37 = vadd.f32 %v1069_v16, %v507_v36  ;;  %v1143_v38 = vmul.f32 %v507_v36, %v507_v36  ;;  %v1205_v39 = vadd.f32 %v1204_v2, %v1142_v53  ;;  %v1837_v40 = vpop.f32.mrb[6].mxu0  ;;  %v1635_v27 = vpack.c.bf16 %v2279_v22, %v2273_v17 }
 0x100   :  { %v1570_v41 = vpack.c.bf16 %v1837_v40, %v1836_v6  ;;  %v510_v42 = vpop.f32.mrb[7].mxu0  ;;  %v1146_v51 = vmul.f32 %v1837_v40, %v1837_v40  ;;  %1759 = vst [vmem:[%s2559_s4 + $0x88] sm:$0xff] %v1640_v21  }
 0x101   :  { %v1206_v43 = vadd.f32 %v1205_v39, %v1143_v38  ;;  %v1565_v44 = vpack.c.bf16 %v510_v42, %v507_v36  ;;  %v1071_v45 = vadd.f32 %v1070_v37, %v510_v42  ;;  %v1144_v46 = vmul.f32 %v510_v42, %v510_v42  ;;  %1758 = vst [vmem:[%s2559_s4 + $0x80] sm:$0xff] %v1635_v27  }
 0x102   :  { %1745 = vst [vmem:[%s2559_s4 + $0x18] sm:$0xff] %v1570_v41  }
 0x103   :  { %1744 = vst [vmem:[%s2559_s4 + $0x10] sm:$0xff] %v1565_v44   ;;  %v1072_v48 = vadd.f32 %v1836_v6, %v1071_v45  ;;  %v1207_v49 = vadd.f32 %v1206_v43, %v1144_v46 }
 0x105   :  { %v1208_v54 = vadd.f32 %v1207_v49, %v1145_v47  ;;  %v1840_v55 = vpop.f32.mrb[8].mxu0  ;;  %v1073_v56 = vadd.f32 %v1837_v40, %v1072_v48  ;;  %v2295_v33 = vpop.f32.mrb[4].mxu1 }
 0x106   :  { %v523_v25 = vpop.f32.mrb[9].mxu0  ;;  %v1149_v11 = vmul.f32 %v1840_v55, %v1840_v55  ;;  %v2297_v34 = vpop.f32.mrb[5].mxu1 }
 0x107   :  { %v1074_v57 = vadd.f32 %v1073_v56, %v523_v25  ;;  %v1147_v59 = vmul.f32 %v523_v25, %v523_v25  ;;  %v1209_v61 = vadd.f32 %v1208_v54, %v1146_v51  ;;  %v1841_v62 = vpop.f32.mrb[10].mxu0  ;;  %v2299_v6 = vpop.f32.mrb[6].mxu1 }
 0x108   :  { %v1580_v63 = vpack.c.bf16 %v1841_v62, %v1840_v55  ;;  %v526_v0 = vpop.f32.mrb[11].mxu0  ;;  %v1150_v18 = vmul.f32 %v1841_v62, %v1841_v62  ;;  %v1650_v36 = vpack.c.bf16 %v2299_v6, %v2295_v33  ;;  %v2303_v37 = vpop.f32.mrb[7].mxu1 }
 0x109   :  { %v1210_v1 = vadd.f32 %v1209_v61, %v1147_v59  ;;  %v1575_v4 = vpack.c.bf16 %v526_v0, %v523_v25  ;;  %v1075_v8 = vadd.f32 %v1074_v57, %v526_v0  ;;  %v1148_v9 = vmul.f32 %v526_v0, %v526_v0 }
 0x10a   :  { %1747 = vst [vmem:[%s2559_s4 + $0x28] sm:$0xff] %v1580_v63   ;;  %v1645_v42 = vpack.c.bf16 %v2303_v37, %v2297_v34  ;;  %1761 = vst [vmem:[%s2559_s4 + $0x98] sm:$0xff] %v1650_v36  }
 0x10b   :  { %1746 = vst [vmem:[%s2559_s4 + $0x20] sm:$0xff] %v1575_v4   ;;  %v1076_v13 = vadd.f32 %v1840_v55, %v1075_v8  ;;  %v1211_v14 = vadd.f32 %v1210_v1, %v1148_v9 }
 0x10c   :  { %1760 = vst [vmem:[%s2559_s4 + $0x90] sm:$0xff] %v1645_v42  }
 0x10d   :  { %v1212_v3 = vadd.f32 %v1211_v14, %v1149_v11  ;;  %v1844_v58 = vpop.f32.mrb[12].mxu0  ;;  %v1077_v7 = vadd.f32 %v1841_v62, %v1076_v13 }
 0x10e   :  { %v539_v20 = vpop.f32.mrb[13].mxu0  ;;  %v1153_v30 = vmul.f32 %v1844_v58, %v1844_v58  ;;  %v2319_v55 = vpop.f32.mrb[8].mxu1 }
 0x10f   :  { %v1078_v23 = vadd.f32 %v1077_v7, %v539_v20  ;;  %v1151_v24 = vmul.f32 %v539_v20, %v539_v20  ;;  %v1213_v26 = vadd.f32 %v1212_v3, %v1150_v18  ;;  %v1845_v60 = vpop.f32.mrb[14].mxu0  ;;  %v2321_v56 = vpop.f32.mrb[9].mxu1 }
 0x110   :  { %v1590_v52 = vpack.c.bf16 %v1845_v60, %v1844_v58  ;;  %v542_v5 = vpop.f32.mrb[15].mxu0  ;;  %v1154_v50 = vmul.f32 %v1845_v60, %v1845_v60  ;;  %v2323_v62 = vpop.f32.mrb[10].mxu1 }
 0x111   :  { %v1214_v12 = vadd.f32 %v1213_v26, %v1151_v24  ;;  %v1585_v28 = vpack.c.bf16 %v542_v5, %v539_v20  ;;  %v1079_v10 = vadd.f32 %v1078_v23, %v542_v5  ;;  %v1152_v29 = vmul.f32 %v542_v5, %v542_v5  ;;  %v2327_v1 = vpop.f32.mrb[11].mxu1 }
 0x112   :  { %1749 = vst [vmem:[%s2559_s4 + $0x38] sm:$0xff] %v1590_v52   ;;  %v1660_v0 = vpack.c.bf16 %v2323_v62, %v2319_v55  ;;  %v1655_v13 = vpack.c.bf16 %v2327_v1, %v2321_v56 }
 0x113   :  { %1748 = vst [vmem:[%s2559_s4 + $0x30] sm:$0xff] %v1585_v28   ;;  %v1080_v31 = vadd.f32 %v1844_v58, %v1079_v10  ;;  %v1215_v32 = vadd.f32 %v1214_v12, %v1152_v29 }
 0x114   :  { %1763 = vst [vmem:[%s2559_s4 + $0xa8] sm:$0xff] %v1660_v0   ;;  %1762 = vst [vmem:[%s2559_s4 + $0xa0] sm:$0xff] %v1655_v13  }
 0x115   :  { %v1216_v35 = vadd.f32 %v1215_v32, %v1153_v30  ;;  %v1848_v53 = vpop.f32.mrb[16].mxu0  ;;  %v1081_v2 = vadd.f32 %v1845_v60, %v1080_v31 }
 0x116   :  { %v555_v16 = vpop.f32.mrb[17].mxu0  ;;  %v1157_v49 = vmul.f32 %v1848_v53, %v1848_v53 }
 0x117   :  { %v1082_v38 = vadd.f32 %v1081_v2, %v555_v16  ;;  %v1155_v39 = vmul.f32 %v555_v16, %v555_v16  ;;  %v1217_v40 = vadd.f32 %v1216_v35, %v1154_v50  ;;  %v1849_v41 = vpop.f32.mrb[18].mxu0 }
 0x118   :  { %v1600_v43 = vpack.c.bf16 %v1849_v41, %v1848_v53  ;;  %v558_v44 = vpop.f32.mrb[19].mxu0  ;;  %v1158_v25 = vmul.f32 %v1849_v41, %v1849_v41  ;;  %v2343_v26 = vpop.f32.mrb[12].mxu1 }
 0x119   :  { %v1218_v45 = vadd.f32 %v1217_v40, %v1155_v39  ;;  %v1595_v46 = vpack.c.bf16 %v558_v44, %v555_v16  ;;  %v1083_v47 = vadd.f32 %v1082_v38, %v558_v44  ;;  %v1156_v48 = vmul.f32 %v558_v44, %v558_v44  ;;  %v2345_v60 = vpop.f32.mrb[13].mxu1 }
 0x11a   :  { %1751 = vst [vmem:[%s2559_s4 + $0x48] sm:$0xff] %v1600_v43   ;;  %v2347_v28 = vpop.f32.mrb[14].mxu1 }
 0x11b   :  { %1750 = vst [vmem:[%s2559_s4 + $0x40] sm:$0xff] %v1595_v46   ;;  %v1084_v51 = vadd.f32 %v1848_v53, %v1083_v47  ;;  %v1219_v54 = vadd.f32 %v1218_v45, %v1156_v48  ;;  %v1670_v29 = vpack.c.bf16 %v2347_v28, %v2343_v26  ;;  %v2351_v30 = vpop.f32.mrb[15].mxu1 }
 0x11c   :  { %v1665_v53 = vpack.c.bf16 %v2351_v30, %v2345_v60 }
 0x11d   :  { %v1220_v57 = vadd.f32 %v1219_v54, %v1157_v49  ;;  %v1852_v59 = vpop.f32.mrb[20].mxu0  ;;  %v1085_v61 = vadd.f32 %v1849_v41, %v1084_v51  ;;  %1765 = vst [vmem:[%s2559_s4 + $0xb8] sm:$0xff] %v1670_v29  }
 0x11e   :  { %v571_v63 = vpop.f32.mrb[21].mxu0  ;;  %v1161_v21 = vmul.f32 %v1852_v59, %v1852_v59  ;;  %1764 = vst [vmem:[%s2559_s4 + $0xb0] sm:$0xff] %v1665_v53   ;;  %v1172_v53 = vmul.f32 %v2279_v22, %v2279_v22 }
 0x11f   :  { %v1086_v4 = vadd.f32 %v1085_v61, %v571_v63  ;;  %v1159_v8 = vmul.f32 %v571_v63, %v571_v63  ;;  %v1221_v9 = vadd.f32 %v1220_v57, %v1158_v25  ;;  %v1853_v11 = vpop.f32.mrb[22].mxu0 }
 0x120   :  { %v1610_v14 = vpack.c.bf16 %v1853_v11, %v1852_v59  ;;  %v574_v18 = vpop.f32.mrb[23].mxu0  ;;  %v1162_v27 = vmul.f32 %v1853_v11, %v1853_v11  ;;  %v2367_v44 = vpop.f32.mrb[16].mxu1 }
 0x121   :  { %v1222_v3 = vadd.f32 %v1221_v9, %v1159_v8  ;;  %v1605_v58 = vpack.c.bf16 %v574_v18, %v571_v63  ;;  %v1087_v7 = vadd.f32 %v1086_v4, %v574_v18  ;;  %v1160_v20 = vmul.f32 %v574_v18, %v574_v18  ;;  %v2369_v45 = vpop.f32.mrb[17].mxu1 }
 0x122   :  { %1753 = vst [vmem:[%s2559_s4 + $0x58] sm:$0xff] %v1610_v14   ;;  %v2371_v51 = vpop.f32.mrb[18].mxu1 }
 0x123   :  { %1752 = vst [vmem:[%s2559_s4 + $0x50] sm:$0xff] %v1605_v58   ;;  %v1088_v23 = vadd.f32 %v1852_v59, %v1087_v7  ;;  %v1223_v24 = vadd.f32 %v1222_v3, %v1160_v20  ;;  %v1680_v25 = vpack.c.bf16 %v2371_v51, %v2367_v44  ;;  %v2375_v57 = vpop.f32.mrb[19].mxu1 }
 0x124   :  { %v1675_v4 = vpack.c.bf16 %v2375_v57, %v2369_v45 }
 0x125   :  { %v1224_v52 = vadd.f32 %v1223_v24, %v1161_v21  ;;  %v1856_v5 = vpop.f32.mrb[24].mxu0  ;;  %v1089_v12 = vadd.f32 %v1853_v11, %v1088_v23  ;;  %1767 = vst [vmem:[%s2559_s4 + $0xc8] sm:$0xff] %v1680_v25  }
 0x126   :  { %v587_v10 = vpop.f32.mrb[25].mxu0  ;;  %v1165_v41 = vmul.f32 %v1856_v5, %v1856_v5  ;;  %1766 = vst [vmem:[%s2559_s4 + $0xc0] sm:$0xff] %v1675_v4  }
 0x127   :  { %v1090_v31 = vadd.f32 %v1089_v12, %v587_v10  ;;  %v1163_v32 = vmul.f32 %v587_v10, %v587_v10  ;;  %v1225_v50 = vadd.f32 %v1224_v52, %v1162_v27  ;;  %v1857_v35 = vpop.f32.mrb[26].mxu0  ;;  %v1171_v52 = vmul.f32 %v2273_v17, %v2273_v17 }
 0x128   :  { %v1620_v2 = vpack.c.bf16 %v1857_v35, %v1856_v5  ;;  %v590_v16 = vpop.f32.mrb[27].mxu0  ;;  %v1166_v46 = vmul.f32 %v1857_v35, %v1857_v35  ;;  %v2391_v20 = vpop.f32.mrb[20].mxu1 }
 0x129   :  { %v1226_v36 = vadd.f32 %v1225_v50, %v1163_v32  ;;  %v1615_v38 = vpack.c.bf16 %v590_v16, %v587_v10  ;;  %v1091_v39 = vadd.f32 %v1090_v31, %v590_v16  ;;  %v1164_v40 = vmul.f32 %v590_v16, %v590_v16  ;;  %v2393_v21 = vpop.f32.mrb[21].mxu1 }
 0x12a   :  { %1755 = vst [vmem:[%s2559_s4 + $0x68] sm:$0xff] %v1620_v2  }
 0x12b   :  { %1754 = vst [vmem:[%s2559_s4 + $0x60] sm:$0xff] %v1615_v38   ;;  %v1092_v42 = vadd.f32 %v1856_v5, %v1091_v39  ;;  %v1227_v43 = vadd.f32 %v1226_v36, %v1164_v40  ;;  %v2397_v5 = vpop.f32.mrb[22].mxu1  ;;  %v1174_v39 = vmul.f32 %v2275_v19, %v2275_v19 }
 0x12c   :  { %v1690_v12 = vpack.c.bf16 %v2397_v5, %v2391_v20  ;;  %v2401_v10 = vpop.f32.mrb[23].mxu1 }
 0x12d   :  { %v1228_v47 = vadd.f32 %v1227_v43, %v1165_v41  ;;  %v1860_v48 = vpop.f32.mrb[28].mxu0  ;;  %v1093_v49 = vadd.f32 %v1857_v35, %v1092_v42  ;;  %v1685_v32 = vpack.c.bf16 %v2401_v10, %v2393_v21  ;;  %v1175_v41 = vmul.f32 %v2297_v34, %v2297_v34 }
 0x12e   :  { %v603_v54 = vpop.f32.mrb[29].mxu0  ;;  %v1169_v3 = vmul.f32 %v1860_v48, %v1860_v48  ;;  %1769 = vst [vmem:[%s2559_s4 + $0xd8] sm:$0xff] %v1690_v12   ;;  %v1183_v12 = vmul.f32 %v2345_v60, %v2345_v60 }
 0x12f   :  { %v1094_v59 = vadd.f32 %v1093_v49, %v603_v54  ;;  %v1167_v61 = vmul.f32 %v603_v54, %v603_v54  ;;  %v1229_v63 = vadd.f32 %v1228_v47, %v1166_v46  ;;  %v1861_v0 = vpop.f32.mrb[30].mxu0  ;;  %1768 = vst [vmem:[%s2559_s4 + $0xd0] sm:$0xff] %v1685_v32  }
 0x130   :  { %v1630_v8 = vpack.c.bf16 %v1861_v0, %v1860_v48  ;;  %v606_v9 = vpop.f32.mrb[31].mxu0  ;;  %v1170_v23 = vmul.f32 %v1861_v0, %v1861_v0  ;;  %v2418_v36 = vpop.f32.mrb[24].mxu1 }
 0x131   :  { %v1230_v11 = vadd.f32 %v1229_v63, %v1167_v61  ;;  %v1625_v13 = vpack.c.bf16 %v606_v9, %v603_v54  ;;  %v1095_v14 = vadd.f32 %v1094_v59, %v606_v9  ;;  %v1168_v18 = vmul.f32 %v606_v9, %v606_v9  ;;  %v2420_v38 = vpop.f32.mrb[25].mxu1 }
 0x132   :  { %1757 = vst [vmem:[%s2559_s4 + $0x78] sm:$0xff] %v1630_v8   ;;  %v2427_v42 = vpop.f32.mrb[26].mxu1  ;;  %v1176_v54 = vmul.f32 %v2303_v37, %v2303_v37  ;;  %v1179_v8 = vmul.f32 %v2321_v56, %v2321_v56 }
 0x133   :  { %1756 = vst [vmem:[%s2559_s4 + $0x70] sm:$0xff] %v1625_v13   ;;  %v1096_v58 = vadd.f32 %v1860_v48, %v1095_v14  ;;  %v1231_v7 = vadd.f32 %v1230_v11, %v1168_v18  ;;  %v1700_v43 = vpack.c.bf16 %v2427_v42, %v2418_v36 }
 0x135   :  { %v1232_v24 = vadd.f32 %v1231_v7, %v1169_v3  ;;  %v1097_v27 = vadd.f32 %v1861_v0, %v1096_v58  ;;  %1771 = vst [vmem:[%s2559_s4 + $0xe8] sm:$0xff] %v1700_v43   ;;  %v1178_v0 = vmul.f32 %v2299_v6, %v2299_v6  ;;  %v1180_v58 = vmul.f32 %v2327_v1, %v2327_v1 }
 0x137   :  { %v1098_v29 = vadd.f32 %v1097_v27, %v2273_v17  ;;  %v1233_v31 = vadd.f32 %v1232_v24, %v1170_v23  ;;  %v1173_v17 = vmul.f32 %v2271_v15, %v2271_v15  ;;  %v1182_v24 = vmul.f32 %v2323_v62, %v2323_v62 }
 0x139   :  { %v1234_v50 = vadd.f32 %v1233_v31, %v1171_v52  ;;  %v1099_v35 = vadd.f32 %v1098_v29, %v2279_v22 }
 0x13b   :  { %v1100_v2 = vadd.f32 %v2271_v15, %v1099_v35  ;;  %v1235_v16 = vadd.f32 %v1234_v50, %v1172_v53  ;;  %v2431_v15 = vpop.f32.mrb[27].mxu1  ;;  %v1184_v50 = vmul.f32 %v2351_v30, %v2351_v30 }
 0x13c   :  { %v1695_v48 = vpack.c.bf16 %v2431_v15, %v2420_v38  ;;  %v2448_v61 = vpop.f32.mrb[28].mxu1 }
 0x13d   :  { %v1236_v40 = vadd.f32 %v1235_v16, %v1173_v17  ;;  %v1101_v22 = vadd.f32 %v2275_v19, %v1100_v2  ;;  %v2450_v63 = vpop.f32.mrb[29].mxu1 }
 0x13e   :  { %1770 = vst [vmem:[%s2559_s4 + $0xe0] sm:$0xff] %v1695_v48   ;;  %v2457_v9 = vpop.f32.mrb[30].mxu1 }
 0x13f   :  { %v1102_v46 = vadd.f32 %v1101_v22, %v2297_v34  ;;  %v1237_v47 = vadd.f32 %v1236_v40, %v1174_v39  ;;  %v1177_v34 = vmul.f32 %v2295_v33, %v2295_v33  ;;  %v1710_v11 = vpack.c.bf16 %v2457_v9, %v2448_v61 }
 0x140   :  { %v1188_v22 = vmul.f32 %v2375_v57, %v2375_v57 }
 0x141   :  { %v1238_v19 = vadd.f32 %v1237_v47, %v1175_v41  ;;  %v1103_v49 = vadd.f32 %v1102_v46, %v2303_v37  ;;  %1773 = vst [vmem:[%s2559_s4 + $0xf8] sm:$0xff] %v1710_v11   ;;  %v1196_v11 = vmul.f32 %v2431_v15, %v2431_v15 }
 0x143   :  { %v1104_v25 = vadd.f32 %v2295_v33, %v1103_v49  ;;  %v1239_v59 = vadd.f32 %v1238_v19, %v1176_v54  ;;  %v2461_v33 = vpop.f32.mrb[31].mxu1  ;;  %v1192_v54 = vmul.f32 %v2401_v10, %v2401_v10 }
 0x144   :  { %v1705_v18 = vpack.c.bf16 %v2461_v33, %v2450_v63 }
 0x145   :  { %v1240_v4 = vadd.f32 %v1239_v59, %v1177_v34  ;;  %v1105_v37 = vadd.f32 %v2299_v6, %v1104_v25 }
 0x146   :  { %1772 = vst [vmem:[%s2559_s4 + $0xf0] sm:$0xff] %v1705_v18  }
 0x147   :  { %v1106_v13 = vadd.f32 %v1105_v37, %v2321_v56  ;;  %v1241_v14 = vadd.f32 %v1240_v4, %v1178_v0  ;;  %v1181_v56 = vmul.f32 %v2319_v55, %v2319_v55 }
 0x149   :  { %v1242_v6 = vadd.f32 %v1241_v14, %v1179_v8  ;;  %v1107_v3 = vadd.f32 %v1106_v13, %v2327_v1 }
 0x14b   :  { %v1108_v7 = vadd.f32 %v2319_v55, %v1107_v3  ;;  %v1243_v23 = vadd.f32 %v1242_v6, %v1180_v58  ;;  %v1185_v55 = vmul.f32 %v2343_v26, %v2343_v26 }
 0x14d   :  { %v1244_v27 = vadd.f32 %v1243_v23, %v1181_v56  ;;  %v1109_v52 = vadd.f32 %v2323_v62, %v1108_v7  ;;  %v1186_v62 = vmul.f32 %v2347_v28, %v2347_v28  ;;  %v1200_v7 = vmul.f32 %v2461_v33, %v2461_v33 }
 0x14f   :  { %v1110_v1 = vadd.f32 %v1109_v52, %v2345_v60  ;;  %v1245_v29 = vadd.f32 %v1244_v27, %v1182_v24  ;;  %v1187_v60 = vmul.f32 %v2369_v45, %v2369_v45 }
 0x151   :  { %v1246_v31 = vadd.f32 %v1245_v29, %v1183_v12  ;;  %v1111_v32 = vadd.f32 %v1110_v1, %v2351_v30 }
 0x153   :  { %v1112_v35 = vadd.f32 %v2343_v26, %v1111_v32  ;;  %v1247_v53 = vadd.f32 %v1246_v31, %v1184_v50  ;;  %v1189_v26 = vmul.f32 %v2367_v44, %v2367_v44 }
 0x155   :  { %v1248_v17 = vadd.f32 %v1247_v53, %v1185_v55  ;;  %v1113_v2 = vadd.f32 %v2347_v28, %v1112_v35  ;;  %v1190_v28 = vmul.f32 %v2371_v51, %v2371_v51 }
 0x157   :  { %v1114_v16 = vadd.f32 %v1113_v2, %v2369_v45  ;;  %v1249_v39 = vadd.f32 %v1248_v17, %v1186_v62  ;;  %v1191_v45 = vmul.f32 %v2393_v21, %v2393_v21 }
 0x159   :  { %v1250_v40 = vadd.f32 %v1249_v39, %v1187_v60  ;;  %v1115_v30 = vadd.f32 %v1114_v16, %v2375_v57 }
 0x15b   :  { %v1116_v41 = vadd.f32 %v2367_v44, %v1115_v30  ;;  %v1251_v43 = vadd.f32 %v1250_v40, %v1188_v22  ;;  %v1193_v44 = vmul.f32 %v2391_v20, %v2391_v20 }
 0x15d   :  { %v1252_v46 = vadd.f32 %v1251_v43, %v1189_v26  ;;  %v1117_v47 = vadd.f32 %v2371_v51, %v1116_v41  ;;  %v1194_v51 = vmul.f32 %v2397_v5, %v2397_v5 }
 0x15f   :  { %v1118_v48 = vadd.f32 %v1117_v47, %v2393_v21  ;;  %v1253_v19 = vadd.f32 %v1252_v46, %v1190_v28  ;;  %v1195_v21 = vmul.f32 %v2420_v38, %v2420_v38 }
 0x161   :  { %v1254_v49 = vadd.f32 %v1253_v19, %v1191_v45  ;;  %v1119_v57 = vadd.f32 %v1118_v48, %v2401_v10 }
 0x163   :  { %v1120_v34 = vadd.f32 %v2391_v20, %v1119_v57  ;;  %v1255_v25 = vadd.f32 %v1254_v49, %v1192_v54  ;;  %v1197_v20 = vmul.f32 %v2418_v36, %v2418_v36 }
 0x165   :  { %v1256_v59 = vadd.f32 %v1255_v25, %v1193_v44  ;;  %v1121_v0 = vadd.f32 %v2397_v5, %v1120_v34  ;;  %v1198_v5 = vmul.f32 %v2427_v42, %v2427_v42 }
 0x167   :  { %v1122_v4 = vadd.f32 %v1121_v0, %v2420_v38  ;;  %v1257_v37 = vadd.f32 %v1256_v59, %v1194_v51  ;;  %v1199_v38 = vmul.f32 %v2450_v63, %v2450_v63 }
 0x169   :  { %v1258_v8 = vadd.f32 %v1257_v37, %v1195_v21  ;;  %v1123_v10 = vadd.f32 %v1122_v4, %v2431_v15 }
 0x16b   :  { %v1124_v13 = vadd.f32 %v2418_v36, %v1123_v10  ;;  %v1259_v14 = vadd.f32 %v1258_v8, %v1196_v11  ;;  %v1201_v36 = vmul.f32 %v2448_v61, %v2448_v61 }
 0x16d   :  { %v1260_v18 = vadd.f32 %v1259_v14, %v1197_v20  ;;  %v1125_v6 = vadd.f32 %v2427_v42, %v1124_v13  ;;  %v1202_v42 = vmul.f32 %v2457_v9, %v2457_v9 }
 0x16f   :  { %v1126_v3 = vadd.f32 %v1125_v6, %v2450_v63  ;;  %v1261_v58 = vadd.f32 %v1260_v18, %v1198_v5 }
 0x171   :  { %v1262_v56 = vadd.f32 %v1261_v58, %v1199_v38  ;;  %v1127_v15 = vadd.f32 %v1126_v3, %v2461_v33 }
 0x173   :  { %v1128_v23 = vadd.f32 %v2448_v61, %v1127_v15  ;;  %v1263_v24 = vadd.f32 %v1262_v56, %v1200_v7  ;;  %v1066_v61 = vld [vmem:[%s2557_s5] sm:$0x1] }
 0x175   :  { %v1129_v27 = vadd.f32 %v2457_v9, %v1128_v23  ;;  %v1264_v52 = vadd.f32 %v1263_v24, %v1201_v36  ;;  %v1138_v9 = vld [vmem:[%s2558_s6] sm:$0x1] }
 0x177   :  { %v1130_v63 = vrot.slane %v1129_v27, 4  ;;  %v1265_v12 = vadd.f32 %v1264_v52, %v1202_v42 }
 0x179   :  { %v1131_v1 = vadd.f32 %v1130_v63, %v1129_v27  ;;  %v1266_v29 = vrot.slane %v1265_v12, 4 }
 0x17b   :  { %v1132_v31 = vrot.slane %v1131_v1, 2  ;;  %v1267_v32 = vadd.f32 %v1266_v29, %v1265_v12 }
 0x17d   :  { %v1133_v50 = vadd.f32 %v1132_v31, %v1131_v1  ;;  %v1268_v33 = vrot.slane %v1267_v32, 2 }
 0x17f   :  { %v1134_v55 = vrot.slane %v1133_v50, 1  ;;  %v1269_v35 = vadd.f32 %v1268_v33, %v1267_v32 }
 0x181   :  { %v1135_v53 = vadd.f32 %v1134_v55, %v1133_v50  ;;  %v1270_v62 = vrot.slane %v1269_v35, 1 }
 0x183   :  { %v1136_v17 = vadd.f32 %v1135_v53, %v1066_v61  ;;  %v1271_v2 = vadd.f32 %v1270_v62, %v1269_v35 }
 0x185   :  { %1137 = vst [vmem:[%s2557_s5] sm:$0x1] %v1136_v17  ;;  %v1272_v60 = vadd.f32 %v1271_v2, %v1138_v9 }
 0x187   :  { %1273 = vst [vmem:[%s2558_s6] sm:$0x1] %v1272_v60 }

// kernel: dense_block_forward.11
= control target key start
LH: loop header
LB: loop body
LE: loop exit
PB: predicated region body
PF: predicated region fallthrough
CT: control target
= control target key end

     0   :  { %s4739_s15 = smov 0   ;;  %s5467_s0 = inlined_call_operand.vmem [shape: bf16[32,16,128], index: 0, kind: input, shape index: {}]   ;;  %s5468_s1 = inlined_call_operand.vmem [shape: f32[1,128], index: 1, kind: input, shape index: {}]   ;;  %s5469_s2 = inlined_call_operand.vmem [shape: f32[1,128], index: 2, kind: input, shape index: {}]   ;;  %s5470_s3 = inlined_call_operand.vmem [shape: bf16[1152,128], index: 3, kind: input, shape index: {}]   ;;  %s5471_s4 = inlined_call_operand.vmem [shape: bf16[32,16,128], index: 4, kind: output, shape index: {}]  }
   0x1 LB: > { %s3368_s16 = sadd.s32 4294967295, %s4711_s15   ;;  %p3372_p0 = scmp.ge.s32.totalorder %s4711_s15, 1  ;;  %s4711_s15 = sphi %s4739_s15, %s14_s15  }
   0x2   : > { %p164_p1 = scmp.lt.s32.totalorder %s4711_s15, 3 }
   0x4   : > { %p165_p2 = pnand %p3372_p0, %p164_p1 }
   0x5   : > { %v4624_v0 = vld [vmem:[%s5470_s3 + $0x40] sm:$0xff] (!%p165_p2)   ;;  %v4713_v2 = vmov (!%p165_p2), 0.0   ;;  %s3373_s21 = sshll.u32 (!%p165_p2), %s3368_s16, 4  ;;  %v4626_v3 = vld [vmem:[%s5470_s3 + $0x48] sm:$0xff] (!%p165_p2)   ;;  %v4628_v5 = vld [vmem:[%s5470_s3 + $0x50] sm:$0xff] (!%p165_p2)  }
   0x6   : > { %168 = sbr.rel (%p165_p2) target bundleno = 539 (0x21b), region = 36  ;;  %v4625_v1 = vld [vmem:[%s5470_s3 + $0x100] sm:$0xff] (!%p165_p2)   ;;  %207 = vst [vmem:[#allocation2] sm:$0xff] (!%p165_p2), %v4713_v2  ;;  %208 = vst [vmem:[#allocation2 + $0x8] sm:$0xff] (!%p165_p2), %v4713_v2  ;;  %3911 = vmatprep.subr.bf16.mxu1 (!%p165_p2), %v4624_v0  ;;  %p193_p3 = scmp.lt.s32.totalorder (!%p165_p2), %s3373_s21, 31  ;;  %v4627_v4 = vld [vmem:[%s5470_s3 + $0x108] sm:$0xff] (!%p165_p2)  }
   0x7   : > { %209 = vst [vmem:[#allocation2 + $0x10] sm:$0x3] (!%p165_p2), %v4713_v2  ;;  %210 = vst [vmem:[#allocation2 + $0x18] sm:$0xff] (!%p165_p2), %v4713_v2  ;;  %4103 = vmatprep.subr.bf16.mxu0 (!%p165_p2), %v4625_v1  ;;  %3912 = vmatpush3.bf16.msra.mxu1 (!%p165_p2), %v4624_v0  ;;  %v4629_v6 = vld [vmem:[%s5470_s3 + $0x110] sm:$0xff] (!%p165_p2)   ;;  %v4630_v7 = vld [vmem:[%s5470_s3 + $0x58] sm:$0xff] (!%p165_p2)  }
   0x8   : > { %211 = vst [vmem:[#allocation2 + $0x20] sm:$0xff] (!%p165_p2), %v4713_v2  ;;  %212 = vst [vmem:[#allocation2 + $0x28] sm:$0x3] (!%p165_p2), %v4713_v2  ;;  %4104 = vmatpush3.bf16.msra.mxu0 (!%p165_p2), %v4625_v1  ;;  %3913 = vmatprep.subr.bf16.mxu1 (!%p165_p2), %v4626_v3  ;;  %v4631_v8 = vld [vmem:[%s5470_s3 + $0x118] sm:$0xff] (!%p165_p2)   ;;  %v4632_v9 = vld [vmem:[%s5470_s3 + $0x60] sm:$0xff] (!%p165_p2)  }
   0x9   : > { %213 = vst [vmem:[#allocation2 + $0x30] sm:$0xff] (!%p165_p2), %v4713_v2  ;;  %214 = vst [vmem:[#allocation2 + $0x38] sm:$0xff] (!%p165_p2), %v4713_v2  ;;  %4105 = vmatprep.subr.bf16.mxu0 (!%p165_p2), %v4627_v4  ;;  %v4633_v10 = vld [vmem:[%s5470_s3 + $0x120] sm:$0xff] (!%p165_p2)   ;;  %v4634_v11 = vld [vmem:[%s5470_s3 + $0x68] sm:$0xff] (!%p165_p2)  }
   0xa   : > { %215 = vst [vmem:[#allocation2 + $0x40] sm:$0x3] (!%p165_p2), %v4713_v2  ;;  %216 = vst [vmem:[#allocation2 + $0x48] sm:$0xff] (!%p165_p2), %v4713_v2  ;;  %v4635_v15 = vld [vmem:[%s5470_s3 + $0x128] sm:$0xff] (!%p165_p2)   ;;  %v4799_v19 = vld [vmem:[%s5468_s1] ss:$0 sm:$0xff] (!%p165_p2) }
   0xb   : > { %217 = vst [vmem:[#allocation2 + $0x50] sm:$0xff] (!%p165_p2), %v4713_v2  ;;  %218 = vst [vmem:[#allocation2 + $0x58] sm:$0x3] (!%p165_p2), %v4713_v2  ;;  %3914 = vmatpush3.bf16.msra.mxu1 (!%p165_p2), %v4626_v3  ;;  %v4804_v20 = vld [vmem:[%s5469_s2] ss:$0 sm:$0xff] (!%p165_p2)  ;;  %v4636_v22 = vld [vmem:[%s5470_s3 + $0x70] sm:$0xff] (!%p165_p2)  }
   0xc   : > { %219 = vst [vmem:[#allocation2 + $0x60] sm:$0xff] (!%p165_p2), %v4713_v2  ;;  %220 = vst [vmem:[#allocation2 + $0x68] sm:$0xff] (!%p165_p2), %v4713_v2  ;;  %4106 = vmatpush3.bf16.msra.mxu0 (!%p165_p2), %v4627_v4  ;;  %3915 = vmatprep.subr.bf16.mxu1 (!%p165_p2), %v4628_v5  ;;  %v4637_v27 = vld [vmem:[%s5470_s3 + $0x130] sm:$0xff] (!%p165_p2)   ;;  %v4638_v36 = vld [vmem:[%s5470_s3 + $0x78] sm:$0xff] (!%p165_p2)  }
   0xd   : > { %221 = vst [vmem:[#allocation2 + $0x70] sm:$0x3] %v4713_v2  ;;  %222 = vst [vmem:[#allocation2 + $0x78] sm:$0xff] %v4713_v2  ;;  %s5473_s21 = smov (!%p193_p3, %s3373_s21), 31  ;;  %4107 = vmatprep.subr.bf16.mxu0 %v4629_v6  ;;  %v532_v12 = vld [vmem:[#allocation2 + $0x1] sm:$0xff]  ;;  %v4639_v37 = vld [vmem:[%s5470_s3 + $0x138] sm:$0xff]  }
   0xe   : > { %223 = vst [vmem:[#allocation2 + $0x80] sm:$0xff] %v4713_v2  ;;  %224 = vst [vmem:[#allocation2 + $0x88] sm:$0x3] %v4713_v2  ;;  %s3487_s8 = sshll.u32 %s5473_s21, 3  ;;  %v533_v13 = vld [vmem:[#allocation2 + $0x9] sm:$0xff]  ;;  %v4640_v59 = vld [vmem:[%s5470_s3] sm:$0xff]  }
   0xf   : > { %225 = vst [vmem:[#allocation2 + $0x90] sm:$0xff] %v4713_v2  ;;  %226 = vst [vmem:[#allocation2 + $0x98] sm:$0xff] %v4713_v2  ;;  %3916 = vmatpush3.bf16.msra.mxu1 %v4628_v5  ;;  %s4787_s16 = scalar_lea.vmem %s5467_s0, %s3487_s8  ;;  %v564_v16 = vpack.c.bf16 %v533_v13, %v532_v12  ;;  %v4641_v1 = vld [vmem:[%s5470_s3 + $0x140] sm:$0xff]  }
  0x10   : > { %227 = vst [vmem:[#allocation2 + $0xa0] sm:$0x3] %v4713_v2  ;;  %228 = vst [vmem:[#allocation2 + $0xa8] sm:$0xff] %v4713_v2  ;;  %4108 = vmatpush3.bf16.msra.mxu0 %v4629_v6  ;;  %3917 = vmatprep.subr.bf16.mxu1 %v4630_v7  ;;  %v3522_v14 = vld [vmem:[%s4787_s16] sm:$0xff]   ;;  %v3665_v21 = vld [vmem:[%s4787_s16 + $0x8] sm:$0xff]  }
  0x11   : > { %229 = vst [vmem:[#allocation2 + $0xb0] sm:$0xff] %v4713_v2  ;;  %230 = vst [vmem:[#allocation2 + $0xb8] sm:$0x3] %v4713_v2  ;;  %4109 = vmatprep.subr.bf16.mxu0 %v4631_v8  ;;  %v3523_v17 = vunpack.c.l.bf16 %v3522_v14  ;;  %v3524_v18 = vunpack.c.h.bf16 %v3522_v14  ;;  %3927 = vmatprep.mubr.bf16.mxu1 %v564_v16  ;;  %v3527_v25 = vunpack.c.l.bf16 %v3665_v21  ;;  %v3528_v26 = vunpack.c.h.bf16 %v3665_v21  ;;  %v3666_v32 = vld [vmem:[%s4787_s16 + $0x10] sm:$0xff]   ;;  %v3667_v35 = vld [vmem:[%s4787_s16 + $0x18] sm:$0xff]  }
  0x12   : > { %231 = vst [vmem:[#allocation2 + $0xc0] sm:$0xff] %v4713_v2  ;;  %232 = vst [vmem:[#allocation2 + $0xc8] sm:$0xff] %v4713_v2  ;;  %v3531_v33 = vunpack.c.l.bf16 %v3666_v32  ;;  %v3532_v34 = vunpack.c.h.bf16 %v3666_v32  ;;  %v3535_v44 = vunpack.c.l.bf16 %v3667_v35  ;;  %v3536_v45 = vunpack.c.h.bf16 %v3667_v35  ;;  %v3668_v46 = vld [vmem:[%s4787_s16 + $0x20] sm:$0xff]   ;;  %v3669_v55 = vld [vmem:[%s4787_s16 + $0x28] sm:$0xff]  }
  0x13   : > { %233 = vst [vmem:[#allocation2 + $0xd0] sm:$0x3] %v4713_v2  ;;  %234 = vst [vmem:[#allocation2 + $0xd8] sm:$0xff] %v4713_v2  ;;  %3918 = vmatpush3.bf16.msra.mxu1 %v4630_v7  ;;  %v332_v23 = vmul.f32 %v3523_v17, %v4799_v19  ;;  %v333_v24 = vmul.f32 %v3524_v18, %v4799_v19  ;;  %v334_v30 = vmul.f32 %v3527_v25, %v4799_v19  ;;  %v3670_v0 = vld [vmem:[%s4787_s16 + $0x30] sm:$0xff]   ;;  %v4642_v21 = vld [vmem:[%s5470_s3 + $0x148] sm:$0xff]  }
  0x14   : > { %235 = vst [vmem:[#allocation2 + $0xe0] sm:$0xff] %v4713_v2  ;;  %236 = vst [vmem:[#allocation2 + $0xe8] sm:$0x3] %v4713_v2  ;;  %4110 = vmatpush3.bf16.msra.mxu0 %v4631_v8  ;;  %3919 = vmatprep.subr.bf16.mxu1 %v4632_v9  ;;  %v335_v31 = vmul.f32 %v3528_v26, %v4799_v19  ;;  %v336_v42 = vmul.f32 %v3531_v33, %v4799_v19  ;;  %v3539_v50 = vunpack.c.l.bf16 %v3668_v46  ;;  %v3672_v26 = vld [vmem:[%s4787_s16 + $0x40] sm:$0xff]  }
  0x15   : > { %237 = vst [vmem:[#allocation2 + $0xf0] sm:$0xff] %v4713_v2  ;;  %238 = vst [vmem:[#allocation2 + $0xf8] sm:$0xff] %v4713_v2  ;;  %4111 = vmatprep.subr.bf16.mxu0 %v4633_v10  ;;  %v371_v28 = vadd.f32 %v4804_v20, %v332_v23  ;;  %v372_v29 = vadd.f32 %v4804_v20, %v333_v24  ;;  %v373_v40 = vadd.f32 %v4804_v20, %v334_v30 }
  0x16   : > { %239 = vst [vmem:[#allocation2 + $0x100] sm:$0x3] %v4713_v2  ;;  %240 = vst [vmem:[#allocation2 + $0x108] sm:$0xff] %v4713_v2  ;;  %v374_v41 = vadd.f32 %v4804_v20, %v335_v31  ;;  %v337_v43 = vmul.f32 %v3532_v34, %v4799_v19  ;;  %v375_v51 = vadd.f32 %v4804_v20, %v336_v42  ;;  %v3540_v56 = vunpack.c.h.bf16 %v3668_v46  ;;  %v4646_v34 = vld [vmem:[%s5470_s3 + $0x10] sm:$0xff]  }
  0x17   : > { %241 = vst [vmem:[#allocation2 + $0x110] sm:$0xff] %v4713_v2  ;;  %242 = vst [vmem:[#allocation2 + $0x118] sm:$0x3] %v4713_v2  ;;  %3920 = vmatpush3.bf16.msra.mxu1 %v4632_v9  ;;  %v403_v38 = vmax.f32 %v371_v28, 0.0  ;;  %v404_v39 = vmax.f32 %v372_v29, 0.0  ;;  %v405_v48 = vmax.f32 %v373_v40, 0.0  ;;  %v338_v53 = vmul.f32 %v3535_v44, %v4799_v19 }
  0x18   : > { %243 = vst [vmem:[#allocation2 + $0x120] sm:$0xff] %v4713_v2  ;;  %244 = vst [vmem:[#allocation2 + $0x128] sm:$0xff] %v4713_v2  ;;  %4112 = vmatpush3.bf16.msra.mxu0 %v4633_v10  ;;  %3921 = vmatprep.subr.bf16.mxu1 %v4634_v11  ;;  %v406_v49 = vmax.f32 %v374_v41, 0.0  ;;  %v376_v52 = vadd.f32 %v4804_v20, %v337_v43  ;;  %v339_v54 = vmul.f32 %v3536_v45, %v4799_v19  ;;  %v3671_v10 = vld [vmem:[%s4787_s16 + $0x38] sm:$0xff]   ;;  %v4644_v40 = vld [vmem:[%s5470_s3 + $0x150] sm:$0xff]  }
  0x19   : > { %245 = vst [vmem:[#allocation2 + $0x130] sm:$0x3] %v4713_v2  ;;  %246 = vst [vmem:[#allocation2 + $0x138] sm:$0xff] %v4713_v2  ;;  %4113 = vmatprep.subr.bf16.mxu0 %v4635_v15  ;;  %v1656_v47 = vpack.c.bf16 %v404_v39, %v403_v38  ;;  %v340_v57 = vmul.f32 %v3539_v50, %v4799_v19  ;;  %v3543_v58 = vunpack.c.l.bf16 %v3669_v55  ;;  %v407_v60 = vmax.f32 %v375_v51, 0.0  ;;  %v3674_v44 = vld [vmem:[%s4787_s16 + $0x50] sm:$0xff]  }
  0x1a   : > { %247 = vst [vmem:[#allocation2 + $0x140] sm:$0xff] %v4713_v2  ;;  %248 = vst [vmem:[#allocation2 + $0x148] sm:$0x3] %v4713_v2  ;;  %v408_v61 = vmax.f32 %v376_v52, 0.0  ;;  %v4842_v62 = vadd.f32 %v4804_v20, %v338_v53  ;;  %v4845_v63 = vadd.f32 %v4804_v20, %v339_v54  ;;  %v3544_v4 = vunpack.c.h.bf16 %v3669_v55  ;;  %v4645_v53 = vld [vmem:[%s5470_s3 + $0x158] sm:$0xff]  }
  0x1b   : > { %249 = vst [vmem:[#allocation2 + $0x150] sm:$0xff] %v4713_v2  ;;  %250 = vst [vmem:[#allocation2 + $0x158] sm:$0xff] %v4713_v2  ;;  %3922 = vmatpush3.bf16.msra.mxu1 %v4634_v11  ;;  %4119 = vmatprep.mubr.bf16.mxu0 %v1656_v47  ;;  %v4853_v3 = vadd.f32 %v4804_v20, %v340_v57  ;;  %v342_v5 = vmul.f32 %v3543_v58, %v4799_v19  ;;  %v3547_v9 = vunpack.c.l.bf16 %v3670_v0  ;;  %v3675_v57 = vld [vmem:[%s4787_s16 + $0x58] sm:$0xff]  }
  0x1c   : > { %251 = vst [vmem:[#allocation2 + $0x160] sm:$0x3] %v4713_v2  ;;  %252 = vst [vmem:[#allocation2 + $0x168] sm:$0xff] %v4713_v2  ;;  %4114 = vmatpush3.bf16.msra.mxu0 %v4635_v15  ;;  %3923 = vmatprep.subr.bf16.mxu1 %v4636_v22  ;;  %v1657_v6 = vpack.c.bf16 %v406_v49, %v405_v48  ;;  %v409_v7 = vmax.f32 %v4842_v62, 0.0  ;;  %v410_v8 = vmax.f32 %v4845_v63, 0.0  ;;  %v3548_v16 = vunpack.c.h.bf16 %v3670_v0  ;;  %v4649_v62 = vld [vmem:[%s5470_s3 + $0x18] sm:$0xff]  }
  0x1d   : > { %253 = vst [vmem:[#allocation2 + $0x170] sm:$0xff] %v4713_v2  ;;  %254 = vst [vmem:[#allocation2 + $0x178] sm:$0x3] %v4713_v2  ;;  %4115 = vmatprep.subr.bf16.mxu0 %v4637_v27  ;;  %v411_v12 = vmax.f32 %v4853_v3, 0.0  ;;  %v343_v13 = vmul.f32 %v3544_v4, %v4799_v19  ;;  %v4863_v14 = vadd.f32 %v4804_v20, %v342_v5  ;;  %v3551_v18 = vunpack.c.l.bf16 %v3671_v10 }
  0x1e   : > { %255 = vst [vmem:[#allocation2 + $0x180] sm:$0xff] %v4713_v2  ;;  %256 = vst [vmem:[#allocation2 + $0x188] sm:$0xff] %v4713_v2  ;;  %v4865_v15 = vpack.c.bf16 %v408_v61, %v407_v60  ;;  %v344_v17 = vmul.f32 %v3547_v9, %v4799_v19  ;;  %v3552_v25 = vunpack.c.h.bf16 %v3671_v10  ;;  %v345_v28 = vmul.f32 %v3548_v16, %v4799_v19 }
  0x1f   : > { %257 = vst [vmem:[#allocation2 + $0x190] sm:$0x3] %v4713_v2  ;;  %258 = vst [vmem:[#allocation2 + $0x198] sm:$0xff] %v4713_v2  ;;  %3924 = vmatpush3.bf16.msra.mxu1 %v4636_v22  ;;  %v4872_v23 = vadd.f32 %v4804_v20, %v343_v13  ;;  %v413_v24 = vmax.f32 %v4863_v14, 0.0  ;;  %v346_v30 = vmul.f32 %v3551_v18, %v4799_v19  ;;  %v3555_v33 = vunpack.c.l.bf16 %v3672_v26  ;;  %v3677_v13 = vld [vmem:[%s4787_s16 + $0x68] sm:$0xff]  }
  0x20   : > { %259 = vst [vmem:[#allocation2 + $0x1a0] sm:$0xff] %v4713_v2  ;;  %260 = vst [vmem:[#allocation2 + $0x1a8] sm:$0x3] %v4713_v2  ;;  %4116 = vmatpush3.bf16.msra.mxu0 %v4637_v27  ;;  %3925 = vmatprep.subr.bf16.mxu1 %v4638_v36  ;;  %v341_v2 = vmul.f32 %v3540_v56, %v4799_v19  ;;  %v4643_v27 = vld [vmem:[%s5470_s3 + $0x8] sm:$0xff]   ;;  %v4881_v29 = vadd.f32 %v4804_v20, %v344_v17  ;;  %v3563_v56 = vunpack.c.l.bf16 %v3674_v44 }
  0x21   : > { %436 = vst [vmem:[#allocation2 + $0x19] sm:$0xff] %v403_v38  ;;  %437 = vst [vmem:[#allocation2 + $0x21] sm:$0xff] %v404_v39  ;;  %4117 = vmatprep.subr.bf16.mxu0 %v4639_v37  ;;  %v414_v31 = vmax.f32 %v4872_v23, 0.0  ;;  %v347_v32 = vmul.f32 %v3552_v25, %v4799_v19  ;;  %v4892_v35 = vadd.f32 %v4804_v20, %v345_v28  ;;  %v3556_v38 = vunpack.c.h.bf16 %v3672_v26  ;;  %v3673_v39 = vld [vmem:[%s4787_s16 + $0x48] sm:$0xff]  }
  0x22   : > { %438 = vst [vmem:[#allocation2 + $0x31] sm:$0xff] %v405_v48  ;;  %439 = vst [vmem:[#allocation2 + $0x39] sm:$0xff] %v406_v49  ;;  %v380_v11 = vadd.f32 %v4804_v20, %v341_v2  ;;  %v348_v42 = vmul.f32 %v3555_v33, %v4799_v19  ;;  %v3559_v43 = vunpack.c.l.bf16 %v3673_v39  ;;  %v1659_v45 = vpack.c.bf16 %v410_v8, %v409_v7 }
  0x23   : > { %440 = vst [vmem:[#allocation2 + $0x49] sm:$0xff] %v407_v60  ;;  %441 = vst [vmem:[#allocation2 + $0x51] sm:$0xff] %v408_v61  ;;  %3926 = vmatpush3.bf16.msra.mxu1 %v4638_v36  ;;  %v415_v36 = vmax.f32 %v4881_v29, 0.0  ;;  %v4906_v41 = vadd.f32 %v4804_v20, %v347_v32  ;;  %v416_v46 = vmax.f32 %v4892_v35, 0.0  ;;  %v349_v48 = vmul.f32 %v3556_v38, %v4799_v19  ;;  %v3676_v61 = vld [vmem:[%s4787_s16 + $0x60] sm:$0xff]   ;;  %v3678_v29 = vld [vmem:[%s4787_s16 + $0x70] sm:$0xff]  }
  0x24   : > { %4118 = vmatpush3.bf16.msra.mxu0 %v4639_v37  ;;  %3959 = vmatprep.subr.bf16.mxu1 %v4640_v59  ;;  %442 = vst [vmem:[#allocation2 + $0x61] sm:$0xff] %v409_v7  ;;  %443 = vst [vmem:[#allocation2 + $0x69] sm:$0xff] %v410_v8  ;;  %v412_v22 = vmax.f32 %v380_v11, 0.0  ;;  %v4896_v37 = vadd.f32 %v4804_v20, %v346_v30  ;;  %v4917_v50 = vadd.f32 %v4804_v20, %v348_v42  ;;  %v4648_v30 = vld [vmem:[%s5470_s3 + $0x168] sm:$0xff]  }
  0x25   : > { %4151 = vmatprep.subr.bf16.mxu0 %v4641_v1  ;;  %444 = vst [vmem:[#allocation2 + $0x79] sm:$0xff] %v411_v12  ;;  %446 = vst [vmem:[#allocation2 + $0x91] sm:$0xff] %v413_v24  ;;  %v418_v49 = vmax.f32 %v4906_v41, 0.0  ;;  %v3560_v51 = vunpack.c.h.bf16 %v3673_v39  ;;  %v350_v52 = vmul.f32 %v3559_v43, %v4799_v19  ;;  %v4926_v55 = vadd.f32 %v4804_v20, %v349_v48  ;;  %v4650_v43 = vld [vmem:[%s5470_s3 + $0x170] sm:$0xff]  }
  0x26   : > { %3928 = vmatmul.mubr.bf16.vlgmr.msra.gmra.mrb[0].mxu1 %v1656_v47  ;;  %445 = vst [vmem:[#allocation2 + $0x81] sm:$0xff] %v412_v22  ;;  %447 = vst [vmem:[#allocation2 + $0x99] sm:$0xff] %v414_v31  ;;  %v417_v47 = vmax.f32 %v4896_v37, 0.0  ;;  %v1660_v54 = vpack.c.bf16 %v412_v22, %v411_v12  ;;  %v419_v58 = vmax.f32 %v4917_v50, 0.0  ;;  %v3564_v0 = vunpack.c.h.bf16 %v3674_v44  ;;  %v4651_v37 = vld [vmem:[%s5470_s3 + $0x178] sm:$0xff]  }
  0x27   : > { %4120 = vmatmul.mubr.bf16.vlgmr.msra.gmra.mrb[0].mxu0 %v1657_v6  ;;  %3960 = vmatpush3.bf16.msra.mxu1 %v4640_v59  ;;  %448 = vst [vmem:[#allocation2 + $0xa9] sm:$0xff] %v415_v36  ;;  %449 = vst [vmem:[#allocation2 + $0xb1] sm:$0xff] %v416_v46  ;;  %v351_v59 = vmul.f32 %v3560_v51, %v4799_v19  ;;  %v4934_v60 = vadd.f32 %v4804_v20, %v350_v52  ;;  %v420_v63 = vmax.f32 %v4926_v55, 0.0 }
  0x28   : > { %4152 = vmatpush3.bf16.msra.mxu0 %v4641_v1  ;;  %3931 = vmatprep.mubr.bf16.mxu1 %v1657_v6  ;;  %450 = vst [vmem:[#allocation2 + $0xc1] sm:$0xff] %v417_v47  ;;  %451 = vst [vmem:[#allocation2 + $0xc9] sm:$0xff] %v418_v49  ;;  %v352_v1 = vmul.f32 %v3563_v56, %v4799_v19  ;;  %v3567_v4 = vunpack.c.l.bf16 %v3675_v57  ;;  %v3568_v5 = vunpack.c.h.bf16 %v3675_v57  ;;  %v4647_v6 = vld [vmem:[%s5470_s3 + $0x160] sm:$0xff]   ;;  %v3571_v9 = vunpack.c.l.bf16 %v3676_v61 }
  0x29   : > { %4153 = vmatprep.subr.bf16.mxu0 %v4642_v21  ;;  %4123 = vmatprep.mubr.bf16.mxu0 %v4865_v15  ;;  %452 = vst [vmem:[#allocation2 + $0xd9] sm:$0xff] %v419_v58  ;;  %v4946_v2 = vadd.f32 %v4804_v20, %v351_v59  ;;  %v421_v3 = vmax.f32 %v4934_v60, 0.0  ;;  %453 = vst [vmem:[#allocation2 + $0xe1] sm:$0xff] %v420_v63  ;;  %v353_v7 = vmul.f32 %v3564_v0, %v4799_v19  ;;  %v1929_v44 = vld [vmem:[#allocation2 + $0x1a] sm:$0xff]  ;;  %v1930_v48 = vld [vmem:[#allocation2 + $0x22] sm:$0xff] }
  0x2a   : > { %3961 = vmatprep.subr.bf16.mxu1 %v4643_v27  ;;  %v4956_v8 = vadd.f32 %v4804_v20, %v352_v1  ;;  %v354_v11 = vmul.f32 %v3567_v4, %v4799_v19  ;;  %v355_v12 = vmul.f32 %v3568_v5, %v4799_v19  ;;  %v3572_v18 = vunpack.c.h.bf16 %v3676_v61  ;;  %v1931_v1 = vld [vmem:[#allocation2 + $0x32] sm:$0xff]  ;;  %v1932_v4 = vld [vmem:[#allocation2 + $0x3a] sm:$0xff] }
  0x2b   : > { %3962 = vmatpush3.bf16.msra.mxu1 %v4643_v27  ;;  %v422_v10 = vmax.f32 %v4946_v2, 0.0  ;;  %454 = vst [vmem:[#allocation2 + $0xf1] sm:$0xff] %v421_v3  ;;  %v4968_v16 = vadd.f32 %v4804_v20, %v353_v7  ;;  %v1661_v22 = vpack.c.bf16 %v414_v31, %v413_v24  ;;  %v1662_v25 = vpack.c.bf16 %v416_v46, %v415_v36  ;;  %v4653_v5 = vld [vmem:[%s5470_s3 + $0x180] sm:$0xff]   ;;  %v1934_v7 = vld [vmem:[#allocation2 + $0x52] sm:$0xff] }
  0x2c   : > { %4154 = vmatpush3.bf16.msra.mxu0 %v4642_v21  ;;  %3963 = vmatprep.subr.bf16.mxu1 %v4646_v34  ;;  %v423_v17 = vmax.f32 %v4956_v8, 0.0  ;;  %v356_v21 = vmul.f32 %v3571_v9, %v4799_v19  ;;  %v4981_v26 = vadd.f32 %v4804_v20, %v354_v11  ;;  %v4984_v27 = vadd.f32 %v4804_v20, %v355_v12  ;;  %v5074_v11 = vld [vmem:[%s5470_s3 + $0x80] sm:$0xff]   ;;  %v4659_v8 = vld [vmem:[%s5470_s3 + $0x198] sm:$0xff]  }
  0x2d   : > { %4155 = vmatprep.subr.bf16.mxu0 %v4644_v40  ;;  %455 = vst [vmem:[#allocation2 + $0xf9] sm:$0xff] %v422_v10  ;;  %v424_v28 = vmax.f32 %v4968_v16, 0.0  ;;  %v357_v14 = vmul.f32 %v3572_v18, %v4799_v19  ;;  %v3575_v24 = vunpack.c.l.bf16 %v3677_v13  ;;  %v3576_v33 = vunpack.c.h.bf16 %v3677_v13  ;;  %v1935_v2 = vld [vmem:[#allocation2 + $0x62] sm:$0xff]  ;;  %v1939_v16 = vld [vmem:[#allocation2 + $0x92] sm:$0xff] }
  0x2e   : > { %3932 = vmatmul.mubr.bf16.gmra.mrb[4].mxu1 %v4865_v15  ;;  %v4652_v15 = vld [vmem:[%s5470_s3 + $0x20] sm:$0xff]   ;;  %456 = vst [vmem:[#allocation2 + $0x109] sm:$0xff] %v423_v17  ;;  %v4991_v23 = vadd.f32 %v4804_v20, %v356_v21  ;;  %v425_v31 = vmax.f32 %v4981_v26, 0.0  ;;  %v426_v32 = vmax.f32 %v4984_v27, 0.0  ;;  %v3580_v42 = vunpack.c.h.bf16 %v3678_v29  ;;  %v1941_v26 = vld [vmem:[#allocation2 + $0xaa] sm:$0xff]  ;;  %v1942_v27 = vld [vmem:[#allocation2 + $0xb2] sm:$0xff] }
  0x2f   : > { %4124 = vmatmul.mubr.bf16.gmra.mrb[4].mxu0 %v1659_v45  ;;  %3935 = vmatprep.mubr.bf16.mxu1 %v1659_v45  ;;  %457 = vst [vmem:[#allocation2 + $0x111] sm:$0xff] %v424_v28  ;;  %v5005_v35 = vadd.f32 %v4804_v20, %v357_v14  ;;  %v358_v38 = vmul.f32 %v3575_v24, %v4799_v19 }
  0x30   : > { %4156 = vmatpush3.bf16.msra.mxu0 %v4644_v40  ;;  %4127 = vmatprep.mubr.bf16.mxu0 %v1660_v54  ;;  %v427_v36 = vmax.f32 %v4991_v23, 0.0  ;;  %458 = vst [vmem:[#allocation2 + $0x121] sm:$0xff] %v425_v31  ;;  %459 = vst [vmem:[#allocation2 + $0x129] sm:$0xff] %v426_v32  ;;  %v359_v39 = vmul.f32 %v3576_v33, %v4799_v19  ;;  %v3579_v40 = vunpack.c.l.bf16 %v3678_v29  ;;  %v1943_v23 = vld [vmem:[#allocation2 + $0xc2] sm:$0xff] }
  0x31   : > { %4157 = vmatprep.subr.bf16.mxu0 %v4645_v53  ;;  %3964 = vmatpush3.bf16.msra.mxu1 %v4646_v34  ;;  %v4654_v34 = vld [vmem:[%s5470_s3 + $0x28] sm:$0xff]   ;;  %v428_v45 = vmax.f32 %v5005_v35, 0.0  ;;  %v5021_v46 = vadd.f32 %v4804_v20, %v358_v38  ;;  %v1663_v57 = vpack.c.bf16 %v418_v49, %v417_v47  ;;  %v5045_v0 = vpack.c.bf16 %v1930_v48, %v1929_v44  ;;  %v4658_v49 = vld [vmem:[%s5470_s3 + $0x38] sm:$0xff]  }
  0x32   : > { %3965 = vmatprep.subr.bf16.mxu1 %v4649_v62  ;;  %460 = vst [vmem:[#allocation2 + $0x139] sm:$0xff] %v427_v36  ;;  %v5024_v51 = vadd.f32 %v4804_v20, %v359_v39  ;;  %v360_v52 = vmul.f32 %v3579_v40, %v4799_v19  ;;  %v573_v9 = vpack.c.bf16 %v420_v63, %v419_v58  ;;  %v4655_v58 = vld [vmem:[%s5470_s3 + $0x188] sm:$0xff]   ;;  %v1945_v35 = vld [vmem:[#allocation2 + $0xda] sm:$0xff] }
  0x33   : > { %461 = vst [vmem:[#allocation2 + $0x141] sm:$0xff] %v428_v45  ;;  %v429_v56 = vmax.f32 %v5021_v46, 0.0  ;;  %v5076_v12 = vpack.c.bf16 %v1932_v4, %v1931_v1  ;;  %v574_v13 = vpack.c.bf16 %v422_v10, %v421_v3  ;;  %v1936_v3 = vld [vmem:[#allocation2 + $0x6a] sm:$0xff]  ;;  %v575_v14 = vpack.c.bf16 %v424_v28, %v423_v17  ;;  %v1940_v17 = vld [vmem:[#allocation2 + $0x9a] sm:$0xff] }
  0x34   : > { %4158 = vmatpush3.bf16.msra.mxu0 %v4645_v53  ;;  %v361_v53 = vmul.f32 %v3580_v42, %v4799_v19  ;;  %v430_v59 = vmax.f32 %v5024_v51, 0.0  ;;  %v5040_v61 = vadd.f32 %v4804_v20, %v360_v52  ;;  %v4661_v28 = vld [vmem:[%s5470_s3 + $0x1a0] sm:$0xff]   ;;  %v5138_v38 = vpack.c.bf16 %v1942_v27, %v1941_v26  ;;  %v4663_v39 = vld [vmem:[%s5470_s3 + $0x1a8] sm:$0xff]   ;;  %v4665_v42 = vld [vmem:[%s5470_s3 + $0x1b0] sm:$0xff]  }
  0x35   : > { %4159 = vmatprep.subr.bf16.mxu0 %v4647_v6  ;;  %3966 = vmatpush3.bf16.msra.mxu1 %v4649_v62  ;;  %462 = vst [vmem:[#allocation2 + $0x151] sm:$0xff] %v429_v56  ;;  %v1944_v40 = vld [vmem:[#allocation2 + $0xca] sm:$0xff]  ;;  %v4667_v51 = vld [vmem:[%s5470_s3 + $0x1b8] sm:$0xff]   ;;  %v4668_v26 = vld [vmem:[%s5470_s3 + $0xa0] sm:$0xff]  }
  0x36   : > { %3936 = vmatmul.mubr.bf16.gmra.mrb[8].mxu1 %v1660_v54  ;;  %3967 = vmatprep.subr.bf16.mxu1 %v4652_v15  ;;  %v4656_v54 = vld [vmem:[%s5470_s3 + $0x30] sm:$0xff]   ;;  %v5043_v62 = vadd.f32 %v4804_v20, %v361_v53  ;;  %463 = vst [vmem:[#allocation2 + $0x159] sm:$0xff] %v430_v59  ;;  %v431_v41 = vmax.f32 %v5040_v61, 0.0  ;;  %v5154_v44 = vpack.c.bf16 %v1944_v40, %v1943_v23  ;;  %v470_v52 = vld [vmem:[#allocation2 + $0x18] sm:$0xff]  ;;  %v471_v53 = vld [vmem:[#allocation2 + $0x20] sm:$0xff] }
  0x37   : > { %4128 = vmatmul.mubr.bf16.gmra.mrb[8].mxu0 %v1661_v22  ;;  %3939 = vmatprep.mubr.bf16.mxu1 %v1661_v22  ;;  %v1937_v22 = vld [vmem:[#allocation2 + $0x7a] sm:$0xff]  ;;  %v1949_v61 = vld [vmem:[#allocation2 + $0x10a] sm:$0xff] }
  0x38   : > { %4160 = vmatpush3.bf16.msra.mxu0 %v4647_v6  ;;  %4131 = vmatprep.mubr.bf16.mxu0 %v1662_v25  ;;  %v432_v47 = vmax.f32 %v5043_v62, 0.0  ;;  %464 = vst [vmem:[#allocation2 + $0x169] sm:$0xff] %v431_v41  ;;  %v1933_v6 = vld [vmem:[#allocation2 + $0x4a] sm:$0xff]  ;;  %v1950_v62 = vld [vmem:[#allocation2 + $0x112] sm:$0xff] }
  0x39   : > { %4161 = vmatprep.subr.bf16.mxu0 %v4648_v30  ;;  %3968 = vmatpush3.bf16.msra.mxu1 %v4652_v15  ;;  %v3679_v15 = vld [vmem:[%s4787_s16 + $0x78] sm:$0xff]   ;;  %v5083_v18 = vpack.c.bf16 %v1934_v7, %v1933_v6  ;;  %v5178_v1 = vpack.c.bf16 %v1950_v62, %v1949_v61  ;;  %v474_v4 = vld [vmem:[#allocation2 + $0x48] sm:$0xff]  ;;  %v476_v7 = vld [vmem:[#allocation2 + $0x60] sm:$0xff]  ;;  %s5446_s16 = scalar_lea.vmem %s5471_s4, %s3487_s8 }
  0x3a   : > { %3969 = vmatprep.subr.bf16.mxu1 %v4654_v34  ;;  %465 = vst [vmem:[#allocation2 + $0x171] sm:$0xff] %v432_v47  ;;  %v3583_v50 = vunpack.c.l.bf16 %v3679_v15  ;;  %v3584_v55 = vunpack.c.h.bf16 %v3679_v15  ;;  %v4662_v6 = vld [vmem:[%s5470_s3 + $0x88] sm:$0xff]   ;;  %v483_v40 = vld [vmem:[#allocation2 + $0xb0] sm:$0xff] }
  0x3b   : > { %v1952_v15 = vld [vmem:[#allocation2 + $0x12a] sm:$0xff] }
  0x3c   : > { %4162 = vmatpush3.bf16.msra.mxu0 %v4648_v30  ;;  %v362_v60 = vmul.f32 %v3583_v50, %v4799_v19  ;;  %v363_v63 = vmul.f32 %v3584_v55, %v4799_v19  ;;  %v4657_v19 = vld [vmem:[%s5470_s3 + $0x190] sm:$0xff]   ;;  %v5108_v30 = vpack.c.bf16 %v1936_v3, %v1935_v2  ;;  %v1953_v50 = vld [vmem:[#allocation2 + $0x13a] sm:$0xff]  ;;  %v482_v23 = vld [vmem:[#allocation2 + $0xa8] sm:$0xff] }
  0x3d   : > { %4163 = vmatprep.subr.bf16.mxu0 %v4650_v43  ;;  %3970 = vmatpush3.bf16.msra.mxu1 %v4654_v34  ;;  %v578_v34 = vpack.c.bf16 %v430_v59, %v429_v56  ;;  %v472_v56 = vld [vmem:[#allocation2 + $0x30] sm:$0xff]  ;;  %v1948_v59 = vld [vmem:[#allocation2 + $0xfa] sm:$0xff] }
  0x3e   : > { %3940 = vmatmul.mubr.bf16.gmra.mrb[12].mxu1 %v1662_v25  ;;  %3971 = vmatprep.subr.bf16.mxu1 %v4656_v54  ;;  %v5094_v10 = vadd.f32 %v4804_v20, %v362_v60  ;;  %v5097_v21 = vadd.f32 %v4804_v20, %v363_v63  ;;  %v1938_v25 = vld [vmem:[#allocation2 + $0x82] sm:$0xff]  ;;  %v576_v20 = vpack.c.bf16 %v426_v32, %v425_v31  ;;  %v4664_v55 = vld [vmem:[%s5470_s3 + $0x90] sm:$0xff]   ;;  %v478_v3 = vld [vmem:[#allocation2 + $0x78] sm:$0xff] }
  0x3f   : > { %4132 = vmatmul.mubr.bf16.gmra.mrb[12].mxu0 %v1663_v57  ;;  %3943 = vmatprep.mubr.bf16.mxu1 %v1663_v57  ;;  %v5114_v33 = vpack.c.bf16 %v1938_v25, %v1937_v22  ;;  %v577_v31 = vpack.c.bf16 %v428_v45, %v427_v36  ;;  %v5132_v32 = vpack.c.bf16 %v1940_v17, %v1939_v16  ;;  %v1946_v36 = vld [vmem:[#allocation2 + $0xe2] sm:$0xff]  ;;  %v473_v57 = vld [vmem:[#allocation2 + $0x38] sm:$0xff] }
  0x40   : > { %4164 = vmatpush3.bf16.msra.mxu0 %v4650_v43  ;;  %4167 = vmatprep.mubr.bf16.mxu0 %v5045_v0  ;;  %v433_v24 = vmax.f32 %v5094_v10, 0.0  ;;  %v434_v29 = vmax.f32 %v5097_v21, 0.0  ;;  %v5152_v43 = vpack.c.bf16 %v432_v47, %v431_v41  ;;  %v4696_v45 = vld [vmem:[#allocation2] sm:$0xff]  ;;  %v5158_v48 = vpack.c.bf16 %v1946_v36, %v1945_v35  ;;  %v4666_v25 = vld [vmem:[%s5470_s3 + $0x98] sm:$0xff]  }
  0x41   : > { %4165 = vmatprep.subr.bf16.mxu0 %v4651_v37  ;;  %3972 = vmatpush3.bf16.msra.mxu1 %v4656_v54  ;;  %v5156_v46 = vpack.c.bf16 %v4696_v45, %v4696_v45  ;;  %v1947_v54 = vld [vmem:[#allocation2 + $0xf2] sm:$0xff]  ;;  %v5172_v41 = vpack.c.bf16 %v471_v53, %v470_v52  ;;  %v479_v22 = vld [vmem:[#allocation2 + $0x80] sm:$0xff]  ;;  %v1957_v16 = vld [vmem:[#allocation2 + $0x16a] sm:$0xff]  ;;  %v5234_v53 = vpack.c.bf16 %v483_v40, %v482_v23 }
  0x42   : > { %3973 = vmatprep.subr.bf16.mxu1 %v4658_v49  ;;  %466 = vst [vmem:[#allocation2 + $0x181] sm:$0xff] %v433_v24  ;;  %467 = vst [vmem:[#allocation2 + $0x189] sm:$0xff] %v434_v29  ;;  %v5174_v47 = vpack.c.bf16 %v1948_v59, %v1947_v54  ;;  %v1958_v17 = vld [vmem:[#allocation2 + $0x172] sm:$0xff]  ;;  %v5210_v27 = vpack.c.bf16 %v479_v22, %v478_v3  ;;  %v484_v35 = vld [vmem:[#allocation2 + $0xc0] sm:$0xff]  ;;  %v5228_v36 = vpack.c.bf16 %v434_v29, %v433_v24 }
  0x43   : > { %v4672_v52 = vld [vmem:[%s5470_s3 + $0xb0] sm:$0xff]   ;;  %v4674_v10 = vld [vmem:[%s5470_s3 + $0xb8] sm:$0xff]   ;;  %v487_v24 = vld [vmem:[#allocation2 + $0xe0] sm:$0xff] }
  0x44   : > { %4166 = vmatpush3.bf16.msra.mxu0 %v4651_v37  ;;  %v5170_v37 = vld [vmem:[%s5470_s3 + $0x1c0] sm:$0xff]   ;;  %v486_v21 = vld [vmem:[#allocation2 + $0xd8] sm:$0xff]  ;;  %v488_v29 = vld [vmem:[#allocation2 + $0xf0] sm:$0xff] }
  0x45   : > { %4199 = vmatprep.subr.bf16.mxu0 %v4653_v5  ;;  %3974 = vmatpush3.bf16.msra.mxu1 %v4658_v49  ;;  %v5176_v49 = vpack.c.bf16 %v473_v57, %v472_v56  ;;  %v489_v57 = vld [vmem:[#allocation2 + $0xf8] sm:$0xff]  ;;  %v5247_v59 = vld [vmem:[%s5470_s3 + $0xc0] sm:$0xff]   ;;  %v5249_v61 = vpack.c.bf16 %v487_v24, %v486_v21  ;;  %v496_v3 = vld [vmem:[#allocation2 + $0x150] sm:$0xff] }
  0x46   : > { %3944 = vmatmul.mubr.bf16.gmra.mrb[16].mxu1 %v573_v9  ;;  %4007 = vmatprep.subr.bf16.mxu1 %v5074_v11  ;;  %v477_v9 = vld [vmem:[#allocation2 + $0x68] sm:$0xff]  ;;  %v5251_v62 = vpack.c.bf16 %v489_v57, %v488_v29  ;;  %v497_v22 = vld [vmem:[#allocation2 + $0x158] sm:$0xff]  ;;  %v4688_v24 = vld [vmem:[%s5470_s3 + $0xf0] sm:$0xff]  }
  0x47   : > { %4168 = vmatmul.mubr.bf16.vlgmr.msra.gmra.mrb[0].mxu0 %v5076_v12  ;;  %3947 = vmatprep.mubr.bf16.mxu1 %v574_v13  ;;  %v1951_v13 = vld [vmem:[#allocation2 + $0x122] sm:$0xff]  ;;  %v5196_v2 = vpack.c.bf16 %v477_v9, %v476_v7  ;;  %v2541_v21 = vld [vmem:[#allocation2 + $0x39] sm:$0xff]  ;;  %v2543_v57 = vld [vmem:[#allocation2 + $0x51] sm:$0xff] }
  0x48   : > { %4200 = vmatpush3.bf16.msra.mxu0 %v4653_v5  ;;  %4171 = vmatprep.mubr.bf16.mxu0 %v5083_v18  ;;  %v475_v5 = vld [vmem:[#allocation2 + $0x50] sm:$0xff]  ;;  %v5194_v63 = vpack.c.bf16 %v1952_v15, %v1951_v13  ;;  %v492_v7 = vld [vmem:[#allocation2 + $0x120] sm:$0xff]  ;;  %v493_v9 = vld [vmem:[#allocation2 + $0x128] sm:$0xff] }
  0x49   : > { %4201 = vmatprep.subr.bf16.mxu0 %v4655_v58  ;;  %v5192_v60 = vpack.c.bf16 %v475_v5, %v474_v4  ;;  %v1960_v45 = vld [vmem:[#allocation2 + $0x18a] sm:$0xff] }
  0x4a   : > { %v4671_v4 = vld [vmem:[%s5470_s3 + $0x1c8] sm:$0xff]   ;;  %v4673_v13 = vld [vmem:[%s5470_s3 + $0x1d0] sm:$0xff]  }
  0x4b   : > { %v490_v5 = vld [vmem:[#allocation2 + $0x108] sm:$0xff] }
  0x4c   : > { %4202 = vmatpush3.bf16.msra.mxu0 %v4655_v58  ;;  %v1954_v58 = vld [vmem:[#allocation2 + $0x142] sm:$0xff] }
  0x4d   : > { %4203 = vmatprep.subr.bf16.mxu0 %v4657_v19 }
  0x4e   : > { %3948 = vmatmul.mubr.bf16.gmra.mrb[20].mxu1 %v575_v14  ;;  %v1955_v14 = vld [vmem:[#allocation2 + $0x152] sm:$0xff] }
  0x4f   : > { %4172 = vmatmul.mubr.bf16.gmra.mrb[4].mxu0 %v5108_v30  ;;  %3951 = vmatprep.mubr.bf16.mxu1 %v576_v20  ;;  %v1956_v20 = vld [vmem:[#allocation2 + $0x15a] sm:$0xff] }
  0x50   : > { %4175 = vmatprep.mubr.bf16.mxu0 %v5114_v33  ;;  %4204 = vmatpush3.bf16.msra.mxu0 %v4657_v19  ;;  %v480_v19 = vld [vmem:[#allocation2 + $0x90] sm:$0xff] }
  0x51   : > { %4205 = vmatprep.subr.bf16.mxu0 %v4659_v8 }
  0x54   : > { %4206 = vmatpush3.bf16.msra.mxu0 %v4659_v8  ;;  %v481_v8 = vld [vmem:[#allocation2 + $0x98] sm:$0xff] }
  0x55   : > { %4207 = vmatprep.subr.bf16.mxu0 %v4661_v28 }
  0x56   : > { %3952 = vmatmul.mubr.bf16.gmra.mrb[24].mxu1 %v577_v31  ;;  %v5214_v31 = vpack.c.bf16 %v481_v8, %v480_v19  ;;  %v498_v8 = vld [vmem:[#allocation2 + $0x168] sm:$0xff] }
  0x57   : > { %4176 = vmatmul.mubr.bf16.gmra.mrb[8].mxu0 %v5132_v32  ;;  %3955 = vmatprep.mubr.bf16.mxu1 %v578_v34  ;;  %v5216_v34 = vpack.c.bf16 %v1958_v17, %v1957_v16  ;;  %v499_v16 = vld [vmem:[#allocation2 + $0x170] sm:$0xff]  ;;  %v1014_v17 = vld [vmem:[#allocation2 + $0x2] sm:$0xff] }
  0x58   : > { %4179 = vmatprep.mubr.bf16.mxu0 %v5138_v38  ;;  %4208 = vmatpush3.bf16.msra.mxu0 %v4661_v28  ;;  %v5212_v28 = vpack.c.bf16 %v1956_v20, %v1955_v14  ;;  %v5281_v14 = vpack.c.bf16 %v497_v22, %v496_v3  ;;  %v4679_v20 = vld [vmem:[%s5470_s3 + $0x1e8] sm:$0xff]   ;;  %v5293_v23 = vpack.c.bf16 %v499_v16, %v498_v8  ;;  %v2551_v3 = vld [vmem:[#allocation2 + $0xb1] sm:$0xff] }
  0x59   : > { %4209 = vmatprep.subr.bf16.mxu0 %v4663_v39  ;;  %v2552_v22 = vld [vmem:[#allocation2 + $0xc1] sm:$0xff] }
  0x5c   : > { %4210 = vmatpush3.bf16.msra.mxu0 %v4663_v39  ;;  %v4670_v39 = vld [vmem:[%s5470_s3 + $0xa8] sm:$0xff]  }
  0x5d   : > { %4211 = vmatprep.subr.bf16.mxu0 %v4665_v42 }
  0x5e   : > { %3956 = vmatmul.mubr.bf16.gmra.mrb[28].mxu1 %v5152_v43 }
  0x5f   : > { %4180 = vmatmul.mubr.bf16.gmra.mrb[12].mxu0 %v5154_v44  ;;  %3975 = vmatprep.mubr.bf16.mxu1 %v5156_v46 }
  0x60   : > { %4183 = vmatprep.mubr.bf16.mxu0 %v5158_v48  ;;  %4212 = vmatpush3.bf16.msra.mxu0 %v4665_v42  ;;  %v1959_v42 = vld [vmem:[#allocation2 + $0x182] sm:$0xff] }
  0x61   : > { %4213 = vmatprep.subr.bf16.mxu0 %v4667_v51  ;;  %v1976_v54 = vpack.c.bf16 %v1960_v45, %v1959_v42  ;;  %v4685_v42 = vld [vmem:[%s5470_s3 + $0x200] sm:$0xff]   ;;  %v4678_v45 = vld [vmem:[%s5470_s3 + $0xc8] sm:$0xff]  }
  0x64   : > { %4214 = vmatpush3.bf16.msra.mxu0 %v4667_v51  ;;  %v485_v51 = vld [vmem:[#allocation2 + $0xc8] sm:$0xff] }
  0x65   : > { %4247 = vmatprep.subr.bf16.mxu0 %v5170_v37  ;;  %v5236_v56 = vpack.c.bf16 %v485_v51, %v484_v35  ;;  %v4683_v35 = vld [vmem:[%s5470_s3 + $0x1f8] sm:$0xff]   ;;  %v4680_v51 = vld [vmem:[%s5470_s3 + $0xd0] sm:$0xff]  }
  0x66   : > { %3976 = vmatmul.mubr.bf16.vlgmr.msra.gmra.mrb[0].mxu1 %v5172_v41 }
  0x67   : > { %4184 = vmatmul.mubr.bf16.gmra.mrb[16].mxu0 %v5174_v47  ;;  %4008 = vmatpush3.bf16.msra.mxu1 %v5074_v11  ;;  %v5198_v11 = vpack.c.bf16 %v1954_v58, %v1953_v50  ;;  %v5267_v50 = vpack.c.bf16 %v493_v9, %v492_v7  ;;  %v495_v58 = vld [vmem:[#allocation2 + $0x140] sm:$0xff]  ;;  %v4687_v7 = vld [vmem:[%s5470_s3 + $0x208] sm:$0xff]   ;;  %v2548_v9 = vld [vmem:[#allocation2 + $0x91] sm:$0xff] }
  0x68   : > { %3979 = vmatprep.mubr.bf16.mxu1 %v5176_v49  ;;  %4187 = vmatprep.mubr.bf16.mxu0 %v5178_v1 }
  0x69   : > { %4009 = vmatprep.subr.bf16.mxu1 %v4662_v6 }
  0x6b   : > { %4010 = vmatpush3.bf16.msra.mxu1 %v4662_v6  ;;  %v491_v6 = vld [vmem:[#allocation2 + $0x110] sm:$0xff] }
  0x6c   : > { %4011 = vmatprep.subr.bf16.mxu1 %v4664_v55  ;;  %v5265_v15 = vpack.c.bf16 %v491_v6, %v490_v5 }
  0x6e   : > { %3980 = vmatmul.mubr.bf16.gmra.mrb[4].mxu1 %v5192_v60 }
  0x6f   : > { %4188 = vmatmul.mubr.bf16.gmra.mrb[20].mxu0 %v5194_v63  ;;  %3983 = vmatprep.mubr.bf16.mxu1 %v5196_v2 }
  0x70   : > { %4191 = vmatprep.mubr.bf16.mxu0 %v5198_v11  ;;  %4012 = vmatpush3.bf16.msra.mxu1 %v4664_v55  ;;  %v4675_v55 = vld [vmem:[%s5470_s3 + $0x1d8] sm:$0xff]  }
  0x71   : > { %4013 = vmatprep.subr.bf16.mxu1 %v4666_v25 }
  0x74   : > { %4014 = vmatpush3.bf16.msra.mxu1 %v4666_v25  ;;  %v4677_v25 = vld [vmem:[%s5470_s3 + $0x1e0] sm:$0xff]  }
  0x75   : > { %4015 = vmatprep.subr.bf16.mxu1 %v4668_v26 }
  0x76   : > { %3984 = vmatmul.mubr.bf16.gmra.mrb[8].mxu1 %v5210_v27 }
  0x77   : > { %4192 = vmatmul.mubr.bf16.gmra.mrb[24].mxu0 %v5212_v28  ;;  %3987 = vmatprep.mubr.bf16.mxu1 %v5214_v31 }
  0x78   : > { %4195 = vmatprep.mubr.bf16.mxu0 %v5216_v34  ;;  %4016 = vmatpush3.bf16.msra.mxu1 %v4668_v26  ;;  %v1015_v26 = vld [vmem:[#allocation2 + $0xa] sm:$0xff] }
  0x79   : > { %4017 = vmatprep.subr.bf16.mxu1 %v4670_v39  ;;  %v1046_v40 = vpack.c.bf16 %v1015_v26, %v1014_v17  ;;  %v2555_v17 = vld [vmem:[#allocation2 + $0xe1] sm:$0xff]  ;;  %v2556_v26 = vld [vmem:[#allocation2 + $0xf1] sm:$0xff] }
  0x7c   : > { %4018 = vmatpush3.bf16.msra.mxu1 %v4670_v39  ;;  %v4681_v39 = vld [vmem:[%s5470_s3 + $0x1f0] sm:$0xff]  }
  0x7d   : > { %4019 = vmatprep.subr.bf16.mxu1 %v4672_v52 }
  0x7e   : > { %3988 = vmatmul.mubr.bf16.gmra.mrb[12].mxu1 %v5234_v53 }
  0x7f   : > { %4196 = vmatmul.mubr.bf16.gmra.mrb[28].mxu0 %v1976_v54  ;;  %3991 = vmatprep.mubr.bf16.mxu1 %v5236_v56  ;;  %v4684_v54 = vld [vmem:[%s5470_s3 + $0xe0] sm:$0xff]  }
  0x80   : > { %4215 = vmatprep.mubr.bf16.mxu0 %v5176_v49  ;;  %4020 = vmatpush3.bf16.msra.mxu1 %v4672_v52  ;;  %v4682_v52 = vld [vmem:[%s5470_s3 + $0xd8] sm:$0xff]  }
  0x81   : > { %4021 = vmatprep.subr.bf16.mxu1 %v4674_v10 }
  0x84   : > { %4022 = vmatpush3.bf16.msra.mxu1 %v4674_v10 }
  0x85   : > { %4055 = vmatprep.subr.bf16.mxu1 %v5247_v59 }
  0x86   : > { %3992 = vmatmul.mubr.bf16.gmra.mrb[16].mxu1 %v5249_v61 }
  0x87   : > { %4216 = vmatmul.mubr.bf16.vlgmr.msra.gmra.mrb[0].mxu0 %v5192_v60  ;;  %3995 = vmatprep.mubr.bf16.mxu1 %v5251_v62 }
  0x88   : > { %4248 = vmatpush3.bf16.msra.mxu0 %v5170_v37  ;;  %4219 = vmatprep.mubr.bf16.mxu0 %v5196_v2  ;;  %v494_v37 = vld [vmem:[#allocation2 + $0x138] sm:$0xff] }
  0x89   : > { %4249 = vmatprep.subr.bf16.mxu0 %v4671_v4  ;;  %v5279_v19 = vpack.c.bf16 %v495_v58, %v494_v37 }
  0x8c   : > { %4250 = vmatpush3.bf16.msra.mxu0 %v4671_v4  ;;  %v2545_v4 = vld [vmem:[#allocation2 + $0x69] sm:$0xff] }
  0x8d   : > { %4251 = vmatprep.subr.bf16.mxu0 %v4673_v13 }
  0x8e   : > { %3996 = vmatmul.mubr.bf16.gmra.mrb[20].mxu1 %v5265_v15 }
  0x8f   : > { %4220 = vmatmul.mubr.bf16.gmra.mrb[4].mxu0 %v5210_v27  ;;  %3999 = vmatprep.mubr.bf16.mxu1 %v5267_v50 }
  0x90   : > { %4223 = vmatprep.mubr.bf16.mxu0 %v5214_v31  ;;  %4252 = vmatpush3.bf16.msra.mxu0 %v4673_v13  ;;  %v2549_v13 = vld [vmem:[#allocation2 + $0x99] sm:$0xff] }
  0x91   : > { %4253 = vmatprep.subr.bf16.mxu0 %v4675_v55  ;;  %v2576_v58 = vpack.c.bf16 %v2549_v13, %v2548_v9 }
  0x94   : > { %4254 = vmatpush3.bf16.msra.mxu0 %v4675_v55  ;;  %v4689_v55 = vld [vmem:[%s5470_s3 + $0x210] sm:$0xff]  }
  0x95   : > { %4255 = vmatprep.subr.bf16.mxu0 %v4677_v25 }
  0x96   : > { %4000 = vmatmul.mubr.bf16.gmra.mrb[24].mxu1 %v5279_v19 }
  0x97   : > { %4224 = vmatmul.mubr.bf16.gmra.mrb[8].mxu0 %v5234_v53  ;;  %4003 = vmatprep.mubr.bf16.mxu1 %v5281_v14 }
  0x98   : > { %4227 = vmatprep.mubr.bf16.mxu0 %v5236_v56  ;;  %4256 = vmatpush3.bf16.msra.mxu0 %v4677_v25  ;;  %v2553_v25 = vld [vmem:[#allocation2 + $0xc9] sm:$0xff] }
  0x99   : > { %4257 = vmatprep.subr.bf16.mxu0 %v4679_v20  ;;  %v2578_v16 = vpack.c.bf16 %v2553_v25, %v2552_v22  ;;  %v2861_v22 = vld [vmem:[#allocation2 + $0xf2] sm:$0xff] }
  0x9c   : > { %4258 = vmatpush3.bf16.msra.mxu0 %v4679_v20  ;;  %v4692_v20 = vld [vmem:[%s5470_s3 + $0x220] sm:$0xff]  }
  0x9d   : > { %4259 = vmatprep.subr.bf16.mxu0 %v4681_v39 }
  0x9e   : > { %4004 = vmatmul.mubr.bf16.gmra.mrb[28].mxu1 %v5293_v23 }
  0x9f   : > { %4228 = vmatmul.mubr.bf16.gmra.mrb[12].mxu0 %v5249_v61  ;;  %4023 = vmatprep.mubr.bf16.mxu1 %v1046_v40  ;;  %v4694_v40 = vld [vmem:[%s5470_s3 + $0x230] sm:$0xff]  }
  0xa0   : > { %4231 = vmatprep.mubr.bf16.mxu0 %v5251_v62  ;;  %4260 = vmatpush3.bf16.msra.mxu0 %v4681_v39  ;;  %v2557_v39 = vld [vmem:[#allocation2 + $0xf9] sm:$0xff] }
  0xa1   : > { %4261 = vmatprep.subr.bf16.mxu0 %v4683_v35 }
  0xa4   : > { %4262 = vmatpush3.bf16.msra.mxu0 %v4683_v35 }
  0xa5   : > { %4295 = vmatprep.subr.bf16.mxu0 %v4685_v42 }
  0xa6   : > { %4024 = vmatmul.mubr.bf16.vlgmr.msra.gmra.mrb[0].mxu1 %v5045_v0  ;;  %v2263_v0 = vld [vmem:[#allocation2 + $0x180] sm:$0xff] }
  0xa7   : > { %4232 = vmatmul.mubr.bf16.gmra.mrb[16].mxu0 %v5265_v15  ;;  %4056 = vmatpush3.bf16.msra.mxu1 %v5247_v59  ;;  %v2544_v59 = vld [vmem:[#allocation2 + $0x61] sm:$0xff] }
  0xa8   : > { %4027 = vmatprep.mubr.bf16.mxu1 %v5076_v12  ;;  %4235 = vmatprep.mubr.bf16.mxu0 %v5267_v50  ;;  %v2264_v12 = vld [vmem:[#allocation2 + $0x188] sm:$0xff]  ;;  %v2574_v6 = vpack.c.bf16 %v2545_v4, %v2544_v59 }
  0xa9   : > { %4057 = vmatprep.subr.bf16.mxu1 %v4678_v45  ;;  %v5325_v10 = vpack.c.bf16 %v2264_v12, %v2263_v0 }
  0xab   : > { %4058 = vmatpush3.bf16.msra.mxu1 %v4678_v45  ;;  %v2559_v45 = vld [vmem:[#allocation2 + $0x111] sm:$0xff] }
  0xac   : > { %4059 = vmatprep.subr.bf16.mxu1 %v4680_v51 }
  0xae   : > { %4028 = vmatmul.mubr.bf16.gmra.mrb[4].mxu1 %v5083_v18  ;;  %v4686_v18 = vld [vmem:[%s5470_s3 + $0xe8] sm:$0xff]  }
  0xaf   : > { %4236 = vmatmul.mubr.bf16.gmra.mrb[20].mxu0 %v5279_v19  ;;  %4031 = vmatprep.mubr.bf16.mxu1 %v5108_v30  ;;  %v2540_v30 = vld [vmem:[#allocation2 + $0x31] sm:$0xff] }
  0xb0   : > { %4239 = vmatprep.mubr.bf16.mxu0 %v5281_v14  ;;  %4060 = vmatpush3.bf16.msra.mxu1 %v4680_v51  ;;  %v2572_v29 = vpack.c.bf16 %v2541_v21, %v2540_v30  ;;  %v2560_v51 = vld [vmem:[#allocation2 + $0x121] sm:$0xff]  ;;  %v2565_v30 = vld [vmem:[#allocation2 + $0x159] sm:$0xff] }
  0xb1   : > { %4061 = vmatprep.subr.bf16.mxu1 %v4682_v52 }
  0xb4   : > { %4062 = vmatpush3.bf16.msra.mxu1 %v4682_v52  ;;  %v2561_v52 = vld [vmem:[#allocation2 + $0x129] sm:$0xff] }
  0xb5   : > { %4063 = vmatprep.subr.bf16.mxu1 %v4684_v54  ;;  %v5386_v12 = vpack.c.bf16 %v2561_v52, %v2560_v51  ;;  %v2874_v51 = vld [vmem:[#allocation2 + $0x18a] sm:$0xff] }
  0xb6   : > { %4032 = vmatmul.mubr.bf16.gmra.mrb[8].mxu1 %v5114_v33  ;;  %v4690_v33 = vld [vmem:[%s5470_s3 + $0xf8] sm:$0xff]  }
  0xb7   : > { %4240 = vmatmul.mubr.bf16.gmra.mrb[24].mxu0 %v5293_v23  ;;  %4035 = vmatprep.mubr.bf16.mxu1 %v5132_v32  ;;  %v2542_v32 = vld [vmem:[#allocation2 + $0x49] sm:$0xff] }
  0xb8   : > { %4243 = vmatprep.mubr.bf16.mxu0 %v5325_v10  ;;  %4064 = vmatpush3.bf16.msra.mxu1 %v4684_v54  ;;  %v2573_v5 = vpack.c.bf16 %v2543_v57, %v2542_v32  ;;  %v4698_v54 = vld [vmem:[%s5470_s3 + $0x108] sm:$0xff]   ;;  %v2846_v32 = vld [vmem:[#allocation2 + $0x3a] sm:$0xff] }
  0xb9   : > { %4065 = vmatprep.subr.bf16.mxu1 %v4686_v18  ;;  %v4702_v57 = vld [vmem:[%s5470_s3 + $0x128] sm:$0xff]  }
  0xbc   : > { %4066 = vmatpush3.bf16.msra.mxu1 %v4686_v18  ;;  %v2564_v18 = vld [vmem:[#allocation2 + $0x151] sm:$0xff] }
  0xbd   : > { %4067 = vmatprep.subr.bf16.mxu1 %v4688_v24 }
  0xbe   : > { %4036 = vmatmul.mubr.bf16.gmra.mrb[12].mxu1 %v5138_v38  ;;  %v5349_v38 = vld [vmem:[%s5470_s3 + $0x100] sm:$0xff]  }
  0xbf   : > { %4244 = vmatmul.mubr.bf16.gmra.mrb[28].mxu0 %v5156_v46  ;;  %4039 = vmatprep.mubr.bf16.mxu1 %v5154_v44  ;;  %v2546_v44 = vld [vmem:[#allocation2 + $0x79] sm:$0xff]  ;;  %v2547_v46 = vld [vmem:[#allocation2 + $0x81] sm:$0xff] }
  0xc0   : > { %4263 = vmatprep.mubr.bf16.mxu0 %v2572_v29  ;;  %4068 = vmatpush3.bf16.msra.mxu1 %v4688_v24  ;;  %v2575_v37 = vpack.c.bf16 %v2547_v46, %v2546_v44  ;;  %v4700_v24 = vld [vmem:[%s5470_s3 + $0x118] sm:$0xff]   ;;  %v4701_v29 = vld [vmem:[%s5470_s3 + $0x120] sm:$0xff]  }
  0xc1   : > { %4069 = vmatprep.subr.bf16.mxu1 %v4690_v33  ;;  %v2853_v44 = vld [vmem:[#allocation2 + $0x92] sm:$0xff]  ;;  %v2854_v46 = vld [vmem:[#allocation2 + $0x9a] sm:$0xff] }
  0xc2   : > { %v2881_v13 = vpack.c.bf16 %v2854_v46, %v2853_v44 }
  0xc4   : > { %4070 = vmatpush3.bf16.msra.mxu1 %v4690_v33  ;;  %v2845_v33 = vld [vmem:[#allocation2 + $0x32] sm:$0xff] }
  0xc5   : > { %4343 = vmatprep.subr.bf16.mxu1 %v5349_v38  ;;  %v2877_v4 = vpack.c.bf16 %v2846_v32, %v2845_v33 }
  0xc6   : > { %4040 = vmatmul.mubr.bf16.gmra.mrb[16].mxu1 %v5158_v48  ;;  %v4691_v48 = vld [vmem:[%s5470_s3 + $0x218] sm:$0xff]  }
  0xc7   : > { %4264 = vmatmul.mubr.bf16.vlgmr.msra.gmra.mrb[0].mxu0 %v2573_v5  ;;  %4043 = vmatprep.mubr.bf16.mxu1 %v5174_v47  ;;  %v2550_v47 = vld [vmem:[#allocation2 + $0xa9] sm:$0xff] }
  0xc8   : > { %4296 = vmatpush3.bf16.msra.mxu0 %v4685_v42  ;;  %4267 = vmatprep.mubr.bf16.mxu0 %v2574_v6  ;;  %v2577_v8 = vpack.c.bf16 %v2551_v3, %v2550_v47  ;;  %v5375_v42 = vpack.c.bf16 %v2557_v39, %v2556_v26  ;;  %v2850_v5 = vld [vmem:[#allocation2 + $0x6a] sm:$0xff]  ;;  %v4704_v6 = vld [vmem:[%s5470_s3 + $0x138] sm:$0xff]   ;;  %v2860_v3 = vld [vmem:[#allocation2 + $0xe2] sm:$0xff] }
  0xc9   : > { %4297 = vmatprep.subr.bf16.mxu0 %v4687_v7  ;;  %v2869_v26 = vld [vmem:[#allocation2 + $0x152] sm:$0xff] }
  0xcc   : > { %4298 = vmatpush3.bf16.msra.mxu0 %v4687_v7 }
  0xcd   : > { %4299 = vmatprep.subr.bf16.mxu0 %v4689_v55 }
  0xce   : > { %4044 = vmatmul.mubr.bf16.gmra.mrb[20].mxu1 %v5178_v1  ;;  %v4693_v1 = vld [vmem:[%s5470_s3 + $0x228] sm:$0xff]  }
  0xcf   : > { %4268 = vmatmul.mubr.bf16.gmra.mrb[4].mxu0 %v2575_v37  ;;  %4047 = vmatprep.mubr.bf16.mxu1 %v5194_v63  ;;  %v2554_v63 = vld [vmem:[#allocation2 + $0xd9] sm:$0xff] }
  0xd0   : > { %4271 = vmatprep.mubr.bf16.mxu0 %v2576_v58  ;;  %4300 = vmatpush3.bf16.msra.mxu0 %v4689_v55  ;;  %v5373_v35 = vpack.c.bf16 %v2555_v17, %v2554_v63  ;;  %v2855_v55 = vld [vmem:[#allocation2 + $0xaa] sm:$0xff]  ;;  %v2856_v37 = vld [vmem:[#allocation2 + $0xb2] sm:$0xff]  ;;  %v2857_v58 = vld [vmem:[#allocation2 + $0xc2] sm:$0xff] }
  0xd1   : > { %4301 = vmatprep.subr.bf16.mxu0 %v4691_v48  ;;  %v2868_v17 = vld [vmem:[#allocation2 + $0x142] sm:$0xff] }
  0xd4   : > { %4302 = vmatpush3.bf16.msra.mxu0 %v4691_v48  ;;  %v2882_v48 = vpack.c.bf16 %v2856_v37, %v2855_v55 }
  0xd5   : > { %4303 = vmatprep.subr.bf16.mxu0 %v4692_v20 }
  0xd6   : > { %4048 = vmatmul.mubr.bf16.gmra.mrb[24].mxu1 %v5198_v11  ;;  %v4695_v11 = vld [vmem:[%s5470_s3 + $0x238] sm:$0xff]  }
  0xd7   : > { %4272 = vmatmul.mubr.bf16.gmra.mrb[8].mxu0 %v2577_v8  ;;  %4051 = vmatprep.mubr.bf16.mxu1 %v5212_v28  ;;  %v2558_v28 = vld [vmem:[#allocation2 + $0x109] sm:$0xff]  ;;  %v2864_v8 = vld [vmem:[#allocation2 + $0x112] sm:$0xff] }
  0xd8   : > { %4275 = vmatprep.mubr.bf16.mxu0 %v2578_v16  ;;  %4304 = vmatpush3.bf16.msra.mxu0 %v4692_v20  ;;  %v5384_v0 = vpack.c.bf16 %v2559_v45, %v2558_v28  ;;  %v2865_v16 = vld [vmem:[#allocation2 + $0x122] sm:$0xff] }
  0xd9   : > { %4305 = vmatprep.subr.bf16.mxu0 %v4693_v1  ;;  %v1652_v28 = vld [vmem:[#allocation2 + $0x169] sm:$0xff] }
  0xda   : > { %v2873_v45 = vld [vmem:[#allocation2 + $0x182] sm:$0xff] }
  0xdc   : > { %4306 = vmatpush3.bf16.msra.mxu0 %v4693_v1 }
  0xdd   : > { %4307 = vmatprep.subr.bf16.mxu0 %v4694_v40 }
  0xde   : > { %4052 = vmatmul.mubr.bf16.gmra.mrb[28].mxu1 %v5216_v34  ;;  %v2563_v34 = vld [vmem:[#allocation2 + $0x141] sm:$0xff] }
  0xdf   : > { %4276 = vmatmul.mubr.bf16.gmra.mrb[12].mxu0 %v5373_v35  ;;  %4071 = vmatprep.mubr.bf16.mxu1 %v5172_v41  ;;  %v2562_v41 = vld [vmem:[#allocation2 + $0x139] sm:$0xff] }
  0xe0   : > { %4279 = vmatprep.mubr.bf16.mxu0 %v5375_v42  ;;  %4308 = vmatpush3.bf16.msra.mxu0 %v4694_v40  ;;  %v5396_v21 = vpack.c.bf16 %v2563_v34, %v2562_v41  ;;  %v2891_v41 = vpack.c.bf16 %v2874_v51, %v2873_v45  ;;  %v1654_v34 = vld [vmem:[#allocation2 + $0x181] sm:$0xff] }
  0xe1   : > { %4309 = vmatprep.subr.bf16.mxu0 %v4695_v11 }
  0xe4   : > { %4310 = vmatpush3.bf16.msra.mxu0 %v4695_v11  ;;  %v2872_v11 = vld [vmem:[#allocation2 + $0x172] sm:$0xff] }
  0xe6   : > { %4072 = vmatmul.mubr.bf16.vlgmr.msra.gmra.mrb[0].mxu1 %v5176_v49  ;;  %v5398_v49 = vpack.c.bf16 %v2565_v30, %v2564_v18  ;;  %v2876_v18 = vld [vmem:[#allocation2 + $0x1a2] sm:$0xff] }
  0xe7   : > { %4280 = vmatmul.mubr.bf16.gmra.mrb[16].mxu0 %v5384_v0  ;;  %4351 = vmatpush3.bf16.msra.mxu1 %v5349_v38 }
  0xe8   : > { %4075 = vmatprep.mubr.bf16.mxu1 %v5192_v60  ;;  %4283 = vmatprep.mubr.bf16.mxu0 %v5386_v12  ;;  %v4699_v60 = vld [vmem:[%s5470_s3 + $0x110] sm:$0xff]  }
  0xe9   : > { %4344 = vmatprep.subr.bf16.mxu1 %v4698_v54 }
  0xeb   : > { %4352 = vmatpush3.bf16.msra.mxu1 %v4698_v54  ;;  %v1655_v54 = vld [vmem:[#allocation2 + $0x189] sm:$0xff] }
  0xec   : > { %4345 = vmatprep.subr.bf16.mxu1 %v4699_v60  ;;  %v1671_v30 = vpack.c.bf16 %v1655_v54, %v1654_v34 }
  0xee   : > { %4076 = vmatmul.mubr.bf16.gmra.mrb[4].mxu1 %v5196_v2  ;;  %v2570_v2 = vld [vmem:[#allocation2 + $0x199] sm:$0xff] }
  0xef   : > { %4284 = vmatmul.mubr.bf16.gmra.mrb[20].mxu0 %v5396_v21  ;;  %4079 = vmatprep.mubr.bf16.mxu1 %v5210_v27  ;;  %v2571_v27 = vld [vmem:[#allocation2 + $0x1a1] sm:$0xff] }
  0xf0   : > { %4287 = vmatprep.mubr.bf16.mxu0 %v5398_v49  ;;  %4353 = vmatpush3.bf16.msra.mxu1 %v4699_v60  ;;  %v2587_v59 = vpack.c.bf16 %v2571_v27, %v2570_v2 }
  0xf1   : > { %4346 = vmatprep.subr.bf16.mxu1 %v4700_v24 }
  0xf4   : > { %4354 = vmatpush3.bf16.msra.mxu1 %v4700_v24 }
  0xf5   : > { %4347 = vmatprep.subr.bf16.mxu1 %v4701_v29 }
  0xf6   : > { %4080 = vmatmul.mubr.bf16.gmra.mrb[8].mxu1 %v5214_v31  ;;  %v2847_v31 = vld [vmem:[#allocation2 + $0x4a] sm:$0xff] }
  0xf7   : > { %4288 = vmatmul.mubr.bf16.gmra.mrb[24].mxu0 %v5152_v43  ;;  %4083 = vmatprep.mubr.bf16.mxu1 %v5234_v53  ;;  %v4703_v43 = vld [vmem:[%s5470_s3 + $0x130] sm:$0xff]   ;;  %v2849_v53 = vld [vmem:[#allocation2 + $0x62] sm:$0xff] }
  0xf8   : > { %4291 = vmatprep.mubr.bf16.mxu0 %v5228_v36  ;;  %4355 = vmatpush3.bf16.msra.mxu1 %v4701_v29  ;;  %v2848_v36 = vld [vmem:[#allocation2 + $0x52] sm:$0xff]  ;;  %v2879_v38 = vpack.c.bf16 %v2850_v5, %v2849_v53 }
  0xf9   : > { %4348 = vmatprep.subr.bf16.mxu1 %v4702_v57  ;;  %v2878_v7 = vpack.c.bf16 %v2848_v36, %v2847_v31 }
  0xfc   : > { %4356 = vmatpush3.bf16.msra.mxu1 %v4702_v57 }
  0xfd   : > { %4349 = vmatprep.subr.bf16.mxu1 %v4703_v43 }
  0xfe   : > { %4084 = vmatmul.mubr.bf16.gmra.mrb[12].mxu1 %v5236_v56  ;;  %v2851_v56 = vld [vmem:[#allocation2 + $0x7a] sm:$0xff] }
  0xff   : > { %4292 = vmatmul.mubr.bf16.gmra.mrb[28].mxu0 %v2587_v59  ;;  %4087 = vmatprep.mubr.bf16.mxu1 %v5249_v61  ;;  %v2852_v61 = vld [vmem:[#allocation2 + $0x82] sm:$0xff] }
 0x100   : > { %4311 = vmatprep.mubr.bf16.mxu0 %v2877_v4  ;;  %4357 = vmatpush3.bf16.msra.mxu1 %v4703_v43  ;;  %v2880_v9 = vpack.c.bf16 %v2852_v61, %v2851_v56 }
 0x101   : > { %4350 = vmatprep.subr.bf16.mxu1 %v4704_v6 }
 0x104   : > { %4358 = vmatpush3.bf16.msra.mxu1 %v4704_v6 }
 0x106   : > { %4088 = vmatmul.mubr.bf16.gmra.mrb[16].mxu1 %v5251_v62  ;;  %v2858_v62 = vld [vmem:[#allocation2 + $0xca] sm:$0xff] }
 0x107   : > { %4312 = vmatmul.mubr.bf16.vlgmr.msra.gmra.mrb[0].mxu0 %v2878_v7  ;;  %4091 = vmatprep.mubr.bf16.mxu1 %v5265_v15  ;;  %v2883_v47 = vpack.c.bf16 %v2858_v62, %v2857_v58  ;;  %v2859_v15 = vld [vmem:[#allocation2 + $0xda] sm:$0xff] }
 0x108   : > { %4315 = vmatprep.mubr.bf16.mxu0 %v2879_v38  ;;  %v2884_v25 = vpack.c.bf16 %v2860_v3, %v2859_v15 }
 0x10e   : > { %4092 = vmatmul.mubr.bf16.gmra.mrb[20].mxu1 %v5267_v50  ;;  %v2862_v50 = vld [vmem:[#allocation2 + $0xfa] sm:$0xff] }
 0x10f   : > { %4316 = vmatmul.mubr.bf16.gmra.mrb[4].mxu0 %v2880_v9  ;;  %4095 = vmatprep.mubr.bf16.mxu1 %v5279_v19  ;;  %v2885_v20 = vpack.c.bf16 %v2862_v50, %v2861_v22  ;;  %v2863_v19 = vld [vmem:[#allocation2 + $0x10a] sm:$0xff] }
 0x110   : > { %4319 = vmatprep.mubr.bf16.mxu0 %v2881_v13  ;;  %v2886_v1 = vpack.c.bf16 %v2864_v8, %v2863_v19 }
 0x116   : > { %4096 = vmatmul.mubr.bf16.gmra.mrb[24].mxu1 %v5281_v14  ;;  %v2866_v14 = vld [vmem:[#allocation2 + $0x12a] sm:$0xff] }
 0x117   : > { %4320 = vmatmul.mubr.bf16.gmra.mrb[8].mxu0 %v2882_v48  ;;  %4099 = vmatprep.mubr.bf16.mxu1 %v5293_v23  ;;  %v2887_v63 = vpack.c.bf16 %v2866_v14, %v2865_v16  ;;  %v2867_v23 = vld [vmem:[#allocation2 + $0x13a] sm:$0xff] }
 0x118   : > { %4323 = vmatprep.mubr.bf16.mxu0 %v2883_v47  ;;  %v2888_v39 = vpack.c.bf16 %v2868_v17, %v2867_v23 }
 0x11e   : > { %4100 = vmatmul.mubr.bf16.gmra.mrb[28].mxu1 %v5325_v10  ;;  %v2870_v10 = vld [vmem:[#allocation2 + $0x15a] sm:$0xff] }
 0x11f   : > { %4324 = vmatmul.mubr.bf16.gmra.mrb[12].mxu0 %v2884_v25  ;;  %4135 = vmatprep.mubr.bf16.mxu1 %v5373_v35  ;;  %v2889_v40 = vpack.c.bf16 %v2870_v10, %v2869_v26  ;;  %v2871_v35 = vld [vmem:[#allocation2 + $0x16a] sm:$0xff] }
 0x120   : > { %4327 = vmatprep.mubr.bf16.mxu0 %v2885_v20  ;;  %v2890_v52 = vpack.c.bf16 %v2872_v11, %v2871_v35 }
 0x126   : > { %4136 = vmatmul.mubr.bf16.vlgmr.msra.gmra.mrb[16].mxu1 %v5375_v42  ;;  %v1653_v42 = vld [vmem:[#allocation2 + $0x171] sm:$0xff] }
 0x127   : > { %4328 = vmatmul.mubr.bf16.gmra.mrb[16].mxu0 %v2886_v1  ;;  %4139 = vmatprep.mubr.bf16.mxu1 %v5384_v0  ;;  %v1670_v0 = vpack.c.bf16 %v1653_v42, %v1652_v28 }
 0x128   : > { %4331 = vmatprep.mubr.bf16.mxu0 %v2887_v63 }
 0x12e   : > { %4140 = vmatmul.mubr.bf16.gmra.mrb[20].mxu1 %v5386_v12  ;;  %v2875_v12 = vld [vmem:[#allocation2 + $0x19a] sm:$0xff] }
 0x12f   : > { %4332 = vmatmul.mubr.bf16.gmra.mrb[20].mxu0 %v2888_v39  ;;  %4143 = vmatprep.mubr.bf16.mxu1 %v5396_v21  ;;  %v2892_v21 = vpack.c.bf16 %v2876_v18, %v2875_v12 }
 0x130   : > { %4335 = vmatprep.mubr.bf16.mxu0 %v2889_v40 }
 0x136   : > { %4144 = vmatmul.mubr.bf16.gmra.mrb[24].mxu1 %v5398_v49 }
 0x137   : > { %4336 = vmatmul.mubr.bf16.gmra.mrb[24].mxu0 %v2890_v52  ;;  %4147 = vmatprep.mubr.bf16.mxu1 %v1670_v0 }
 0x138   : > { %4339 = vmatprep.mubr.bf16.mxu0 %v2891_v41 }
 0x13e   : > { %4148 = vmatmul.mubr.bf16.gmra.mrb[28].mxu1 %v1671_v30 }
 0x13f   : > { %4340 = vmatmul.mubr.bf16.gmra.mrb[28].mxu0 %v2892_v21 }
 0x1b9   : > { %v4073_v60 = vpop.f32.mrb[0].mxu1 }
 0x1ba   : > { %v1465_v24 = vpop.f32.mrb[1].mxu1 }
 0x1bb   : > { %v4074_v29 = vpop.f32.mrb[2].mxu1 }
 0x1bc   : > { %v1468_v2 = vpop.f32.mrb[3].mxu1 }
 0x1c1   : > { %v4077_v27 = vpop.f32.mrb[4].mxu1 }
 0x1c2   : > { %v1481_v33 = vpop.f32.mrb[5].mxu1 }
 0x1c3   : > { %v4078_v32 = vpop.f32.mrb[6].mxu1 }
 0x1c4   : > { %v1484_v57 = vpop.f32.mrb[7].mxu1 }
 0x1c9   : > { %v4081_v49 = vpop.f32.mrb[8].mxu1 }
 0x1ca   : > { %v1497_v59 = vpop.f32.mrb[9].mxu1 }
 0x1cb   : > { %v4082_v4 = vpop.f32.mrb[10].mxu1 }
 0x1cc   : > { %v1500_v43 = vpop.f32.mrb[11].mxu1 }
 0x1d1   : > { %v4085_v31 = vpop.f32.mrb[12].mxu1 }
 0x1d2   : > { %v1513_v36 = vpop.f32.mrb[13].mxu1 }
 0x1d3   : > { %v4086_v53 = vpop.f32.mrb[14].mxu1 }
 0x1d4   : > { %v1516_v5 = vpop.f32.mrb[15].mxu1 }
 0x1da   : > { %v4313_v6 = vpop.f32.mrb[0].mxu0 }
 0x1db   : > { %v4359_v7 = vadd.f32 %v4313_v6, %v4073_v60  ;;  %v2991_v38 = vpop.f32.mrb[1].mxu0 }
 0x1dc   : > { %v4360_v56 = vadd.f32 %v2991_v38, %v1465_v24  ;;  %v4314_v61 = vpop.f32.mrb[2].mxu0 }
 0x1dd   : > { %v4361_v44 = vadd.f32 %v4314_v61, %v4074_v29  ;;  %v2994_v46 = vpop.f32.mrb[3].mxu0 }
 0x1de   : > { %v4362_v9 = vadd.f32 %v2994_v46, %v1468_v2 }
 0x1df   : > { %v3593_v13 = vpack.c.bf16 %v4361_v44, %v4359_v7 }
 0x1e0   : > { %v3588_v55 = vpack.c.bf16 %v4362_v9, %v4360_v56 }
 0x1e1   : > { %3680 = vst [vmem:[%s5446_s16 + $0x8] sm:$0xff] %v3593_v13  }
 0x1e2   : > { %3589 = vst [vmem:[%s5446_s16] sm:$0xff] %v3588_v55   ;;  %v4317_v37 = vpop.f32.mrb[4].mxu0 }
 0x1e3   : > { %v4363_v58 = vadd.f32 %v4317_v37, %v4077_v27  ;;  %v3007_v62 = vpop.f32.mrb[5].mxu0 }
 0x1e4   : > { %v4364_v48 = vadd.f32 %v3007_v62, %v1481_v33  ;;  %v4318_v47 = vpop.f32.mrb[6].mxu0 }
 0x1e5   : > { %v4365_v15 = vadd.f32 %v4318_v47, %v4078_v32  ;;  %v3010_v3 = vpop.f32.mrb[7].mxu0 }
 0x1e6   : > { %v4366_v22 = vadd.f32 %v3010_v3, %v1484_v57 }
 0x1e7   : > { %v3603_v50 = vpack.c.bf16 %v4365_v15, %v4363_v58 }
 0x1e8   : > { %v3598_v25 = vpack.c.bf16 %v4366_v22, %v4364_v48 }
 0x1e9   : > { %3682 = vst [vmem:[%s5446_s16 + $0x18] sm:$0xff] %v3603_v50  }
 0x1ea   : > { %3681 = vst [vmem:[%s5446_s16 + $0x10] sm:$0xff] %v3598_v25   ;;  %v4321_v20 = vpop.f32.mrb[8].mxu0 }
 0x1eb   : > { %v4367_v19 = vadd.f32 %v4321_v20, %v4081_v49  ;;  %v3023_v8 = vpop.f32.mrb[9].mxu0 }
 0x1ec   : > { %v4368_v16 = vadd.f32 %v3023_v8, %v1497_v59  ;;  %v4322_v14 = vpop.f32.mrb[10].mxu0 }
 0x1ed   : > { %v4369_v1 = vadd.f32 %v4322_v14, %v4082_v4  ;;  %v3026_v63 = vpop.f32.mrb[11].mxu0 }
 0x1ee   : > { %v4370_v23 = vadd.f32 %v3026_v63, %v1500_v43 }
 0x1ef   : > { %v3613_v17 = vpack.c.bf16 %v4369_v1, %v4367_v19 }
 0x1f0   : > { %v3608_v26 = vpack.c.bf16 %v4370_v23, %v4368_v16 }
 0x1f1   : > { %3684 = vst [vmem:[%s5446_s16 + $0x28] sm:$0xff] %v3613_v17  }
 0x1f2   : > { %3683 = vst [vmem:[%s5446_s16 + $0x20] sm:$0xff] %v3608_v26   ;;  %v4325_v10 = vpop.f32.mrb[12].mxu0 }
 0x1f3   : > { %v4371_v39 = vadd.f32 %v4325_v10, %v4085_v31  ;;  %v3039_v40 = vpop.f32.mrb[13].mxu0 }
 0x1f4   : > { %v4372_v35 = vadd.f32 %v3039_v40, %v1513_v36  ;;  %v4326_v11 = vpop.f32.mrb[14].mxu0 }
 0x1f5   : > { %v4373_v28 = vadd.f32 %v4326_v11, %v4086_v53  ;;  %v3042_v42 = vpop.f32.mrb[15].mxu0 }
 0x1f6   : > { %v4374_v45 = vadd.f32 %v3042_v42, %v1516_v5 }
 0x1f7   : > { %v3623_v51 = vpack.c.bf16 %v4373_v28, %v4371_v39 }
 0x1f8   : > { %v3618_v52 = vpack.c.bf16 %v4374_v45, %v4372_v35 }
 0x1f9   : > { %3686 = vst [vmem:[%s5446_s16 + $0x38] sm:$0xff] %v3623_v51   ;;  %v4137_v0 = vpop.f32.mrb[16].mxu1 }
 0x1fa   : > { %3685 = vst [vmem:[%s5446_s16 + $0x30] sm:$0xff] %v3618_v52   ;;  %v4329_v41 = vpop.f32.mrb[16].mxu0  ;;  %v1834_v34 = vpop.f32.mrb[17].mxu1 }
 0x1fb   : > { %v4375_v54 = vadd.f32 %v4329_v41, %v4137_v0  ;;  %v3055_v12 = vpop.f32.mrb[17].mxu0  ;;  %v4138_v18 = vpop.f32.mrb[18].mxu1 }
 0x1fc   : > { %v4376_v30 = vadd.f32 %v3055_v12, %v1834_v34  ;;  %v4330_v21 = vpop.f32.mrb[18].mxu0  ;;  %v1837_v60 = vpop.f32.mrb[19].mxu1 }
 0x1fd   : > { %v4377_v24 = vadd.f32 %v4330_v21, %v4138_v18  ;;  %v3058_v29 = vpop.f32.mrb[19].mxu0 }
 0x1fe   : > { %v4378_v2 = vadd.f32 %v3058_v29, %v1837_v60 }
 0x1ff   : > { %v3633_v27 = vpack.c.bf16 %v4377_v24, %v4375_v54 }
 0x200   : > { %v3628_v33 = vpack.c.bf16 %v4378_v2, %v4376_v30 }
 0x201   : > { %3688 = vst [vmem:[%s5446_s16 + $0x48] sm:$0xff] %v3633_v27   ;;  %v4141_v32 = vpop.f32.mrb[20].mxu1 }
 0x202   : > { %3687 = vst [vmem:[%s5446_s16 + $0x40] sm:$0xff] %v3628_v33   ;;  %v4333_v57 = vpop.f32.mrb[20].mxu0  ;;  %v1850_v49 = vpop.f32.mrb[21].mxu1 }
 0x203   : > { %v4379_v59 = vadd.f32 %v4333_v57, %v4141_v32  ;;  %v3071_v4 = vpop.f32.mrb[21].mxu0  ;;  %v4142_v43 = vpop.f32.mrb[22].mxu1 }
 0x204   : > { %v4380_v31 = vadd.f32 %v3071_v4, %v1850_v49  ;;  %v4334_v36 = vpop.f32.mrb[22].mxu0  ;;  %v1853_v53 = vpop.f32.mrb[23].mxu1 }
 0x205   : > { %v4381_v5 = vadd.f32 %v4334_v36, %v4142_v43  ;;  %v3074_v6 = vpop.f32.mrb[23].mxu0 }
 0x206   : > { %v4382_v7 = vadd.f32 %v3074_v6, %v1853_v53 }
 0x207   : > { %v3643_v38 = vpack.c.bf16 %v4381_v5, %v4379_v59 }
 0x208   : > { %v3638_v56 = vpack.c.bf16 %v4382_v7, %v4380_v31 }
 0x209   : > { %3690 = vst [vmem:[%s5446_s16 + $0x58] sm:$0xff] %v3643_v38   ;;  %v4145_v61 = vpop.f32.mrb[24].mxu1 }
 0x20a   : > { %3689 = vst [vmem:[%s5446_s16 + $0x50] sm:$0xff] %v3638_v56   ;;  %v4337_v44 = vpop.f32.mrb[24].mxu0  ;;  %v1866_v46 = vpop.f32.mrb[25].mxu1 }
 0x20b   : > { %v4383_v9 = vadd.f32 %v4337_v44, %v4145_v61  ;;  %v3087_v13 = vpop.f32.mrb[25].mxu0  ;;  %v4146_v55 = vpop.f32.mrb[26].mxu1 }
 0x20c   : > { %v4384_v37 = vadd.f32 %v3087_v13, %v1866_v46  ;;  %v4338_v58 = vpop.f32.mrb[26].mxu0  ;;  %v1869_v62 = vpop.f32.mrb[27].mxu1 }
 0x20d   : > { %v4385_v48 = vadd.f32 %v4338_v58, %v4146_v55  ;;  %v3090_v47 = vpop.f32.mrb[27].mxu0 }
 0x20e   : > { %v4386_v15 = vadd.f32 %v3090_v47, %v1869_v62 }
 0x20f   : > { %v3653_v3 = vpack.c.bf16 %v4385_v48, %v4383_v9 }
 0x210   : > { %v3648_v22 = vpack.c.bf16 %v4386_v15, %v4384_v37 }
 0x211   : > { %3692 = vst [vmem:[%s5446_s16 + $0x68] sm:$0xff] %v3653_v3   ;;  %v4149_v50 = vpop.f32.mrb[28].mxu1 }
 0x212   : > { %3691 = vst [vmem:[%s5446_s16 + $0x60] sm:$0xff] %v3648_v22   ;;  %v4341_v25 = vpop.f32.mrb[28].mxu0  ;;  %v1882_v20 = vpop.f32.mrb[29].mxu1 }
 0x213   : > { %v4387_v19 = vadd.f32 %v4341_v25, %v4149_v50  ;;  %v3103_v8 = vpop.f32.mrb[29].mxu0  ;;  %v4150_v16 = vpop.f32.mrb[30].mxu1 }
 0x214   : > { %v4388_v14 = vadd.f32 %v3103_v8, %v1882_v20  ;;  %v4342_v1 = vpop.f32.mrb[30].mxu0  ;;  %v1885_v63 = vpop.f32.mrb[31].mxu1 }
 0x215   : > { %v4389_v23 = vadd.f32 %v4342_v1, %v4150_v16  ;;  %v3106_v17 = vpop.f32.mrb[31].mxu0 }
 0x216   : > { %v4390_v26 = vadd.f32 %v3106_v17, %v1885_v63 }
 0x217   : > { %v3663_v10 = vpack.c.bf16 %v4389_v23, %v4387_v19 }
 0x218   : > { %v3658_v39 = vpack.c.bf16 %v4390_v26, %v4388_v14 }
 0x219   : > { %3694 = vst [vmem:[%s5446_s16 + $0x78] sm:$0xff] %v3663_v10  }
 0x21a   : > { %3693 = vst [vmem:[%s5446_s16 + $0x70] sm:$0xff] %v3658_v39  }
 0x21b PF: > { %s14_s15 = sadd.s32 1, %s4711_s15  }
 0x21c   : > { %p11_p4 = scmp.ge.s32.totalorder %s14_s15, 4  }
 0x21e   :  { %13 = sbr.rel (!%p11_p4) target bundleno = 1 (0x1), region = 68 }

</bundles_post_ra>
